<compile_context>
chip_gen: v6e
topology: v6e:2x2x1
jax: 0.10.0
libtpu: 0.0.40
codegen_flags: <defaults>
</compile_context>

<pallas_src>
import jax
import jax.numpy as jnp
from jax.experimental import pallas as pl
from jax.experimental.pallas import tpu as pltpu


def _round_up(x, m):
    return -(-x // m) * m


# ----------------------------- Pallas kernel ------------------------------- #
def _top_kernel(out5_ref, embed_ref, p_ref,
                wlat_ref, blat_ref,
                w1a_ref, w1b_ref, b1_ref,
                w2_ref, b2_ref,
                w3_ref, b3_ref,
                wc_ref, bc_ref,
                emb_ref, logits_ref, sm_ref, lsm_ref):
    """One (batch b, point-tile j) step; all tensors are channel-major (C, tn)."""
    # Inputs arrive in f32 (no wrapper preprocessing pass); cast to bf16 here,
    # hidden under the input DMA.
    x = out5_ref[0].astype(jnp.bfloat16)      # (512, tn)
    e = embed_ref[0].astype(jnp.bfloat16)     # (1088, tn)
    p = p_ref[0]                              # (L0, tn)  f32 per-point class probs
    n_lat = p_ref.shape[1]                    # L0
    c_lat = blat_ref.shape[0] // n_lat        # 64
    k_cls = bc_ref.shape[0]                   # num part classes K

    # StackedLatentLinear: one lane-dense matmul on the flattened (L0*64, 512)
    # weight, then the probability-weighted mixture (== torch.bmm in _multiply).
    t = jnp.dot(wlat_ref[...], x, preferred_element_type=jnp.float32)   # (L0*64, tn)
    blat = blat_ref[...]                                                # (L0*64, 1)
    lat = p[0:1, :] * (t[0:c_lat, :] + blat[0:c_lat, :])
    for k in range(1, n_lat):
        lo = k * c_lat
        lat = lat + p[k:k + 1, :] * (t[lo:lo + c_lat, :] + blat[lo:lo + c_lat, :])
    lat = lat.astype(jnp.bfloat16)                                      # (64, tn)

    # convs1 on cat([embed, lat]) == W1a @ embed + W1b @ lat.
    # BN scale already folded into the weights; only bias + ReLU remain.
    h = (jnp.dot(w1a_ref[...], e, preferred_element_type=jnp.float32)
         + jnp.dot(w1b_ref[...], lat, preferred_element_type=jnp.float32))
    h = jnp.maximum(h + b1_ref[...], 0.0)                               # (256, tn)

    # convs2 + bns2 + relu
    h = jnp.dot(w2_ref[...], h.astype(jnp.bfloat16),
                preferred_element_type=jnp.float32)
    h = jnp.maximum(h + b2_ref[...], 0.0)                               # (256, tn)

    # convs3 + bns3 + relu   -> "embeddings" output (128 channels)
    h = jnp.dot(w3_ref[...], h.astype(jnp.bfloat16),
                preferred_element_type=jnp.float32)
    h = jnp.maximum(h + b3_ref[...], 0.0)                               # (128, tn)
    emb_ref[0] = h.astype(emb_ref.dtype)

    # PointClassifier head -> logits / softmax / log_softmax over channels.
    # wc is zero-padded to a multiple of 8 rows; slice back to K here so no
    # sentinel bias and no wrapper-side channel slicing are needed.
    logits_full = jnp.dot(wc_ref[...], h.astype(jnp.bfloat16),
                          preferred_element_type=jnp.float32)           # (Kpad, tn)
    logits = logits_full[:k_cls, :] + bc_ref[...]                       # (K, tn)
    logits_ref[0] = logits
    m = jnp.max(logits, axis=0, keepdims=True)
    z = logits - m
    ex = jnp.exp(z)
    s = jnp.sum(ex, axis=0, keepdims=True)
    sm_ref[0] = ex * pl.reciprocal(s, approx=True)      # divide on the EUP slot
    lsm_ref[0] = z - jnp.log(s)


# ------------------------------- wrapper ------------------------------------ #
def _vmem_limit_bytes(estimate):
    """vmem_limit derived from the chip's actual VMEM capacity + buffer math."""
    cap = 128 * 1024 * 1024
    try:
        info = pltpu.get_tpu_info()
        cap = int(getattr(info, "vmem_capacity_bytes", cap) or cap)
    except Exception:
        pass
    return int(min(max(estimate, 32 * 1024 * 1024), cap * 3 // 4))


def top_model_forward(out5, embed, probs, kp, num_classes, *, tn=1024,
                      embeddings_dtype=jnp.float32,
                      deep_buffer_activations=False):
    """out5: (B, 512, N), embed: (B, 1088, N), probs: (B*N, L0) — f32.

    kp: kernel-ready params from fold_params().  Returns the same dict as the
    PyTorch module: embeddings (B,128,N), logits/probs/log_probs (B*N, K).
    tn ~1024 suits v6e/v7x (try 2048 on v7x); ~512 on v5e if VMEM is tight.
    Set embeddings_dtype=jnp.bfloat16 to halve the largest store if downstream
    tolerates it; deep_buffer_activations=True gives the two big activation
    inputs a 3-deep pipeline (v6e, if DMA waits are still exposed).
    """
    B, c_pt, N = out5.shape
    c_emb = embed.shape[1]
    L0 = probs.shape[1]
    K = num_classes
    k_pad = kp["wc"].shape[0]

    # Tiny tensor: reshape per-point class probabilities to channel-major.
    probs_cm = jnp.transpose(probs.reshape(B, N, L0), (0, 2, 1)).astype(jnp.float32)

    # Point-tile on the lane axis.  No padding of the big inputs: Pallas masks
    # the ragged last block, and outputs are sized exactly (B, ., N).
    if N <= 128:
        tn_eff = N                                   # full extent, exact block
    else:
        tn_eff = max(128, min(_round_up(tn, 128), _round_up(N, 128)))
        # Guarantee >=2 grid steps so both v7x TensorCores get work.
        if B * pl.cdiv(N, tn_eff) < 2:
            tn_eff = max(128, _round_up(pl.cdiv(N, 2), 128))
    grid = (B, pl.cdiv(N, tn_eff))

    act_mode = pl.Buffered(buffer_count=3) if deep_buffer_activations else None

    def tile_spec(c, pipeline_mode=None):
        return pl.BlockSpec((1, c, tn_eff), lambda b, j: (b, 0, j),
                            pipeline_mode=pipeline_mode)

    def const_spec(a):
        # Constant index_map -> the block never changes; single-buffer it.
        return pl.BlockSpec(a.shape, lambda b, j: (0,) * a.ndim,
                            pipeline_mode=pl.Buffered(buffer_count=1))

    in_specs = [
        tile_spec(c_pt, act_mode), tile_spec(c_emb, act_mode), tile_spec(L0),
        const_spec(kp["wlat"]), const_spec(kp["blat"]),
        const_spec(kp["w1a"]), const_spec(kp["w1b"]), const_spec(kp["b1"]),
        const_spec(kp["w2"]), const_spec(kp["b2"]),
        const_spec(kp["w3"]), const_spec(kp["b3"]),
        const_spec(kp["wc"]), const_spec(kp["bc"]),
    ]
    out_specs = [tile_spec(128), tile_spec(K), tile_spec(K), tile_spec(K)]
    out_shapes = (
        jax.ShapeDtypeStruct((B, 128, N), embeddings_dtype),   # embeddings
        jax.ShapeDtypeStruct((B, K, N), jnp.float32),          # logits
        jax.ShapeDtypeStruct((B, K, N), jnp.float32),          # probs
        jax.ShapeDtypeStruct((B, K, N), jnp.float32),          # log_probs
    )

    # Rough VMEM budget: double-buffered f32 activation tiles + single-buffered
    # weights + output tiles + live f32 intermediates + compiler headroom.
    weight_bytes = sum(int(a.size) * a.dtype.itemsize for a in kp.values())
    est = (2 * tn_eff * 4 * (c_pt + c_emb + L0)
           + 2 * tn_eff * (128 * jnp.dtype(embeddings_dtype).itemsize + 3 * K * 4)
           + weight_bytes
           + tn_eff * 4 * (L0 * 64 + 2 * 256 + 128 + k_pad)
           + (8 << 20))

    grid_spec = pltpu.PrefetchScalarGridSpec(
        num_scalar_prefetch=0, grid=grid, in_specs=in_specs, out_specs=out_specs)

    emb_full, logits_full, sm_full, lsm_full = pl.pallas_call(
        _top_kernel,
        out_shape=out_shapes,
        grid_spec=grid_spec,
        compiler_params=pltpu.CompilerParams(
            dimension_semantics=("parallel", "parallel"),
            vmem_limit_bytes=_vmem_limit_bytes(est)),
    )(out5, embed, probs_cm,
      kp["wlat"], kp["blat"],
      kp["w1a"], kp["w1b"], kp["b1"],
      kp["w2"], kp["b2"],
      kp["w3"], kp["b3"],
      kp["wc"], kp["bc"])

    def to_point_major(a):           # (B, K, N) -> (B*N, K); tiny tensors
        return jnp.transpose(a, (0, 2, 1)).reshape(B * N, K)

    return {
        "embeddings": emb_full,                 # (B, 128, N) — channel-major, no slice
        "logits": to_point_major(logits_full),
        "probs": to_point_major(sm_full),
        "log_probs": to_point_major(lsm_full),
    }


# --------------------------- parameter building ----------------------------- #
def make_params(key, level_classes, *, c_embed=1088, c_point=512, c_lat=64):
    """Module-style f32 parameters (weights stored (out_channels, in_channels))."""
    L0, K = level_classes[0], level_classes[-1]
    ks = jax.random.split(key, 13)
    nrm = lambda k, s: (0.02 * jax.random.normal(k, s)).astype(jnp.float32)

    def bn_stats(k, c):
        gamma = jnp.ones((c,), jnp.float32)
        beta = 0.1 * jnp.ones((c,), jnp.float32)
        mean = 0.02 * jax.random.normal(k, (c,)).astype(jnp.float32)
        var = (1.0 + 0.1 * jnp.abs(
            jax.random.normal(jax.random.fold_in(k, 1), (c,)))).astype(jnp.float32)
        return gamma, beta, mean, var

    return dict(
        wlat=nrm(ks[0], (L0, c_lat, c_point)),     # per-class Linear(512->64)
        blat=nrm(ks[1], (L0, c_lat)),
        w1=nrm(ks[2], (256, c_embed + c_lat)),     # Conv1d(1152, 256, 1)
        b1=nrm(ks[3], (256,)), bn1=bn_stats(ks[4], 256),
        w2=nrm(ks[5], (256, 256)),
        b2=nrm(ks[6], (256,)), bn2=bn_stats(ks[7], 256),
        w3=nrm(ks[8], (128, 256)),
        b3=nrm(ks[9], (128,)), bn3=bn_stats(ks[10], 128),
        wc=nrm(ks[11], (K, 128)),                  # PointClassifier Conv1d(128, K, 1)
        bc=nrm(ks[12], (K,)),
    )


def _fold_bn(conv_bias, gamma, beta, mean, var, eps=1e-5):
    s = gamma / jnp.sqrt(var + eps)
    b = beta + (conv_bias - mean) * s
    return s.astype(jnp.float32), b.astype(jnp.float32)


def fold_params(raw, level_classes, *, c_embed=1088):
    """Kernel-ready params: BN scale folded into the weights (f32, pre-bf16 cast),
    channel-major, bf16 matmul operands, f32 biases."""
    L0, K = level_classes[0], level_classes[-1]
    c_lat = raw["blat"].shape[1]
    k_pad = max(8, _round_up(K, 8))
    bf = jnp.bfloat16

    s1, b1 = _fold_bn(raw["b1"], *raw["bn1"])
    s2, b2 = _fold_bn(raw["b2"], *raw["bn2"])
    s3, b3 = _fold_bn(raw["b3"], *raw["bn3"])

    w1 = raw["w1"] * s1[:, None]
    w2 = raw["w2"] * s2[:, None]
    w3 = raw["w3"] * s3[:, None]

    wc_pad = jnp.zeros((k_pad, 128), jnp.float32).at[:K].set(raw["wc"])

    return dict(
        wlat=raw["wlat"].reshape(L0 * c_lat, -1).astype(bf),   # (L0*64, 512)
        blat=raw["blat"].reshape(L0 * c_lat, 1).astype(jnp.float32),
        w1a=w1[:, :c_embed].astype(bf),                        # (256, 1088) scaled
        w1b=w1[:, c_embed:].astype(bf),                        # (256, 64)   scaled
        b1=b1.reshape(-1, 1),
        w2=w2.astype(bf), b2=b2.reshape(-1, 1),
        w3=w3.astype(bf), b3=b3.reshape(-1, 1),
        wc=wc_pad.astype(bf),                                  # zero pad rows only
        bc=raw["bc"].reshape(-1, 1).astype(jnp.float32),
    )


# --------------------------- pure-JAX reference ------------------------------ #
def _reference(out5, embed, probs, kp, K):
    """Point-major reference mirroring the kernel's bf16 casts and folded scales."""
    B, c_pt, N = out5.shape
    c_emb = embed.shape[1]
    BN = B * N
    L0 = probs.shape[1]
    c_lat = kp["blat"].shape[0] // L0

    x = jnp.transpose(out5, (0, 2, 1)).reshape(BN, c_pt).astype(jnp.bfloat16)
    e = jnp.transpose(embed, (0, 2, 1)).reshape(BN, c_emb).astype(jnp.bfloat16)
    p = probs.astype(jnp.float32)

    t = jnp.dot(x, kp["wlat"].T, preferred_element_type=jnp.float32)   # (BN, L0*64)
    blat = kp["blat"][:, 0]
    lat = p[:, 0:1] * (t[:, 0:c_lat] + blat[0:c_lat][None, :])
    for k in range(1, L0):
        lo = k * c_lat
        lat = lat + p[:, k:k + 1] * (t[:, lo:lo + c_lat] + blat[lo:lo + c_lat][None, :])
    lat = lat.astype(jnp.bfloat16)

    h = (jnp.dot(e, kp["w1a"].T, preferred_element_type=jnp.float32)
         + jnp.dot(lat, kp["w1b"].T, preferred_element_type=jnp.float32))
    h = jnp.maximum(h + kp["b1"][:, 0][None, :], 0.0)
    h = jnp.dot(h.astype(jnp.bfloat16), kp["w2"].T, preferred_element_type=jnp.float32)
    h = jnp.maximum(h + kp["b2"][:, 0][None, :], 0.0)
    h = jnp.dot(h.astype(jnp.bfloat16), kp["w3"].T, preferred_element_type=jnp.float32)
    h = jnp.maximum(h + kp["b3"][:, 0][None, :], 0.0)

    logits = (jnp.dot(h.astype(jnp.bfloat16), kp["wc"][:K].T,
                      preferred_element_type=jnp.float32)
              + kp["bc"][:K, 0][None, :])
    emb = jnp.transpose(h.reshape(B, N, 128), (0, 2, 1))
    return emb, logits, jax.nn.softmax(logits, -1), jax.nn.log_softmax(logits, -1)


# --------------------------------- main -------------------------------------- #
if __name__ == "__main__":
    level_classes = [4, 6]       # [latent classes L0, num part classes K]
    B, N = 2, 16                 # small test; channel dims fixed by module (512/1088)
    L0, K = level_classes[0], level_classes[-1]

    key = jax.random.PRNGKey(0)
    k_in, k_par = jax.random.split(key)
    k1, k2, k3 = jax.random.split(k_in, 3)

    out5 = jax.random.normal(k1, (B, 512, N), dtype=jnp.float32)
    embed = jax.random.normal(k2, (B, 1088, N), dtype=jnp.float32)
    probs = jax.nn.softmax(
        jax.random.normal(k3, (B * N, L0), dtype=jnp.float32), axis=-1)

    raw = make_params(k_par, level_classes)
    kp = fold_params(raw, level_classes)

    out = top_model_forward(out5, embed, probs, kp, K)
    jax.block_until_ready(out)

    # sanity check against pure-JAX reference (same bf16 casts, f32 accumulation)
    emb_ref, logits_ref, probs_ref, lp_ref = _reference(out5, embed, probs, kp, K)
    assert jnp.allclose(out["embeddings"], emb_ref, atol=2e-3, rtol=2e-3), "embeddings mismatch"
    assert jnp.allclose(out["logits"], logits_ref, atol=2e-3, rtol=2e-3), "logits mismatch"
    assert jnp.allclose(out["probs"], probs_ref, atol=2e-3, rtol=2e-3), "probs mismatch"
    assert jnp.allclose(out["log_probs"], lp_ref, atol=2e-3, rtol=2e-3), "log_probs mismatch"

    print("KERNEL_OK")
</pallas_src>

<mosaic_0001>
module attributes {stable_mosaic.version = 11 : i64} {
  func.func @_top_kernel(%arg0: i32, %arg1: i32, %arg2: memref<1x512x16xf32, #tpu.memory_space<vmem>>, %arg3: memref<1x1088x16xf32, #tpu.memory_space<vmem>>, %arg4: memref<1x4x16xf32, #tpu.memory_space<vmem>>, %arg5: memref<256x512xbf16, #tpu.memory_space<vmem>>, %arg6: memref<256x1xf32, #tpu.memory_space<vmem>>, %arg7: memref<256x1088xbf16, #tpu.memory_space<vmem>>, %arg8: memref<256x64xbf16, #tpu.memory_space<vmem>>, %arg9: memref<256x1xf32, #tpu.memory_space<vmem>>, %arg10: memref<256x256xbf16, #tpu.memory_space<vmem>>, %arg11: memref<256x1xf32, #tpu.memory_space<vmem>>, %arg12: memref<128x256xbf16, #tpu.memory_space<vmem>>, %arg13: memref<128x1xf32, #tpu.memory_space<vmem>>, %arg14: memref<8x128xbf16, #tpu.memory_space<vmem>>, %arg15: memref<6x1xf32, #tpu.memory_space<vmem>>, %arg16: memref<1x128x16xf32, #tpu.memory_space<vmem>>, %arg17: memref<1x6x16xf32, #tpu.memory_space<vmem>>, %arg18: memref<1x6x16xf32, #tpu.memory_space<vmem>>, %arg19: memref<1x6x16xf32, #tpu.memory_space<vmem>>) attributes {dimension_semantics = [#tpu.dimension_semantics<parallel>, #tpu.dimension_semantics<parallel>], iteration_bounds = array<i64: 2, 1>, scalar_prefetch = 0 : i64, scratch_operands = 0 : i64, tpu.core_type = #tpu.core_type<tc>, window_params = [{transform_indices = @transform_0, window_bounds = array<i64: 1, 512, 16>}, {transform_indices = @transform_1, window_bounds = array<i64: 1, 1088, 16>}, {transform_indices = @transform_2, window_bounds = array<i64: 1, 4, 16>}, {pipeline_mode = #tpu.pipeline_mode<synchronous>, transform_indices = @transform_3, window_bounds = array<i64: 256, 512>}, {pipeline_mode = #tpu.pipeline_mode<synchronous>, transform_indices = @transform_4, window_bounds = array<i64: 256, 1>}, {pipeline_mode = #tpu.pipeline_mode<synchronous>, transform_indices = @transform_5, window_bounds = array<i64: 256, 1088>}, {pipeline_mode = #tpu.pipeline_mode<synchronous>, transform_indices = @transform_6, window_bounds = array<i64: 256, 64>}, {pipeline_mode = #tpu.pipeline_mode<synchronous>, transform_indices = @transform_7, window_bounds = array<i64: 256, 1>}, {pipeline_mode = #tpu.pipeline_mode<synchronous>, transform_indices = @transform_8, window_bounds = array<i64: 256, 256>}, {pipeline_mode = #tpu.pipeline_mode<synchronous>, transform_indices = @transform_9, window_bounds = array<i64: 256, 1>}, {pipeline_mode = #tpu.pipeline_mode<synchronous>, transform_indices = @transform_10, window_bounds = array<i64: 128, 256>}, {pipeline_mode = #tpu.pipeline_mode<synchronous>, transform_indices = @transform_11, window_bounds = array<i64: 128, 1>}, {pipeline_mode = #tpu.pipeline_mode<synchronous>, transform_indices = @transform_12, window_bounds = array<i64: 8, 128>}, {pipeline_mode = #tpu.pipeline_mode<synchronous>, transform_indices = @transform_13, window_bounds = array<i64: 6, 1>}, {transform_indices = @transform_14, window_bounds = array<i64: 1, 128, 16>}, {transform_indices = @transform_15, window_bounds = array<i64: 1, 6, 16>}, {transform_indices = @transform_16, window_bounds = array<i64: 1, 6, 16>}, {transform_indices = @transform_17, window_bounds = array<i64: 1, 6, 16>}]} {
    %c0 = arith.constant 0 : index
    %c0_0 = arith.constant 0 : index
    %c0_1 = arith.constant 0 : index
    %0 = vector.load %arg2[%c0, %c0_0, %c0_1] : memref<1x512x16xf32, #tpu.memory_space<vmem>>, vector<1x512x16xf32>
    %1 = vector.shape_cast %0 : vector<1x512x16xf32> to vector<512x16xf32>
    %2 = arith.truncf %1 : vector<512x16xf32> to vector<512x16xbf16>
    %c0_2 = arith.constant 0 : index
    %c0_3 = arith.constant 0 : index
    %c0_4 = arith.constant 0 : index
    %3 = vector.load %arg3[%c0_2, %c0_3, %c0_4] : memref<1x1088x16xf32, #tpu.memory_space<vmem>>, vector<1x1088x16xf32>
    %4 = vector.shape_cast %3 : vector<1x1088x16xf32> to vector<1088x16xf32>
    %5 = arith.truncf %4 : vector<1088x16xf32> to vector<1088x16xbf16>
    %c0_5 = arith.constant 0 : index
    %c0_6 = arith.constant 0 : index
    %c0_7 = arith.constant 0 : index
    %6 = vector.load %arg4[%c0_5, %c0_6, %c0_7] : memref<1x4x16xf32, #tpu.memory_space<vmem>>, vector<1x4x16xf32>
    %7 = vector.shape_cast %6 : vector<1x4x16xf32> to vector<4x16xf32>
    %c0_8 = arith.constant 0 : index
    %c0_9 = arith.constant 0 : index
    %8 = vector.load %arg5[%c0_8, %c0_9] : memref<256x512xbf16, #tpu.memory_space<vmem>>, vector<256x512xbf16>
    %cst = arith.constant dense<0.000000e+00> : vector<256x16xf32>
    %9 = tpu.matmul %8, %2, %cst {dimension_numbers = #tpu.dot_dimension_numbers<[1], [0], [0], [1], [0, 0, 1, 1], [], []>} : vector<256x512xbf16>, vector<512x16xbf16>, vector<256x16xf32> -> vector<256x16xf32>
    %c0_10 = arith.constant 0 : index
    %c0_11 = arith.constant 0 : index
    %10 = vector.load %arg6[%c0_10, %c0_11] : memref<256x1xf32, #tpu.memory_space<vmem>>, vector<256x1xf32>
    %11 = vector.extract_strided_slice %7 {offsets = [0, 0], sizes = [1, 16], strides = [1, 1]} : vector<4x16xf32> to vector<1x16xf32>
    %12 = vector.extract_strided_slice %9 {offsets = [0, 0], sizes = [64, 16], strides = [1, 1]} : vector<256x16xf32> to vector<64x16xf32>
    %13 = vector.extract_strided_slice %10 {offsets = [0, 0], sizes = [64, 1], strides = [1, 1]} : vector<256x1xf32> to vector<64x1xf32>
    %14 = vector.broadcast %13 : vector<64x1xf32> to vector<64x16xf32>
    %15 = arith.addf %12, %14 : vector<64x16xf32>
    %16 = vector.broadcast %11 : vector<1x16xf32> to vector<64x16xf32>
    %17 = arith.mulf %16, %15 : vector<64x16xf32>
    %18 = vector.extract_strided_slice %7 {offsets = [1, 0], sizes = [1, 16], strides = [1, 1]} : vector<4x16xf32> to vector<1x16xf32>
    %19 = vector.extract_strided_slice %9 {offsets = [64, 0], sizes = [64, 16], strides = [1, 1]} : vector<256x16xf32> to vector<64x16xf32>
    %20 = vector.extract_strided_slice %10 {offsets = [64, 0], sizes = [64, 1], strides = [1, 1]} : vector<256x1xf32> to vector<64x1xf32>
    %21 = vector.broadcast %20 : vector<64x1xf32> to vector<64x16xf32>
    %22 = arith.addf %19, %21 : vector<64x16xf32>
    %23 = vector.broadcast %18 : vector<1x16xf32> to vector<64x16xf32>
    %24 = arith.mulf %23, %22 : vector<64x16xf32>
    %25 = arith.addf %17, %24 : vector<64x16xf32>
    %26 = vector.extract_strided_slice %7 {offsets = [2, 0], sizes = [1, 16], strides = [1, 1]} : vector<4x16xf32> to vector<1x16xf32>
    %27 = vector.extract_strided_slice %9 {offsets = [128, 0], sizes = [64, 16], strides = [1, 1]} : vector<256x16xf32> to vector<64x16xf32>
    %28 = vector.extract_strided_slice %10 {offsets = [128, 0], sizes = [64, 1], strides = [1, 1]} : vector<256x1xf32> to vector<64x1xf32>
    %29 = vector.broadcast %28 : vector<64x1xf32> to vector<64x16xf32>
    %30 = arith.addf %27, %29 : vector<64x16xf32>
    %31 = vector.broadcast %26 : vector<1x16xf32> to vector<64x16xf32>
    %32 = arith.mulf %31, %30 : vector<64x16xf32>
    %33 = arith.addf %25, %32 : vector<64x16xf32>
    %34 = vector.extract_strided_slice %7 {offsets = [3, 0], sizes = [1, 16], strides = [1, 1]} : vector<4x16xf32> to vector<1x16xf32>
    %35 = vector.extract_strided_slice %9 {offsets = [192, 0], sizes = [64, 16], strides = [1, 1]} : vector<256x16xf32> to vector<64x16xf32>
    %36 = vector.extract_strided_slice %10 {offsets = [192, 0], sizes = [64, 1], strides = [1, 1]} : vector<256x1xf32> to vector<64x1xf32>
    %37 = vector.broadcast %36 : vector<64x1xf32> to vector<64x16xf32>
    %38 = arith.addf %35, %37 : vector<64x16xf32>
    %39 = vector.broadcast %34 : vector<1x16xf32> to vector<64x16xf32>
    %40 = arith.mulf %39, %38 : vector<64x16xf32>
    %41 = arith.addf %33, %40 : vector<64x16xf32>
    %42 = arith.truncf %41 : vector<64x16xf32> to vector<64x16xbf16>
    %c0_12 = arith.constant 0 : index
    %c0_13 = arith.constant 0 : index
    %43 = vector.load %arg7[%c0_12, %c0_13] : memref<256x1088xbf16, #tpu.memory_space<vmem>>, vector<256x1088xbf16>
    %cst_14 = arith.constant dense<0.000000e+00> : vector<256x16xf32>
    %44 = tpu.matmul %43, %5, %cst_14 {dimension_numbers = #tpu.dot_dimension_numbers<[1], [0], [0], [1], [0, 0, 1, 1], [], []>} : vector<256x1088xbf16>, vector<1088x16xbf16>, vector<256x16xf32> -> vector<256x16xf32>
    %c0_15 = arith.constant 0 : index
    %c0_16 = arith.constant 0 : index
    %45 = vector.load %arg8[%c0_15, %c0_16] : memref<256x64xbf16, #tpu.memory_space<vmem>>, vector<256x64xbf16>
    %cst_17 = arith.constant dense<0.000000e+00> : vector<256x16xf32>
    %46 = tpu.matmul %45, %42, %cst_17 {dimension_numbers = #tpu.dot_dimension_numbers<[1], [0], [0], [1], [0, 0, 1, 1], [], []>} : vector<256x64xbf16>, vector<64x16xbf16>, vector<256x16xf32> -> vector<256x16xf32>
    %47 = arith.addf %44, %46 : vector<256x16xf32>
    %c0_18 = arith.constant 0 : index
    %c0_19 = arith.constant 0 : index
    %48 = vector.load %arg9[%c0_18, %c0_19] : memref<256x1xf32, #tpu.memory_space<vmem>>, vector<256x1xf32>
    %49 = vector.broadcast %48 : vector<256x1xf32> to vector<256x16xf32>
    %50 = arith.addf %47, %49 : vector<256x16xf32>
    %cst_20 = arith.constant 0.000000e+00 : f32
    %51 = vector.broadcast %cst_20 : f32 to vector<256x16xf32>
    %52 = arith.maximumf %50, %51 : vector<256x16xf32>
    %c0_21 = arith.constant 0 : index
    %c0_22 = arith.constant 0 : index
    %53 = vector.load %arg10[%c0_21, %c0_22] : memref<256x256xbf16, #tpu.memory_space<vmem>>, vector<256x256xbf16>
    %54 = arith.truncf %52 : vector<256x16xf32> to vector<256x16xbf16>
    %cst_23 = arith.constant dense<0.000000e+00> : vector<256x16xf32>
    %55 = tpu.matmul %53, %54, %cst_23 {dimension_numbers = #tpu.dot_dimension_numbers<[1], [0], [0], [1], [0, 0, 1, 1], [], []>} : vector<256x256xbf16>, vector<256x16xbf16>, vector<256x16xf32> -> vector<256x16xf32>
    %c0_24 = arith.constant 0 : index
    %c0_25 = arith.constant 0 : index
    %56 = vector.load %arg11[%c0_24, %c0_25] : memref<256x1xf32, #tpu.memory_space<vmem>>, vector<256x1xf32>
    %57 = vector.broadcast %56 : vector<256x1xf32> to vector<256x16xf32>
    %58 = arith.addf %55, %57 : vector<256x16xf32>
    %cst_26 = arith.constant 0.000000e+00 : f32
    %59 = vector.broadcast %cst_26 : f32 to vector<256x16xf32>
    %60 = arith.maximumf %58, %59 : vector<256x16xf32>
    %c0_27 = arith.constant 0 : index
    %c0_28 = arith.constant 0 : index
    %61 = vector.load %arg12[%c0_27, %c0_28] : memref<128x256xbf16, #tpu.memory_space<vmem>>, vector<128x256xbf16>
    %62 = arith.truncf %60 : vector<256x16xf32> to vector<256x16xbf16>
    %cst_29 = arith.constant dense<0.000000e+00> : vector<128x16xf32>
    %63 = tpu.matmul %61, %62, %cst_29 {dimension_numbers = #tpu.dot_dimension_numbers<[1], [0], [0], [1], [0, 0, 1, 1], [], []>} : vector<128x256xbf16>, vector<256x16xbf16>, vector<128x16xf32> -> vector<128x16xf32>
    %c0_30 = arith.constant 0 : index
    %c0_31 = arith.constant 0 : index
    %64 = vector.load %arg13[%c0_30, %c0_31] : memref<128x1xf32, #tpu.memory_space<vmem>>, vector<128x1xf32>
    %65 = vector.broadcast %64 : vector<128x1xf32> to vector<128x16xf32>
    %66 = arith.addf %63, %65 : vector<128x16xf32>
    %cst_32 = arith.constant 0.000000e+00 : f32
    %67 = vector.broadcast %cst_32 : f32 to vector<128x16xf32>
    %68 = arith.maximumf %66, %67 : vector<128x16xf32>
    %c0_33 = arith.constant 0 : index
    %c0_34 = arith.constant 0 : index
    %c0_35 = arith.constant 0 : index
    %69 = vector.load %arg16[%c0_33, %c0_34, %c0_35] : memref<1x128x16xf32, #tpu.memory_space<vmem>>, vector<1x128x16xf32>
    %70 = vector.shape_cast %69 : vector<1x128x16xf32> to vector<128x16xf32>
    %71 = vector.shape_cast %68 : vector<128x16xf32> to vector<1x128x16xf32>
    tpu.vector_store %arg16[%c0_33, %c0_34, %c0_35], %71 {strides = array<i32>} : memref<1x128x16xf32, #tpu.memory_space<vmem>>, vector<1x128x16xf32>,
    %c0_36 = arith.constant 0 : index
    %c0_37 = arith.constant 0 : index
    %72 = vector.load %arg14[%c0_36, %c0_37] : memref<8x128xbf16, #tpu.memory_space<vmem>>, vector<8x128xbf16>
    %73 = arith.truncf %68 : vector<128x16xf32> to vector<128x16xbf16>
    %cst_38 = arith.constant dense<0.000000e+00> : vector<8x16xf32>
    %74 = tpu.matmul %72, %73, %cst_38 {dimension_numbers = #tpu.dot_dimension_numbers<[1], [0], [0], [1], [0, 0, 1, 1], [], []>} : vector<8x128xbf16>, vector<128x16xbf16>, vector<8x16xf32> -> vector<8x16xf32>
    %75 = vector.extract_strided_slice %74 {offsets = [0, 0], sizes = [6, 16], strides = [1, 1]} : vector<8x16xf32> to vector<6x16xf32>
    %c0_39 = arith.constant 0 : index
    %c0_40 = arith.constant 0 : index
    %76 = vector.load %arg15[%c0_39, %c0_40] : memref<6x1xf32, #tpu.memory_space<vmem>>, vector<6x1xf32>
    %77 = vector.broadcast %76 : vector<6x1xf32> to vector<6x16xf32>
    %78 = arith.addf %75, %77 : vector<6x16xf32>
    %c0_41 = arith.constant 0 : index
    %c0_42 = arith.constant 0 : index
    %c0_43 = arith.constant 0 : index
    %79 = vector.load %arg17[%c0_41, %c0_42, %c0_43] : memref<1x6x16xf32, #tpu.memory_space<vmem>>, vector<1x6x16xf32>
    %80 = vector.shape_cast %79 : vector<1x6x16xf32> to vector<6x16xf32>
    %81 = vector.shape_cast %78 : vector<6x16xf32> to vector<1x6x16xf32>
    tpu.vector_store %arg17[%c0_41, %c0_42, %c0_43], %81 {strides = array<i32>} : memref<1x6x16xf32, #tpu.memory_space<vmem>>, vector<1x6x16xf32>,
    %cst_44 = arith.constant dense<0xFF800000> : vector<16xf32>
    %82 = vector.multi_reduction <maximumf>, %78, %cst_44 [0] : vector<6x16xf32> to vector<16xf32>
    %83 = vector.shape_cast %82 : vector<16xf32> to vector<1x16xf32>
    %84 = vector.broadcast %83 : vector<1x16xf32> to vector<6x16xf32>
    %85 = arith.subf %78, %84 : vector<6x16xf32>
    %86 = math.exp %85 : vector<6x16xf32>
    %cst_45 = arith.constant dense<0.000000e+00> : vector<16xf32>
    %87 = vector.multi_reduction <add>, %86, %cst_45 [0] : vector<6x16xf32> to vector<16xf32>
    %88 = vector.shape_cast %87 : vector<16xf32> to vector<1x16xf32>
    %89 = tpu.reciprocal %88 {approx = true} : vector<1x16xf32> -> vector<1x16xf32>
    %90 = vector.broadcast %89 : vector<1x16xf32> to vector<6x16xf32>
    %91 = arith.mulf %86, %90 : vector<6x16xf32>
    %c0_46 = arith.constant 0 : index
    %c0_47 = arith.constant 0 : index
    %c0_48 = arith.constant 0 : index
    %92 = vector.load %arg18[%c0_46, %c0_47, %c0_48] : memref<1x6x16xf32, #tpu.memory_space<vmem>>, vector<1x6x16xf32>
    %93 = vector.shape_cast %92 : vector<1x6x16xf32> to vector<6x16xf32>
    %94 = vector.shape_cast %91 : vector<6x16xf32> to vector<1x6x16xf32>
    tpu.vector_store %arg18[%c0_46, %c0_47, %c0_48], %94 {strides = array<i32>} : memref<1x6x16xf32, #tpu.memory_space<vmem>>, vector<1x6x16xf32>,
    %95 = math.log %88 : vector<1x16xf32>
    %96 = vector.broadcast %95 : vector<1x16xf32> to vector<6x16xf32>
    %97 = arith.subf %85, %96 : vector<6x16xf32>
    %c0_49 = arith.constant 0 : index
    %c0_50 = arith.constant 0 : index
    %c0_51 = arith.constant 0 : index
    %98 = vector.load %arg19[%c0_49, %c0_50, %c0_51] : memref<1x6x16xf32, #tpu.memory_space<vmem>>, vector<1x6x16xf32>
    %99 = vector.shape_cast %98 : vector<1x6x16xf32> to vector<6x16xf32>
    %100 = vector.shape_cast %97 : vector<6x16xf32> to vector<1x6x16xf32>
    tpu.vector_store %arg19[%c0_49, %c0_50, %c0_51], %100 {strides = array<i32>} : memref<1x6x16xf32, #tpu.memory_space<vmem>>, vector<1x6x16xf32>,
    return
  }
  func.func @transform_0(%arg0: i32, %arg1: i32) -> (i32, i32, i32) {
    %c0_i32 = arith.constant 0 : i32
    %c0_i32_0 = arith.constant 0 : i32
    return %arg0, %c0_i32, %arg1 : i32, i32, i32
  }
  func.func @transform_1(%arg0: i32, %arg1: i32) -> (i32, i32, i32) {
    %c0_i32 = arith.constant 0 : i32
    %c0_i32_0 = arith.constant 0 : i32
    return %arg0, %c0_i32, %arg1 : i32, i32, i32
  }
  func.func @transform_2(%arg0: i32, %arg1: i32) -> (i32, i32, i32) {
    %c0_i32 = arith.constant 0 : i32
    %c0_i32_0 = arith.constant 0 : i32
    return %arg0, %c0_i32, %arg1 : i32, i32, i32
  }
  func.func @transform_3(%arg0: i32, %arg1: i32) -> (i32, i32) {
    %c0_i32 = arith.constant 0 : i32
    %c0_i32_0 = arith.constant 0 : i32
    %c0_i32_1 = arith.constant 0 : i32
    return %c0_i32, %c0_i32_0 : i32, i32
  }
  func.func @transform_4(%arg0: i32, %arg1: i32) -> (i32, i32) {
    %c0_i32 = arith.constant 0 : i32
    %c0_i32_0 = arith.constant 0 : i32
    %c0_i32_1 = arith.constant 0 : i32
    return %c0_i32, %c0_i32_0 : i32, i32
  }
  func.func @transform_5(%arg0: i32, %arg1: i32) -> (i32, i32) {
    %c0_i32 = arith.constant 0 : i32
    %c0_i32_0 = arith.constant 0 : i32
    %c0_i32_1 = arith.constant 0 : i32
    return %c0_i32, %c0_i32_0 : i32, i32
  }
  func.func @transform_6(%arg0: i32, %arg1: i32) -> (i32, i32) {
    %c0_i32 = arith.constant 0 : i32
    %c0_i32_0 = arith.constant 0 : i32
    %c0_i32_1 = arith.constant 0 : i32
    return %c0_i32, %c0_i32_0 : i32, i32
  }
  func.func @transform_7(%arg0: i32, %arg1: i32) -> (i32, i32) {
    %c0_i32 = arith.constant 0 : i32
    %c0_i32_0 = arith.constant 0 : i32
    %c0_i32_1 = arith.constant 0 : i32
    return %c0_i32, %c0_i32_0 : i32, i32
  }
  func.func @transform_8(%arg0: i32, %arg1: i32) -> (i32, i32) {
    %c0_i32 = arith.constant 0 : i32
    %c0_i32_0 = arith.constant 0 : i32
    %c0_i32_1 = arith.constant 0 : i32
    return %c0_i32, %c0_i32_0 : i32, i32
  }
  func.func @transform_9(%arg0: i32, %arg1: i32) -> (i32, i32) {
    %c0_i32 = arith.constant 0 : i32
    %c0_i32_0 = arith.constant 0 : i32
    %c0_i32_1 = arith.constant 0 : i32
    return %c0_i32, %c0_i32_0 : i32, i32
  }
  func.func @transform_10(%arg0: i32, %arg1: i32) -> (i32, i32) {
    %c0_i32 = arith.constant 0 : i32
    %c0_i32_0 = arith.constant 0 : i32
    %c0_i32_1 = arith.constant 0 : i32
    return %c0_i32, %c0_i32_0 : i32, i32
  }
  func.func @transform_11(%arg0: i32, %arg1: i32) -> (i32, i32) {
    %c0_i32 = arith.constant 0 : i32
    %c0_i32_0 = arith.constant 0 : i32
    %c0_i32_1 = arith.constant 0 : i32
    return %c0_i32, %c0_i32_0 : i32, i32
  }
  func.func @transform_12(%arg0: i32, %arg1: i32) -> (i32, i32) {
    %c0_i32 = arith.constant 0 : i32
    %c0_i32_0 = arith.constant 0 : i32
    %c0_i32_1 = arith.constant 0 : i32
    return %c0_i32, %c0_i32_0 : i32, i32
  }
  func.func @transform_13(%arg0: i32, %arg1: i32) -> (i32, i32) {
    %c0_i32 = arith.constant 0 : i32
    %c0_i32_0 = arith.constant 0 : i32
    %c0_i32_1 = arith.constant 0 : i32
    return %c0_i32, %c0_i32_0 : i32, i32
  }
  func.func @transform_14(%arg0: i32, %arg1: i32) -> (i32, i32, i32) {
    %c0_i32 = arith.constant 0 : i32
    %c0_i32_0 = arith.constant 0 : i32
    return %arg0, %c0_i32, %arg1 : i32, i32, i32
  }
  func.func @transform_15(%arg0: i32, %arg1: i32) -> (i32, i32, i32) {
    %c0_i32 = arith.constant 0 : i32
    %c0_i32_0 = arith.constant 0 : i32
    return %arg0, %c0_i32, %arg1 : i32, i32, i32
  }
  func.func @transform_16(%arg0: i32, %arg1: i32) -> (i32, i32, i32) {
    %c0_i32 = arith.constant 0 : i32
    %c0_i32_0 = arith.constant 0 : i32
    return %arg0, %c0_i32, %arg1 : i32, i32, i32
  }
  func.func @transform_17(%arg0: i32, %arg1: i32) -> (i32, i32, i32) {
    %c0_i32 = arith.constant 0 : i32
    %c0_i32_0 = arith.constant 0 : i32
    return %arg0, %c0_i32, %arg1 : i32, i32, i32
  }
}

</mosaic_0001>

<bundles_post_ra>
// kernel: tpu_custom_call.1
= control target key start
LH: loop header
LB: loop body
LE: loop exit
PB: predicated region body
PF: predicated region fallthrough
CT: control target
= control target key end

     0   :  { %s7437_s24 = smov 0   ;;  %s7439_s25 = smov 0   ;;  %s9768_s0 = inlined_call_operand.vmem [shape: f32[2,512,16], index: 0, kind: input, shape index: {}]   ;;  %s9769_s1 = inlined_call_operand.vmem [shape: f32[2,1088,16], index: 1, kind: input, shape index: {}]   ;;  %s9770_s2 = inlined_call_operand.vmem [shape: f32[2,4,16], index: 2, kind: input, shape index: {}]   ;;  %s9771_s3 = inlined_call_operand.vmem [shape: bf16[256,512], index: 3, kind: input, shape index: {}]   ;;  %s9772_s4 = inlined_call_operand.vmem [shape: f32[256,1], index: 4, kind: input, shape index: {}]   ;;  %s9773_s5 = inlined_call_operand.vmem [shape: bf16[256,1088], index: 5, kind: input, shape index: {}]   ;;  %s9774_s6 = inlined_call_operand.vmem [shape: bf16[256,64], index: 6, kind: input, shape index: {}]   ;;  %s9775_s7 = inlined_call_operand.vmem [shape: f32[256,1], index: 7, kind: input, shape index: {}]   ;;  %s9776_s8 = inlined_call_operand.vmem [shape: bf16[256,256], index: 8, kind: input, shape index: {}]   ;;  %s9777_s9 = inlined_call_operand.vmem [shape: f32[256,1], index: 9, kind: input, shape index: {}]   ;;  %s9778_s10 = inlined_call_operand.vmem [shape: bf16[128,256], index: 10, kind: input, shape index: {}]   ;;  %s9779_s11 = inlined_call_operand.vmem [shape: f32[128,1], index: 11, kind: input, shape index: {}]   ;;  %s9780_s12 = inlined_call_operand.vmem [shape: bf16[8,128], index: 12, kind: input, shape index: {}]   ;;  %s9781_s13 = inlined_call_operand.vmem [shape: f32[6,1], index: 13, kind: input, shape index: {}]   ;;  %s9782_s14 = inlined_call_operand.vmem [shape: f32[2,128,16], index: 14, kind: output, shape index: {0}]   ;;  %s9783_s15 = inlined_call_operand.vmem [shape: f32[2,6,16], index: 15, kind: output, shape index: {1}]   ;;  %s9784_s16 = inlined_call_operand.vmem [shape: f32[2,6,16], index: 16, kind: output, shape index: {2}]   ;;  %s9785_s17 = inlined_call_operand.vmem [shape: f32[2,6,16], index: 17, kind: output, shape index: {3}]  }
   0x1   :  { %9788 = sst [smem:[#allocation31_spill]] %s9768_s0  ;;  %s7441_s26 = smov 0  }
   0x2   :  { %9789 = sst [smem:[#allocation32_spill]] %s9769_s1 }
   0x3 LB: > { %s40_s27 = sadd.s32 1, %s7338_s25  ;;  %p5569_p0 = scmp.ge.s32.totalorder %s7342_s26, 1  ;;  %s7342_s26 = sphi %s7441_s26, %s28_s26   ;;  %s7338_s25 = sphi %s7439_s25, %s9875_s25   ;;  %s7334_s24 = sphi %s7437_s24, %s9874_s24  }
   0x4   : > { %p42_p1 = scmp.ge.s32.totalorder %s40_s27, 2  ;;  %p548_p2 = scmp.lt.s32.totalorder %s7342_s26, 3 }
   0x6   : > { %s9877_s27 = smov (%p42_p1, %s40_s27), 0  ;;  %p549_p3 = pnand %p5569_p0, %p548_p2 }
   0x8   : > { %552 = sbr.rel (%p549_p3) target bundleno = 1897 (0x769), region = 76 }
   0xd   : > { %v1716_v0 = vld [vmem:[%s9772_s4 + $0x70] sm:$0xff]  ;;  %p642_p4 = scmp.lt.s32.totalorder %s7334_s24, 1  ;;  %v7344_v2 = vmov 0   ;;  %v1717_v3 = vld [vmem:[%s9772_s4 + $0x78] sm:$0xff]  ;;  %s9790_s28 = sld [smem:[#allocation31_spill]]  ;;  %v1707_v23 = vld [vmem:[%s9772_s4 + $0x28] sm:$0xff] }
   0xe   : > { %v1708_v1 = vld [vmem:[%s9772_s4 + $0x30] sm:$0xff]  ;;  %6921 = vset.pattern.permute.xlu1 %v7344_v2  ;;  %6920 = vset.pattern.permute.xlu0 %v7344_v2  ;;  %v1709_v4 = vld [vmem:[%s9772_s4 + $0x38] sm:$0xff]  ;;  %v1706_v26 = vld [vmem:[%s9772_s4 + $0x20] sm:$0xff]  ;;  %vm2274_vm0 = vcmask 523264   ;;  %s9815_s22 = sld [smem:[#allocation32_spill]]  ;;  %vm7346_vm1 = vmmov 0  }
   0xf   : > { %1826 = vperm.xlu1 %6921, %v1716_v0   ;;  %1766 = vperm.xlu0 %6920, %v1708_v1   ;;  %s9879_s24 = smov (!%p642_p4, %s7334_s24), 1  ;;  %v1725_v5 = vld [vmem:[%s9772_s4 + $0xb8] sm:$0xff]  ;;  %v1724_v9 = vld [vmem:[%s9772_s4 + $0xb0] sm:$0xff]  ;;  %v1715_v46 = vld [vmem:[%s9772_s4 + $0x68] sm:$0xff]  ;;  %vm5227_vm2 = vcmask 130048   ;;  %vm5300_vm3 = vcmask 128000  }
  0x10   : > { %s5885_s21 = sshll.u32 %s9879_s24, 9  ;;  %v1714_v47 = vld [vmem:[%s9772_s4 + $0x60] sm:$0xff]  ;;  %v1733_v61 = vld [vmem:[%s9772_s4 + $0xf8] sm:$0xff]  ;;  %v1732_v62 = vld [vmem:[%s9772_s4 + $0xf0] sm:$0xff]  ;;  %s5573_s30 = sshll.u32 %s9879_s24, 2 }
  0x11   : > { %s664_s1 = scalar_lea.vmem %s9770_s2, %s5573_s30  ;;  %s6892_s20 = smul.u32 1088, %s9879_s24 }
  0x13   : > { %s7473_s29 = scalar_lea.vmem %s9790_s28, %s5885_s21  ;;  %1831 = vperm.xlu1 %6921, %v1717_v3   ;;  %1771 = vperm.xlu0 %6920, %v1709_v4   ;;  %s5886_s28 = sshll.u32 %s9879_s24, 7 }
  0x14   : > { %v725_v6 = vld [vmem:[%s7473_s29 + $0xf0] sm:$0xff]  ;;  %v726_v7 = vld [vmem:[%s7473_s29 + $0xf8] sm:$0xff]  ;;  %v723_v18 = vld [vmem:[%s7473_s29 + $0xe0] sm:$0xff]  ;;  %s8287_s23 = scalar_lea.vmem %s9815_s22, %s6892_s20  ;;  %s9657_s18 = scalar_lea.vmem %s9782_s14, %s5886_s28 }
  0x15   : > { %v757_v8 = vld [vmem:[%s7473_s29 + $0x1f0] sm:$0xff]  ;;  %v774_v10 = vpack.c.bf16 %v726_v7, %v725_v6  ;;  %v758_v11 = vld [vmem:[%s7473_s29 + $0x1f8] sm:$0xff]  ;;  %v724_v20 = vld [vmem:[%s7473_s29 + $0xe8] sm:$0xff]  ;;  %s9740_s20 = sshll.u32 %s9879_s24, 3 }
  0x16   : > { %v709_v12 = vld [vmem:[%s7473_s29 + $0x70] sm:$0xff]  ;;  %v710_v13 = vld [vmem:[%s7473_s29 + $0x78] sm:$0xff]  ;;  %v790_v14 = vpack.c.bf16 %v758_v11, %v757_v8  ;;  %v755_v21 = vld [vmem:[%s7473_s29 + $0x1e0] sm:$0xff]  ;;  %v773_v24 = vpack.c.bf16 %v724_v20, %v723_v18  ;;  %s679_s21 = scalar_lea.vmem %s9783_s15, %s9740_s20  ;;  %s686_s28 = scalar_lea.vmem %s9784_s16, %s9740_s20 }
  0x17   : > { %v766_v15 = vpack.c.bf16 %v710_v13, %v709_v12  ;;  %v741_v16 = vld [vmem:[%s7473_s29 + $0x170] sm:$0xff]  ;;  %v742_v17 = vld [vmem:[%s7473_s29 + $0x178] sm:$0xff]  ;;  %5887 = vmatprep.subr.bf16.mxu0 %v774_v10  ;;  %v756_v22 = vld [vmem:[%s7473_s29 + $0x1e8] sm:$0xff]  ;;  %1899 = vperm.xlu1 %6921, %v1725_v5  }
  0x18   : > { %v782_v19 = vpack.c.bf16 %v742_v17, %v741_v16  ;;  %5999 = vmatprep.subr.bf16.mxu1 %v790_v14  ;;  %v789_v25 = vpack.c.bf16 %v756_v22, %v755_v21  ;;  %v707_v27 = vld [vmem:[%s7473_s29 + $0x60] sm:$0xff]  ;;  %v708_v28 = vld [vmem:[%s7473_s29 + $0x68] sm:$0xff]  ;;  %1894 = vperm.xlu0 %6920, %v1724_v9   ;;  %v721_v32 = vld [vmem:[%s7473_s29 + $0xd0] sm:$0xff] }
  0x19   : > { %v739_v29 = vld [vmem:[%s7473_s29 + $0x160] sm:$0xff]  ;;  %5888 = vmatpush3.bf16.msra.mxu0 %v766_v15  ;;  %v765_v30 = vpack.c.bf16 %v708_v28, %v707_v27  ;;  %v740_v31 = vld [vmem:[%s7473_s29 + $0x168] sm:$0xff]  ;;  %v722_v33 = vld [vmem:[%s7473_s29 + $0xd8] sm:$0xff] }
  0x1a   : > { %6000 = vmatpush3.bf16.msra.mxu1 %v782_v19  ;;  %5889 = vmatprep.subr.bf16.mxu0 %v773_v24  ;;  %v781_v34 = vpack.c.bf16 %v740_v31, %v739_v29  ;;  %v772_v35 = vpack.c.bf16 %v722_v33, %v721_v32  ;;  %v753_v36 = vld [vmem:[%s7473_s29 + $0x1d0] sm:$0xff]  ;;  %v754_v37 = vld [vmem:[%s7473_s29 + $0x1d8] sm:$0xff]  ;;  %v719_v43 = vld [vmem:[%s7473_s29 + $0xc0] sm:$0xff] }
  0x1b   : > { %v705_v38 = vld [vmem:[%s7473_s29 + $0x50] sm:$0xff]  ;;  %6001 = vmatprep.subr.bf16.mxu1 %v789_v25  ;;  %v788_v39 = vpack.c.bf16 %v754_v37, %v753_v36  ;;  %v706_v40 = vld [vmem:[%s7473_s29 + $0x58] sm:$0xff]  ;;  %1761 = vperm.xlu1 %6921, %v1707_v23   ;;  %v720_v44 = vld [vmem:[%s7473_s29 + $0xc8] sm:$0xff] }
  0x1c   : > { %v737_v41 = vld [vmem:[%s7473_s29 + $0x150] sm:$0xff]  ;;  %v738_v42 = vld [vmem:[%s7473_s29 + $0x158] sm:$0xff]  ;;  %v751_v45 = vld [vmem:[%s7473_s29 + $0x1c0] sm:$0xff]  ;;  %1756 = vperm.xlu0 %6920, %v1706_v26   ;;  %v764_v48 = vpack.c.bf16 %v706_v40, %v705_v38  ;;  %v771_v51 = vpack.c.bf16 %v720_v44, %v719_v43 }
  0x1d   : > { %5890 = vmatpush3.bf16.msra.mxu0 %v765_v30  ;;  %v752_v49 = vld [vmem:[%s7473_s29 + $0x1c8] sm:$0xff]  ;;  %v780_v50 = vpack.c.bf16 %v738_v42, %v737_v41  ;;  %v703_v52 = vld [vmem:[%s7473_s29 + $0x40] sm:$0xff]  ;;  %v717_v57 = vld [vmem:[%s7473_s29 + $0xb0] sm:$0xff] }
  0x1e   : > { %6002 = vmatpush3.bf16.msra.mxu1 %v781_v34  ;;  %5891 = vmatprep.subr.bf16.mxu0 %v772_v35  ;;  %v704_v53 = vld [vmem:[%s7473_s29 + $0x48] sm:$0xff]  ;;  %v735_v54 = vld [vmem:[%s7473_s29 + $0x140] sm:$0xff]  ;;  %v787_v55 = vpack.c.bf16 %v752_v49, %v751_v45  ;;  %v718_v58 = vld [vmem:[%s7473_s29 + $0xb8] sm:$0xff] }
  0x1f   : > { %6003 = vmatprep.subr.bf16.mxu1 %v788_v39  ;;  %v736_v56 = vld [vmem:[%s7473_s29 + $0x148] sm:$0xff]  ;;  %1821 = vperm.xlu1 %6921, %v1715_v46   ;;  %v749_v59 = vld [vmem:[%s7473_s29 + $0x1b0] sm:$0xff]  ;;  %v750_v60 = vld [vmem:[%s7473_s29 + $0x1b8] sm:$0xff]  ;;  %v763_v63 = vpack.c.bf16 %v704_v53, %v703_v52  ;;  %v770_v1 = vpack.c.bf16 %v718_v58, %v717_v57 }
  0x20   : > { %1816 = vperm.xlu0 %6920, %v1714_v47   ;;  %v779_v0 = vpack.c.bf16 %v736_v56, %v735_v54  ;;  %v701_v2 = vld [vmem:[%s7473_s29 + $0x30] sm:$0xff]  ;;  %v702_v3 = vld [vmem:[%s7473_s29 + $0x38] sm:$0xff]  ;;  %v786_v5 = vpack.c.bf16 %v750_v60, %v749_v59  ;;  %v715_v7 = vld [vmem:[%s7473_s29 + $0xa0] sm:$0xff] }
  0x21   : > { %5892 = vmatpush3.bf16.msra.mxu0 %v764_v48  ;;  %v733_v4 = vld [vmem:[%s7473_s29 + $0x130] sm:$0xff]  ;;  %v734_v6 = vld [vmem:[%s7473_s29 + $0x138] sm:$0xff]  ;;  %v716_v8 = vld [vmem:[%s7473_s29 + $0xa8] sm:$0xff]  ;;  %v762_v13 = vpack.c.bf16 %v702_v3, %v701_v2 }
  0x22   : > { %6004 = vmatpush3.bf16.msra.mxu1 %v780_v50  ;;  %5893 = vmatprep.subr.bf16.mxu0 %v771_v51  ;;  %v747_v9 = vld [vmem:[%s7473_s29 + $0x1a0] sm:$0xff]  ;;  %v748_v10 = vld [vmem:[%s7473_s29 + $0x1a8] sm:$0xff]  ;;  %v778_v15 = vpack.c.bf16 %v734_v6, %v733_v4  ;;  %v769_v16 = vpack.c.bf16 %v716_v8, %v715_v7  ;;  %v1705_v21 = vld [vmem:[%s9772_s4 + $0x18] sm:$0xff] }
  0x23   : > { %6005 = vmatprep.subr.bf16.mxu1 %v787_v55  ;;  %1967 = vperm.xlu1 %6921, %v1733_v61   ;;  %v1723_v11 = vld [vmem:[%s9772_s4 + $0xa8] sm:$0xff]  ;;  %v1722_v12 = vld [vmem:[%s9772_s4 + $0xa0] sm:$0xff]  ;;  %v785_v20 = vpack.c.bf16 %v748_v10, %v747_v9  ;;  %v713_v22 = vld [vmem:[%s7473_s29 + $0x90] sm:$0xff] }
  0x24   : > { %1962 = vperm.xlu0 %6920, %v1732_v62   ;;  %v699_v14 = vld [vmem:[%s7473_s29 + $0x20] sm:$0xff]  ;;  %v700_v17 = vld [vmem:[%s7473_s29 + $0x28] sm:$0xff]  ;;  %v714_v23 = vld [vmem:[%s7473_s29 + $0x98] sm:$0xff] }
  0x25   : > { %5894 = vmatpush3.bf16.msra.mxu0 %v763_v63  ;;  %v731_v18 = vld [vmem:[%s7473_s29 + $0x120] sm:$0xff]  ;;  %v732_v19 = vld [vmem:[%s7473_s29 + $0x128] sm:$0xff]  ;;  %v745_v24 = vld [vmem:[%s7473_s29 + $0x190] sm:$0xff]  ;;  %v761_v29 = vpack.c.bf16 %v700_v17, %v699_v14  ;;  %v768_v34 = vpack.c.bf16 %v714_v23, %v713_v22 }
  0x26   : > { %6006 = vmatpush3.bf16.msra.mxu1 %v779_v0  ;;  %5895 = vmatprep.subr.bf16.mxu0 %v770_v1  ;;  %v1704_v25 = vld [vmem:[%s9772_s4 + $0x10] sm:$0xff]  ;;  %v746_v26 = vld [vmem:[%s7473_s29 + $0x198] sm:$0xff]  ;;  %v711_v32 = vld [vmem:[%s7473_s29 + $0x80] sm:$0xff]  ;;  %v777_v33 = vpack.c.bf16 %v732_v19, %v731_v18 }
  0x27   : > { %6007 = vmatprep.subr.bf16.mxu1 %v786_v5  ;;  %1889 = vperm.xlu1 %6921, %v1723_v11   ;;  %v697_v27 = vld [vmem:[%s7473_s29 + $0x10] sm:$0xff]  ;;  %v698_v28 = vld [vmem:[%s7473_s29 + $0x18] sm:$0xff]  ;;  %v712_v35 = vld [vmem:[%s7473_s29 + $0x88] sm:$0xff]  ;;  %v784_v36 = vpack.c.bf16 %v746_v26, %v745_v24 }
  0x28   : > { %1884 = vperm.xlu0 %6920, %v1722_v12   ;;  %v729_v30 = vld [vmem:[%s7473_s29 + $0x110] sm:$0xff]  ;;  %v730_v31 = vld [vmem:[%s7473_s29 + $0x118] sm:$0xff]  ;;  %v743_v39 = vld [vmem:[%s7473_s29 + $0x180] sm:$0xff]  ;;  %v760_v43 = vpack.c.bf16 %v698_v28, %v697_v27  ;;  %v767_v47 = vpack.c.bf16 %v712_v35, %v711_v32 }
  0x29   : > { %5896 = vmatpush3.bf16.msra.mxu0 %v762_v13  ;;  %v1713_v37 = vld [vmem:[%s9772_s4 + $0x58] sm:$0xff]  ;;  %v6924_v38 = vld [vmem:[%s9771_s3 + $0x4] ss:$16 sps:$4 sm:$0xff]   ;;  %v744_v40 = vld [vmem:[%s7473_s29 + $0x188] sm:$0xff]  ;;  %v776_v46 = vpack.c.bf16 %v730_v31, %v729_v30 }
  0x2a   : > { %6008 = vmatpush3.bf16.msra.mxu1 %v778_v15  ;;  %5897 = vmatprep.subr.bf16.mxu0 %v769_v16  ;;  %v6927_v41 = vld [vmem:[%s9771_s3 + $0xc] ss:$16 sps:$4 sm:$0xff]   ;;  %v1712_v42 = vld [vmem:[%s9772_s4 + $0x50] sm:$0xff]  ;;  %v695_v44 = vld [vmem:[%s7473_s29] sm:$0xff]  ;;  %v783_v49 = vpack.c.bf16 %v744_v40, %v743_v39 }
  0x2b   : > { %6009 = vmatprep.subr.bf16.mxu1 %v785_v20  ;;  %1751 = vperm.xlu1 %6921, %v1705_v21   ;;  %v696_v45 = vld [vmem:[%s7473_s29 + $0x8] sm:$0xff]  ;;  %v727_v48 = vld [vmem:[%s7473_s29 + $0x100] sm:$0xff]  ;;  %v1721_v57 = vld [vmem:[%s9772_s4 + $0x98] sm:$0xff] }
  0x2c   : > { %1746 = vperm.xlu0 %6920, %v1704_v25   ;;  %v728_v50 = vld [vmem:[%s7473_s29 + $0x108] sm:$0xff]  ;;  %1412 = vmatprep.mubr.bf16.mxu0 %v6924_v38  ;;  %v759_v52 = vpack.c.bf16 %v696_v45, %v695_v44  ;;  %v1730_v53 = vld [vmem:[%s9772_s4 + $0xe0] sm:$0xff]  ;;  %v1720_v58 = vld [vmem:[%s9772_s4 + $0x90] sm:$0xff] }
  0x2d   : > { %5898 = vmatpush3.bf16.msra.mxu0 %v761_v29  ;;  %1573 = vmatprep.mubr.bf16.mxu1 %v6927_v41  ;;  %v1731_v51 = vld [vmem:[%s9772_s4 + $0xe8] sm:$0xff]  ;;  %v775_v54 = vpack.c.bf16 %v728_v50, %v727_v48  ;;  %v6922_v55 = vld [vmem:[%s9771_s3] ss:$16 sps:$4 sm:$0xff]   ;;  %v6928_v59 = vld [vmem:[%s9771_s3 + $0x24] ss:$16 sps:$4 sm:$0xff]  }
  0x2e   : > { %6010 = vmatpush3.bf16.msra.mxu1 %v777_v33  ;;  %5899 = vmatprep.subr.bf16.mxu0 %v768_v34  ;;  %v6925_v56 = vld [vmem:[%s9771_s3 + $0x8] ss:$16 sps:$4 sm:$0xff]   ;;  %v6930_v60 = vld [vmem:[%s9771_s3 + $0x2c] ss:$16 sps:$4 sm:$0xff]   ;;  %v1702_v62 = vld [vmem:[%s9772_s4] sm:$0xff] }
  0x2f   : > { %6011 = vmatprep.subr.bf16.mxu1 %v784_v36  ;;  %1811 = vperm.xlu1 %6921, %v1713_v37   ;;  %v1703_v61 = vld [vmem:[%s9772_s4 + $0x8] sm:$0xff]  ;;  %v6932_v63 = vld [vmem:[%s9771_s3 + $0x20] ss:$16 sps:$4 sm:$0xff]   ;;  %v6934_v3 = vld [vmem:[%s9771_s3 + $0x44] ss:$16 sps:$4 sm:$0xff]  }
  0x30   : > { %1806 = vperm.xlu0 %6920, %v1712_v42   ;;  %v6933_v0 = vld [vmem:[%s9771_s3 + $0x28] ss:$16 sps:$4 sm:$0xff]   ;;  %v1710_v2 = vld [vmem:[%s9772_s4 + $0x40] sm:$0xff]  ;;  %v6936_v4 = vld [vmem:[%s9771_s3 + $0x4c] ss:$16 sps:$4 sm:$0xff]  }
  0x31   : > { %5900 = vmatpush3.bf16.msra.mxu0 %v760_v43  ;;  %v1711_v1 = vld [vmem:[%s9772_s4 + $0x48] sm:$0xff]  ;;  %v1729_v5 = vld [vmem:[%s9772_s4 + $0xd8] sm:$0xff]  ;;  %v1728_v6 = vld [vmem:[%s9772_s4 + $0xd0] sm:$0xff] }
  0x32   : > { %6012 = vmatpush3.bf16.msra.mxu1 %v776_v46  ;;  %5901 = vmatprep.subr.bf16.mxu0 %v767_v47  ;;  %v6938_v7 = vld [vmem:[%s9771_s3 + $0x40] ss:$16 sps:$4 sm:$0xff]   ;;  %v6939_v8 = vld [vmem:[%s9771_s3 + $0x48] ss:$16 sps:$4 sm:$0xff]   ;;  %v6940_v11 = vld [vmem:[%s9771_s3 + $0x64] ss:$16 sps:$4 sm:$0xff]  }
  0x33   : > { %6013 = vmatprep.subr.bf16.mxu1 %v783_v49  ;;  %1957 = vperm.xlu1 %6921, %v1731_v51   ;;  %v1719_v9 = vld [vmem:[%s9772_s4 + $0x88] sm:$0xff]  ;;  %v1718_v10 = vld [vmem:[%s9772_s4 + $0x80] sm:$0xff]  ;;  %v4088_v17 = vld [vmem:[%s9775_s7 + $0xf8] sm:$0xff] }
  0x34   : > { %1952 = vperm.xlu0 %6920, %v1730_v53   ;;  %v6942_v12 = vld [vmem:[%s9771_s3 + $0x6c] ss:$16 sps:$4 sm:$0xff]   ;;  %v1726_v14 = vld [vmem:[%s9772_s4 + $0xc0] sm:$0xff]  ;;  %v6945_v16 = vld [vmem:[%s9771_s3 + $0x68] ss:$16 sps:$4 sm:$0xff]  }
  0x35   : > { %5902 = vmatpush3.bf16.msra.mxu0 %v759_v52  ;;  %v1727_v13 = vld [vmem:[%s9772_s4 + $0xc8] sm:$0xff]  ;;  %v6944_v15 = vld [vmem:[%s9771_s3 + $0x60] ss:$16 sps:$4 sm:$0xff]   ;;  %v6946_v19 = vld [vmem:[%s9771_s3 + $0x84] ss:$16 sps:$4 sm:$0xff]  }
  0x36   : > { %6014 = vmatpush3.bf16.msra.mxu1 %v775_v54  ;;  %v4087_v18 = vld [vmem:[%s9775_s7 + $0xf0] sm:$0xff]  ;;  %v6948_v20 = vld [vmem:[%s9771_s3 + $0x8c] ss:$16 sps:$4 sm:$0xff]   ;;  %v6951_v24 = vld [vmem:[%s9771_s3 + $0x88] ss:$16 sps:$4 sm:$0xff]  }
  0x37   : > { %1879 = vperm.xlu1 %6921, %v1721_v57   ;;  %v4072_v21 = vld [vmem:[%s9775_s7 + $0x78] sm:$0xff]  ;;  %v4071_v22 = vld [vmem:[%s9775_s7 + $0x70] sm:$0xff]  ;;  %v4086_v25 = vld [vmem:[%s9775_s7 + $0xe8] sm:$0xff] }
  0x38   : > { %1413 = vmatmul.mubr.bf16.vlgmr.msra.gmra.mxu0 %v6922_v55  ;;  %1874 = vperm.xlu0 %6920, %v1720_v58   ;;  %v6950_v23 = vld [vmem:[%s9771_s3 + $0x80] ss:$16 sps:$4 sm:$0xff]   ;;  %v6952_v27 = vld [vmem:[%s9771_s3 + $0xa4] ss:$16 sps:$4 sm:$0xff]   ;;  %v6954_v28 = vld [vmem:[%s9771_s3 + $0xac] ss:$16 sps:$4 sm:$0xff]  }
  0x39   : > { %1574 = vmatmul.mubr.bf16.vlgmr.msra.gmra.mxu1 %v6925_v56  ;;  %1420 = vmatprep.mubr.bf16.mxu0 %v6928_v59  ;;  %v4085_v26 = vld [vmem:[%s9775_s7 + $0xe0] sm:$0xff]  ;;  %v4070_v29 = vld [vmem:[%s9775_s7 + $0x68] sm:$0xff]  ;;  %v4084_v33 = vld [vmem:[%s9775_s7 + $0xd8] sm:$0xff] }
  0x3a   : > { %1581 = vmatprep.mubr.bf16.mxu1 %v6930_v60  ;;  %v4069_v30 = vld [vmem:[%s9775_s7 + $0x60] sm:$0xff]  ;;  %v6957_v32 = vld [vmem:[%s9771_s3 + $0xa8] ss:$16 sps:$4 sm:$0xff]   ;;  %v4083_v34 = vld [vmem:[%s9775_s7 + $0xd0] sm:$0xff] }
  0x3b   : > { %1741 = vperm.xlu1 %6921, %v1703_v61   ;;  %v6956_v31 = vld [vmem:[%s9771_s3 + $0xa0] ss:$16 sps:$4 sm:$0xff]   ;;  %v6958_v35 = vld [vmem:[%s9771_s3 + $0xc4] ss:$16 sps:$4 sm:$0xff]   ;;  %v6960_v36 = vld [vmem:[%s9771_s3 + $0xcc] ss:$16 sps:$4 sm:$0xff]  }
  0x3c   : > { %1736 = vperm.xlu0 %6920, %v1702_v62   ;;  %v4068_v37 = vld [vmem:[%s9775_s7 + $0x58] sm:$0xff]  ;;  %v4067_v38 = vld [vmem:[%s9775_s7 + $0x50] sm:$0xff]  ;;  %v4082_v41 = vld [vmem:[%s9775_s7 + $0xc8] sm:$0xff] }
  0x3d   : > { %v6962_v39 = vld [vmem:[%s9771_s3 + $0xc0] ss:$16 sps:$4 sm:$0xff]   ;;  %v6963_v40 = vld [vmem:[%s9771_s3 + $0xc8] ss:$16 sps:$4 sm:$0xff]   ;;  %v6964_v43 = vld [vmem:[%s9771_s3 + $0xe4] ss:$16 sps:$4 sm:$0xff]  }
  0x3e   : > { %v4081_v42 = vld [vmem:[%s9775_s7 + $0xc0] sm:$0xff]  ;;  %v6966_v44 = vld [vmem:[%s9771_s3 + $0xec] ss:$16 sps:$4 sm:$0xff]   ;;  %v6969_v48 = vld [vmem:[%s9771_s3 + $0xe8] ss:$16 sps:$4 sm:$0xff]  }
  0x3f   : > { %1801 = vperm.xlu1 %6921, %v1711_v1   ;;  %v4066_v45 = vld [vmem:[%s9775_s7 + $0x48] sm:$0xff]  ;;  %v4065_v46 = vld [vmem:[%s9775_s7 + $0x40] sm:$0xff]  ;;  %v4080_v49 = vld [vmem:[%s9775_s7 + $0xb8] sm:$0xff] }
  0x40   : > { %1421 = vmatmul.mubr.bf16.gmra.mxu0 %v6932_v63  ;;  %1796 = vperm.xlu0 %6920, %v1710_v2   ;;  %v6968_v47 = vld [vmem:[%s9771_s3 + $0xe0] ss:$16 sps:$4 sm:$0xff]   ;;  %v6970_v51 = vld [vmem:[%s9771_s3 + $0x104] ss:$16 sps:$4 sm:$0xff]   ;;  %v6972_v52 = vld [vmem:[%s9771_s3 + $0x10c] ss:$16 sps:$4 sm:$0xff]  }
  0x41   : > { %1582 = vmatmul.mubr.bf16.gmra.mxu1 %v6933_v0  ;;  %1428 = vmatprep.mubr.bf16.mxu0 %v6934_v3  ;;  %v4079_v50 = vld [vmem:[%s9775_s7 + $0xb0] sm:$0xff]  ;;  %v4064_v53 = vld [vmem:[%s9775_s7 + $0x38] sm:$0xff]  ;;  %v4078_v57 = vld [vmem:[%s9775_s7 + $0xa8] sm:$0xff] }
  0x42   : > { %1589 = vmatprep.mubr.bf16.mxu1 %v6936_v4  ;;  %v4063_v54 = vld [vmem:[%s9775_s7 + $0x30] sm:$0xff]  ;;  %v6975_v56 = vld [vmem:[%s9771_s3 + $0x108] ss:$16 sps:$4 sm:$0xff]   ;;  %v4077_v58 = vld [vmem:[%s9775_s7 + $0xa0] sm:$0xff] }
  0x43   : > { %1947 = vperm.xlu1 %6921, %v1729_v5   ;;  %v6974_v55 = vld [vmem:[%s9771_s3 + $0x100] ss:$16 sps:$4 sm:$0xff]   ;;  %v6976_v59 = vld [vmem:[%s9771_s3 + $0x124] ss:$16 sps:$4 sm:$0xff]   ;;  %v6978_v60 = vld [vmem:[%s9771_s3 + $0x12c] ss:$16 sps:$4 sm:$0xff]  }
  0x44   : > { %1942 = vperm.xlu0 %6920, %v1728_v6   ;;  %v4062_v61 = vld [vmem:[%s9775_s7 + $0x28] sm:$0xff]  ;;  %v4061_v62 = vld [vmem:[%s9775_s7 + $0x20] sm:$0xff]  ;;  %v4076_v1 = vld [vmem:[%s9775_s7 + $0x98] sm:$0xff] }
  0x45   : > { %v6980_v63 = vld [vmem:[%s9771_s3 + $0x120] ss:$16 sps:$4 sm:$0xff]   ;;  %v6981_v0 = vld [vmem:[%s9771_s3 + $0x128] ss:$16 sps:$4 sm:$0xff]   ;;  %v6982_v3 = vld [vmem:[%s9771_s3 + $0x144] ss:$16 sps:$4 sm:$0xff]  }
  0x46   : > { %v4075_v2 = vld [vmem:[%s9775_s7 + $0x90] sm:$0xff]  ;;  %v6984_v4 = vld [vmem:[%s9771_s3 + $0x14c] ss:$16 sps:$4 sm:$0xff]  }
  0x47   : > { %1869 = vperm.xlu1 %6921, %v1719_v9   ;;  %v4060_v5 = vld [vmem:[%s9775_s7 + $0x18] sm:$0xff]  ;;  %v4059_v6 = vld [vmem:[%s9775_s7 + $0x10] sm:$0xff]  ;;  %v4074_v9 = vld [vmem:[%s9775_s7 + $0x88] sm:$0xff] }
  0x48   : > { %1429 = vmatmul.mubr.bf16.gmra.mxu0 %v6938_v7  ;;  %1864 = vperm.xlu0 %6920, %v1718_v10   ;;  %v6986_v7 = vld [vmem:[%s9771_s3 + $0x140] ss:$16 sps:$4 sm:$0xff]  }
  0x49   : > { %1590 = vmatmul.mubr.bf16.gmra.mxu1 %v6939_v8  ;;  %1436 = vmatprep.mubr.bf16.mxu0 %v6940_v11  ;;  %v6987_v8 = vld [vmem:[%s9771_s3 + $0x148] ss:$16 sps:$4 sm:$0xff]   ;;  %v4073_v10 = vld [vmem:[%s9775_s7 + $0x80] sm:$0xff] }
  0x4a   : > { %1597 = vmatprep.mubr.bf16.mxu1 %v6942_v12  ;;  %v6988_v11 = vld [vmem:[%s9771_s3 + $0x164] ss:$16 sps:$4 sm:$0xff]   ;;  %v6990_v12 = vld [vmem:[%s9771_s3 + $0x16c] ss:$16 sps:$4 sm:$0xff]  }
  0x4b   : > { %1937 = vperm.xlu1 %6921, %v1727_v13   ;;  %v4058_v13 = vld [vmem:[%s9775_s7 + $0x8] sm:$0xff] }
  0x4c   : > { %1932 = vperm.xlu0 %6920, %v1726_v14   ;;  %v4057_v14 = vld [vmem:[%s9775_s7] sm:$0xff] }
  0x4f   : > { %4246 = vperm.xlu1 %6921, %v4088_v17   ;;  %v4392_v17 = vld [vmem:[%s9777_s9 + $0xf8] sm:$0xff] }
  0x50   : > { %1437 = vmatmul.mubr.bf16.gmra.mxu0 %v6944_v15  ;;  %4241 = vperm.xlu0 %6920, %v4087_v18   ;;  %v6992_v15 = vld [vmem:[%s9771_s3 + $0x160] ss:$16 sps:$4 sm:$0xff]  }
  0x51   : > { %1598 = vmatmul.mubr.bf16.gmra.mxu1 %v6945_v16  ;;  %1444 = vmatprep.mubr.bf16.mxu0 %v6946_v19  ;;  %v6993_v16 = vld [vmem:[%s9771_s3 + $0x168] ss:$16 sps:$4 sm:$0xff]   ;;  %v4391_v18 = vld [vmem:[%s9777_s9 + $0xf0] sm:$0xff] }
  0x52   : > { %1605 = vmatprep.mubr.bf16.mxu1 %v6948_v20  ;;  %v6994_v19 = vld [vmem:[%s9771_s3 + $0x184] ss:$16 sps:$4 sm:$0xff]   ;;  %v6996_v20 = vld [vmem:[%s9771_s3 + $0x18c] ss:$16 sps:$4 sm:$0xff]  }
  0x53   : > { %4166 = vperm.xlu1 %6921, %v4072_v21   ;;  %v4376_v21 = vld [vmem:[%s9777_s9 + $0x78] sm:$0xff] }
  0x54   : > { %4161 = vperm.xlu0 %6920, %v4071_v22   ;;  %v4375_v22 = vld [vmem:[%s9777_s9 + $0x70] sm:$0xff] }
  0x57   : > { %4236 = vperm.xlu1 %6921, %v4086_v25   ;;  %v4390_v25 = vld [vmem:[%s9777_s9 + $0xe8] sm:$0xff] }
  0x58   : > { %1445 = vmatmul.mubr.bf16.gmra.mxu0 %v6950_v23  ;;  %4231 = vperm.xlu0 %6920, %v4085_v26   ;;  %v6998_v23 = vld [vmem:[%s9771_s3 + $0x180] ss:$16 sps:$4 sm:$0xff]  }
  0x59   : > { %1606 = vmatmul.mubr.bf16.gmra.mxu1 %v6951_v24  ;;  %1452 = vmatprep.mubr.bf16.mxu0 %v6952_v27  ;;  %v6999_v24 = vld [vmem:[%s9771_s3 + $0x188] ss:$16 sps:$4 sm:$0xff]   ;;  %v4389_v26 = vld [vmem:[%s9777_s9 + $0xe0] sm:$0xff] }
  0x5a   : > { %1613 = vmatprep.mubr.bf16.mxu1 %v6954_v28  ;;  %v7000_v27 = vld [vmem:[%s9771_s3 + $0x1a4] ss:$16 sps:$4 sm:$0xff]   ;;  %v7002_v28 = vld [vmem:[%s9771_s3 + $0x1ac] ss:$16 sps:$4 sm:$0xff]  }
  0x5b   : > { %4156 = vperm.xlu1 %6921, %v4070_v29   ;;  %v4374_v29 = vld [vmem:[%s9777_s9 + $0x68] sm:$0xff] }
  0x5c   : > { %4151 = vperm.xlu0 %6920, %v4069_v30   ;;  %v4373_v30 = vld [vmem:[%s9777_s9 + $0x60] sm:$0xff] }
  0x5f   : > { %4226 = vperm.xlu1 %6921, %v4084_v33   ;;  %v4388_v33 = vld [vmem:[%s9777_s9 + $0xd8] sm:$0xff] }
  0x60   : > { %1453 = vmatmul.mubr.bf16.gmra.mxu0 %v6956_v31  ;;  %4221 = vperm.xlu0 %6920, %v4083_v34   ;;  %v7004_v31 = vld [vmem:[%s9771_s3 + $0x1a0] ss:$16 sps:$4 sm:$0xff]  }
  0x61   : > { %1614 = vmatmul.mubr.bf16.gmra.mxu1 %v6957_v32  ;;  %1460 = vmatprep.mubr.bf16.mxu0 %v6958_v35  ;;  %v7005_v32 = vld [vmem:[%s9771_s3 + $0x1a8] ss:$16 sps:$4 sm:$0xff]   ;;  %v4387_v34 = vld [vmem:[%s9777_s9 + $0xd0] sm:$0xff] }
  0x62   : > { %1621 = vmatprep.mubr.bf16.mxu1 %v6960_v36  ;;  %v7006_v35 = vld [vmem:[%s9771_s3 + $0x1c4] ss:$16 sps:$4 sm:$0xff]   ;;  %v7008_v36 = vld [vmem:[%s9771_s3 + $0x1cc] ss:$16 sps:$4 sm:$0xff]  }
  0x63   : > { %4146 = vperm.xlu1 %6921, %v4068_v37   ;;  %v4372_v37 = vld [vmem:[%s9777_s9 + $0x58] sm:$0xff] }
  0x64   : > { %4141 = vperm.xlu0 %6920, %v4067_v38   ;;  %v4371_v38 = vld [vmem:[%s9777_s9 + $0x50] sm:$0xff] }
  0x67   : > { %4216 = vperm.xlu1 %6921, %v4082_v41   ;;  %v4386_v41 = vld [vmem:[%s9777_s9 + $0xc8] sm:$0xff] }
  0x68   : > { %1461 = vmatmul.mubr.bf16.gmra.mxu0 %v6962_v39  ;;  %4211 = vperm.xlu0 %6920, %v4081_v42   ;;  %v7010_v39 = vld [vmem:[%s9771_s3 + $0x1c0] ss:$16 sps:$4 sm:$0xff]  }
  0x69   : > { %1622 = vmatmul.mubr.bf16.gmra.mxu1 %v6963_v40  ;;  %1468 = vmatprep.mubr.bf16.mxu0 %v6964_v43  ;;  %v7011_v40 = vld [vmem:[%s9771_s3 + $0x1c8] ss:$16 sps:$4 sm:$0xff]   ;;  %v4385_v42 = vld [vmem:[%s9777_s9 + $0xc0] sm:$0xff] }
  0x6a   : > { %1629 = vmatprep.mubr.bf16.mxu1 %v6966_v44  ;;  %v7012_v43 = vld [vmem:[%s9771_s3 + $0x1e4] ss:$16 sps:$4 sm:$0xff]   ;;  %v7014_v44 = vld [vmem:[%s9771_s3 + $0x1ec] ss:$16 sps:$4 sm:$0xff]  }
  0x6b   : > { %4136 = vperm.xlu1 %6921, %v4066_v45   ;;  %v4370_v45 = vld [vmem:[%s9777_s9 + $0x48] sm:$0xff] }
  0x6c   : > { %4131 = vperm.xlu0 %6920, %v4065_v46   ;;  %v4369_v46 = vld [vmem:[%s9777_s9 + $0x40] sm:$0xff] }
  0x6f   : > { %4206 = vperm.xlu1 %6921, %v4080_v49   ;;  %v4384_v49 = vld [vmem:[%s9777_s9 + $0xb8] sm:$0xff] }
  0x70   : > { %1469 = vmatmul.mubr.bf16.gmra.mxu0 %v6968_v47  ;;  %4201 = vperm.xlu0 %6920, %v4079_v50   ;;  %v7016_v47 = vld [vmem:[%s9771_s3 + $0x1e0] ss:$16 sps:$4 sm:$0xff]  }
  0x71   : > { %1630 = vmatmul.mubr.bf16.gmra.mxu1 %v6969_v48  ;;  %1476 = vmatprep.mubr.bf16.mxu0 %v6970_v51  ;;  %v7017_v48 = vld [vmem:[%s9771_s3 + $0x1e8] ss:$16 sps:$4 sm:$0xff]   ;;  %v4383_v50 = vld [vmem:[%s9777_s9 + $0xb0] sm:$0xff] }
  0x72   : > { %1637 = vmatprep.mubr.bf16.mxu1 %v6972_v52  ;;  %v4368_v51 = vld [vmem:[%s9777_s9 + $0x38] sm:$0xff]  ;;  %v4367_v52 = vld [vmem:[%s9777_s9 + $0x30] sm:$0xff] }
  0x73   : > { %4126 = vperm.xlu1 %6921, %v4064_v53   ;;  %v4382_v53 = vld [vmem:[%s9777_s9 + $0xa8] sm:$0xff] }
  0x74   : > { %4121 = vperm.xlu0 %6920, %v4063_v54   ;;  %v4381_v54 = vld [vmem:[%s9777_s9 + $0xa0] sm:$0xff] }
  0x77   : > { %4196 = vperm.xlu1 %6921, %v4078_v57   ;;  %v4380_v57 = vld [vmem:[%s9777_s9 + $0x98] sm:$0xff] }
  0x78   : > { %1477 = vmatmul.mubr.bf16.gmra.mxu0 %v6974_v55  ;;  %4191 = vperm.xlu0 %6920, %v4077_v58   ;;  %v4366_v55 = vld [vmem:[%s9777_s9 + $0x28] sm:$0xff]  ;;  %v4379_v58 = vld [vmem:[%s9777_s9 + $0x90] sm:$0xff] }
  0x79   : > { %1638 = vmatmul.mubr.bf16.gmra.mxu1 %v6975_v56  ;;  %1484 = vmatprep.mubr.bf16.mxu0 %v6976_v59  ;;  %v4365_v56 = vld [vmem:[%s9777_s9 + $0x20] sm:$0xff]  ;;  %v4364_v59 = vld [vmem:[%s9777_s9 + $0x18] sm:$0xff] }
  0x7a   : > { %1645 = vmatprep.mubr.bf16.mxu1 %v6978_v60  ;;  %v4363_v60 = vld [vmem:[%s9777_s9 + $0x10] sm:$0xff] }
  0x7b   : > { %4116 = vperm.xlu1 %6921, %v4062_v61   ;;  %v4378_v61 = vld [vmem:[%s9777_s9 + $0x88] sm:$0xff] }
  0x7c   : > { %4111 = vperm.xlu0 %6920, %v4061_v62   ;;  %v4377_v62 = vld [vmem:[%s9777_s9 + $0x80] sm:$0xff] }
  0x7f   : > { %4186 = vperm.xlu1 %6921, %v4076_v1   ;;  %v4362_v1 = vld [vmem:[%s9777_s9 + $0x8] sm:$0xff] }
  0x80   : > { %1485 = vmatmul.mubr.bf16.gmra.mxu0 %v6980_v63  ;;  %4181 = vperm.xlu0 %6920, %v4075_v2   ;;  %v4361_v2 = vld [vmem:[%s9777_s9] sm:$0xff] }
  0x81   : > { %1646 = vmatmul.mubr.bf16.gmra.mxu1 %v6981_v0  ;;  %1492 = vmatprep.mubr.bf16.mxu0 %v6982_v3 }
  0x82   : > { %1653 = vmatprep.mubr.bf16.mxu1 %v6984_v4  ;;  %v4953_v4 = vld [vmem:[%s9779_s11 + $0x78] sm:$0xff] }
  0x83   : > { %4106 = vperm.xlu1 %6921, %v4060_v5  }
  0x84   : > { %4101 = vperm.xlu0 %6920, %v4059_v6   ;;  %v4952_v6 = vld [vmem:[%s9779_s11 + $0x70] sm:$0xff] }
  0x87   : > { %4176 = vperm.xlu1 %6921, %v4074_v9  }
  0x88   : > { %1493 = vmatmul.mubr.bf16.gmra.mxu0 %v6986_v7  ;;  %4171 = vperm.xlu0 %6920, %v4073_v10   ;;  %v4951_v7 = vld [vmem:[%s9779_s11 + $0x68] sm:$0xff] }
  0x89   : > { %1654 = vmatmul.mubr.bf16.gmra.mxu1 %v6987_v8  ;;  %1500 = vmatprep.mubr.bf16.mxu0 %v6988_v11  ;;  %v4950_v8 = vld [vmem:[%s9779_s11 + $0x60] sm:$0xff]  ;;  %v4949_v11 = vld [vmem:[%s9779_s11 + $0x58] sm:$0xff] }
  0x8a   : > { %1661 = vmatprep.mubr.bf16.mxu1 %v6990_v12  ;;  %v8001_v63 = vpop.permute.xlu0 %1766  ;;  %v8003_v0 = vpop.permute.xlu1 %1826  ;;  %v4948_v12 = vld [vmem:[%s9779_s11 + $0x50] sm:$0xff] }
  0x8b   : > { %4096 = vperm.xlu1 %6921, %v4058_v13  }
  0x8c   : > { %4091 = vperm.xlu0 %6920, %v4057_v14   ;;  %v4947_v14 = vld [vmem:[%s9779_s11 + $0x48] sm:$0xff] }
  0x8e   : > { %v8011_v3 = vpop.permute.xlu0 %1771  ;;  %v8016_v5 = vpop.permute.xlu1 %1831 }
  0x8f   : > { %4550 = vperm.xlu1 %6921, %v4392_v17   ;;  %9791 = vst [vmem:[#allocation2_spill] sm:$0xff] %v8011_v3  ;;  %v4945_v17 = vld [vmem:[%s9779_s11 + $0x38] sm:$0xff] }
  0x90   : > { %1501 = vmatmul.mubr.bf16.gmra.mxu0 %v6992_v15  ;;  %4545 = vperm.xlu0 %6920, %v4391_v18   ;;  %v4944_v18 = vld [vmem:[%s9779_s11 + $0x30] sm:$0xff] }
  0x91   : > { %1662 = vmatmul.mubr.bf16.gmra.mxu1 %v6993_v16  ;;  %1508 = vmatprep.mubr.bf16.mxu0 %v6994_v19  ;;  %v4946_v16 = vld [vmem:[%s9779_s11 + $0x40] sm:$0xff] }
  0x92   : > { %1669 = vmatprep.mubr.bf16.mxu1 %v6996_v20  ;;  %v8029_v10 = vpop.permute.xlu1 %1899 }
  0x93   : > { %4470 = vperm.xlu1 %6921, %v4376_v21   ;;  %v8027_v9 = vpop.permute.xlu0 %1894  ;;  %9793 = vst [vmem:[#allocation4_spill] sm:$0xff] %v8029_v10  ;;  %v4943_v21 = vld [vmem:[%s9779_s11 + $0x28] sm:$0xff] }
  0x94   : > { %4465 = vperm.xlu0 %6920, %v4375_v22   ;;  %9792 = vst [vmem:[#allocation3_spill] sm:$0xff] %v8027_v9  ;;  %v4942_v22 = vld [vmem:[%s9779_s11 + $0x20] sm:$0xff] }
  0x96   : > { %v8042_v15 = vpop.permute.xlu1 %1761 }
  0x97   : > { %4540 = vperm.xlu1 %6921, %v4390_v25   ;;  %v8037_v13 = vpop.permute.xlu0 %1756 }
  0x98   : > { %1509 = vmatmul.mubr.bf16.gmra.mxu0 %v6998_v23  ;;  %4535 = vperm.xlu0 %6920, %v4389_v26   ;;  %v4940_v26 = vld [vmem:[%s9779_s11 + $0x10] sm:$0xff] }
  0x99   : > { %1670 = vmatmul.mubr.bf16.gmra.mxu1 %v6999_v24  ;;  %1516 = vmatprep.mubr.bf16.mxu0 %v7000_v27  ;;  %v4941_v24 = vld [vmem:[%s9779_s11 + $0x18] sm:$0xff]  ;;  %v4939_v27 = vld [vmem:[%s9779_s11 + $0x8] sm:$0xff] }
  0x9a   : > { %1677 = vmatprep.mubr.bf16.mxu1 %v7002_v28  ;;  %v8055_v20 = vpop.permute.xlu1 %1821  ;;  %v4938_v28 = vld [vmem:[%s9779_s11] sm:$0xff] }
  0x9b   : > { %4460 = vperm.xlu1 %6921, %v4374_v29   ;;  %v8053_v19 = vpop.permute.xlu0 %1816 }
  0x9c   : > { %4455 = vperm.xlu0 %6920, %v4373_v30  }
  0x9e   : > { %v8068_v25 = vpop.permute.xlu1 %1967 }
  0x9f   : > { %4530 = vperm.xlu1 %6921, %v4388_v33   ;;  %v8063_v23 = vpop.permute.xlu0 %1962  ;;  %9795 = vst [vmem:[#allocation6_spill] sm:$0xff] %v8068_v25 }
  0xa0   : > { %1517 = vmatmul.mubr.bf16.gmra.mxu0 %v7004_v31  ;;  %4525 = vperm.xlu0 %6920, %v4387_v34   ;;  %9794 = vst [vmem:[#allocation5_spill] sm:$0xff] %v8063_v23  ;;  %v5293_v31 = vld [vmem:[%s9781_s13] sm:$0x3f] }
  0xa1   : > { %1678 = vmatmul.mubr.bf16.gmra.mxu1 %v7005_v32  ;;  %1524 = vmatprep.mubr.bf16.mxu0 %v7006_v35 }
  0xa2   : > { %1685 = vmatprep.mubr.bf16.mxu1 %v7008_v36  ;;  %v8081_v30 = vpop.permute.xlu1 %1889 }
  0xa3   : > { %4450 = vperm.xlu1 %6921, %v4372_v37   ;;  %v8079_v29 = vpop.permute.xlu0 %1884 }
  0xa4   : > { %4445 = vperm.xlu0 %6920, %v4371_v38  }
  0xa7   : > { %4520 = vperm.xlu1 %6921, %v4386_v41   ;;  %v8086_v32 = vpop.permute.xlu0 %1746 }
  0xa8   : > { %1525 = vmatmul.mubr.bf16.gmra.mxu0 %v7010_v39  ;;  %4515 = vperm.xlu0 %6920, %v4385_v42  }
  0xa9   : > { %1686 = vmatmul.mubr.bf16.gmra.mxu1 %v7011_v40  ;;  %1532 = vmatprep.mubr.bf16.mxu0 %v7012_v43 }
  0xaa   : > { %1693 = vmatprep.mubr.bf16.mxu1 %v7014_v44 }
  0xab   : > { %4440 = vperm.xlu1 %6921, %v4370_v45  }
  0xac   : > { %4435 = vperm.xlu0 %6920, %v4369_v46  }
  0xaf   : > { %4510 = vperm.xlu1 %6921, %v4384_v49  }
  0xb0   : > { %1533 = vmatmul.mubr.bf16.gmra.mxu0 %v7016_v47  ;;  %4505 = vperm.xlu0 %6920, %v4383_v50  }
  0xb1   : > { %1694 = vmatmul.mubr.bf16.gmra.mxu1 %v7017_v48 }
  0xb3   : > { %4430 = vperm.xlu1 %6921, %v4368_v51  }
  0xb4   : > { %4425 = vperm.xlu0 %6920, %v4367_v52  }
  0xb7   : > { %4500 = vperm.xlu1 %6921, %v4382_v53  }
  0xb8   : > { %4495 = vperm.xlu0 %6920, %v4381_v54   ;;  %v8092_v54 = vpop.permute.xlu1 %1751 }
  0xbb   : > { %4420 = vperm.xlu1 %6921, %v4366_v55  }
  0xbc   : > { %4415 = vperm.xlu0 %6920, %v4365_v56  }
  0xbf   : > { %4490 = vperm.xlu1 %6921, %v4380_v57  }
  0xc0   : > { %4485 = vperm.xlu0 %6920, %v4379_v58   ;;  %v8096_v58 = vpop.permute.xlu0 %1806 }
  0xc3   : > { %4410 = vperm.xlu1 %6921, %v4364_v59  }
  0xc4   : > { %4405 = vperm.xlu0 %6920, %v4363_v60  }
  0xc7   : > { %4480 = vperm.xlu1 %6921, %v4378_v61  }
  0xc8   : > { %4475 = vperm.xlu0 %6920, %v4377_v62  }
  0xcb   : > { %4400 = vperm.xlu1 %6921, %v4362_v1  }
  0xcc   : > { %4395 = vperm.xlu0 %6920, %v4361_v2  }
  0xcf   : > { %5031 = vperm.xlu1 %6921, %v4953_v4  }
  0xd0   : > { %5026 = vperm.xlu0 %6920, %v4952_v6   ;;  %v8100_v6 = vpop.permute.xlu1 %1811 }
  0xd3   : > { %5021 = vperm.xlu1 %6921, %v4951_v7  }
  0xd4   : > { %5016 = vperm.xlu0 %6920, %v4950_v8  }
  0xd7   : > { %5011 = vperm.xlu1 %6921, %v4949_v11  }
  0xd8   : > { %5006 = vperm.xlu0 %6920, %v4948_v12  }
  0xdb   : > { %5001 = vperm.xlu1 %6921, %v4947_v14   ;;  %v8102_v14 = vpop.permute.xlu0 %1952 }
  0xdc   : > { %4996 = vperm.xlu0 %6920, %v4946_v16  }
  0xdf   : > { %4991 = vperm.xlu1 %6921, %v4945_v17  }
  0xe0   : > { %4986 = vperm.xlu0 %6920, %v4944_v18  }
  0xe3   : > { %4981 = vperm.xlu1 %6921, %v4943_v21  }
  0xe4   : > { %4976 = vperm.xlu0 %6920, %v4942_v22  }
  0xe7   : > { %4971 = vperm.xlu1 %6921, %v4941_v24  }
  0xe8   : > { %4966 = vperm.xlu0 %6920, %v4940_v26  }
  0xeb   : > { %4961 = vperm.xlu1 %6921, %v4939_v27   ;;  %v8106_v27 = vpop.permute.xlu1 %1957 }
  0xec   : > { %4956 = vperm.xlu0 %6920, %v4938_v28   ;;  %9796 = vst [vmem:[#allocation7_spill] sm:$0xff] %v8106_v27 }
  0xf0   : > { %5296 = vperm.xlu0 %6920, %v5293_v31   ;;  %v7018_v31 = vld [vmem:[%s9774_s6 + $0x40] sm:$0xff]  }
  0xf1   : > { %6808 = vmatprep.mubr.msk.bf16.mxu1 %vm2274_vm0, %v7018_v31 }
  0xf8   : > { %v5903_v33 = vpop.f32.mrf.mxu0 }
  0xf9   : > { %v6015_v34 = vpop.f32.mrf.mxu1 }
  0xfa   : > { %v5904_v35 = vpop.f32.mrf.mxu0 }
  0xfb   : > { %v5905_v36 = vadd.f32 %v5904_v35, %v5903_v33  ;;  %v6016_v37 = vpop.f32.mrf.mxu1  ;;  %v1782_v33 = vlaneseq }
  0xfc   : > { %v6017_v38 = vadd.f32 %v6016_v37, %v6015_v34  ;;  %v5906_v39 = vpop.f32.mrf.mxu0 }
  0xfd   : > { %v6018_v40 = vpop.f32.mrf.mxu1 }
  0xfe   : > { %v8088_v41 = vadd.f32 %v6017_v38, %v5905_v36  ;;  %v5907_v42 = vpop.f32.mrf.mxu0  ;;  %v8113_v36 = vpop.permute.xlu0 %1874 }
  0xff   : > { %v5908_v43 = vadd.f32 %v5907_v42, %v5906_v39  ;;  %v6019_v44 = vpop.f32.mrf.mxu1  ;;  %v7020_v39 = vld [vmem:[%s9774_s6] sm:$0xff]  }
 0x100   : > { %v6020_v45 = vadd.f32 %v6019_v44, %v6018_v40  ;;  %v5909_v46 = vpop.f32.mrf.mxu0  ;;  %6792 = vmatprep.mubr.msk.bf16.mxu0 %vm2274_vm0, %v7020_v39  ;;  %v8121_v44 = vshrl.u32 %v1782_v33, 7 }
 0x101   : > { %v6021_v47 = vpop.f32.mrf.mxu1 }
 0x102   : > { %v8090_v48 = vadd.f32 %v6020_v45, %v5908_v43  ;;  %v5910_v49 = vpop.f32.mrf.mxu0  ;;  %v1980_v25 = vsub.s32 3, %v8121_v44 }
 0x103   : > { %v5911_v50 = vadd.f32 %v5910_v49, %v5909_v46  ;;  %v6022_v51 = vpop.f32.mrf.mxu1 }
 0x104   : > { %v6023_v52 = vadd.f32 %v6022_v51, %v6021_v47  ;;  %v5912_v53 = vpop.f32.mrf.mxu0  ;;  %v8125_v47 = vpop.permute.xlu1 %1879 }
 0x105   : > { %v6024_v55 = vpop.f32.mrf.mxu1 }
 0x106   : > { %v8094_v56 = vadd.f32 %v6023_v52, %v5911_v50  ;;  %v5913_v57 = vpop.f32.mrf.mxu0 }
 0x107   : > { %v5914_v59 = vadd.f32 %v5913_v57, %v5912_v53  ;;  %v6025_v60 = vpop.f32.mrf.mxu1  ;;  %v1737_v53 = vpop.permute.xlu0 %1736  ;;  %v1784_v57 = vsub.s32 0, %v8121_v44 }
 0x108   : > { %v6026_v61 = vadd.f32 %v6025_v60, %v6024_v55  ;;  %v5915_v62 = vpop.f32.mrf.mxu0 }
 0x109   : > { %v6027_v1 = vpop.f32.mrf.mxu1 }
 0x10a   : > { %v8098_v2 = vadd.f32 %v6026_v61, %v5914_v59  ;;  %v5916_v4 = vpop.f32.mrf.mxu0  ;;  %v1844_v61 = vsub.s32 1, %v8121_v44 }
 0x10b   : > { %v5917_v7 = vadd.f32 %v5916_v4, %v5915_v62  ;;  %v6028_v8 = vpop.f32.mrf.mxu1  ;;  %v8134_v62 = vld [vmem:[%s664_s1] sm:$0xf] }
 0x10c   : > { %v6029_v11 = vadd.f32 %v6028_v8, %v6027_v1  ;;  %v5918_v12 = vpop.f32.mrf.mxu0 }
 0x10d   : > { %v6030_v16 = vpop.f32.mrf.mxu1 }
 0x10e   : > { %v8104_v17 = vadd.f32 %v6029_v11, %v5917_v7  ;;  %v5919_v18 = vpop.f32.mrf.mxu0  ;;  %v1742_v11 = vpop.permute.xlu1 %1741 }
 0x10f   : > { %v5920_v21 = vadd.f32 %v5919_v18, %v5918_v12  ;;  %v6031_v22 = vpop.f32.mrf.mxu1  ;;  %v8138_v18 = vrot.slane %v8134_v62, %v1784_v57 }
 0x110   : > { %v6032_v24 = vadd.f32 %v6031_v22, %v6030_v16  ;;  %v5921_v26 = vpop.f32.mrf.mxu0  ;;  %v1774_v16 = vadd.f32 %v1737_v53, %v8088_v41  ;;  %v8141_v22 = vrot.slane %v8134_v62, %v1844_v61  ;;  %v1776_v61 = vadd.f32 %v8086_v32, %v8094_v56 }
 0x111   : > { %v6033_v28 = vpop.f32.mrf.mxu1  ;;  %9798 = vst [vmem:[#allocation9_spill] sm:$0xff] %v8138_v18 }
 0x112   : > { %v8111_v34 = vadd.f32 %v6032_v24, %v5920_v21  ;;  %v5922_v35 = vpop.f32.mrf.mxu0  ;;  %9799 = vst [vmem:[#allocation10_spill] sm:$0xff] %v8141_v22  ;;  %v1786_v39 = vmul.f32 %v8138_v18, %v1774_v16 }
 0x113   : > { %v5923_v37 = vadd.f32 %v5922_v35, %v5921_v26  ;;  %v6034_v38 = vpop.f32.mrf.mxu1  ;;  %v1797_v26 = vpop.permute.xlu0 %1796 }
 0x114   : > { %v6035_v40 = vadd.f32 %v6034_v38, %v6033_v28  ;;  %v5924_v42 = vpop.f32.mrf.mxu0 }
 0x115   : > { %v6036_v43 = vpop.f32.mrf.mxu1 }
 0x116   : > { %v8123_v45 = vadd.f32 %v6035_v40, %v5923_v37  ;;  %v5925_v46 = vpop.f32.mrf.mxu0  ;;  %v1775_v40 = vadd.f32 %v1742_v11, %v8090_v48 }
 0x117   : > { %v5926_v49 = vadd.f32 %v5925_v46, %v5924_v42  ;;  %v6037_v50 = vpop.f32.mrf.mxu1  ;;  %v1802_v46 = vpop.permute.xlu1 %1801 }
 0x118   : > { %v6038_v51 = vadd.f32 %v6037_v50, %v6036_v43  ;;  %v5927_v52 = vpop.f32.mrf.mxu0 }
 0x119   : > { %v6039_v55 = vpop.f32.mrf.mxu1 }
 0x11a   : > { %v8131_v59 = vadd.f32 %v6038_v51, %v5926_v49  ;;  %v5928_v60 = vpop.f32.mrf.mxu0 }
 0x11b   : > { %v5929_v1 = vadd.f32 %v5928_v60, %v5927_v52  ;;  %v6040_v4 = vpop.f32.mrf.mxu1  ;;  %v1787_v60 = vmul.f32 %v8138_v18, %v1775_v40 }
 0x11c   : > { %9797 = vst [vmem:[#allocation8_spill] sm:$0xff] %v8131_v59  ;;  %v6041_v7 = vadd.f32 %v6040_v4, %v6039_v55  ;;  %v5930_v8 = vpop.f32.mrf.mxu0 }
 0x11d   : > { %v6042_v12 = vpop.f32.mrf.mxu1 }
 0x11e   : > { %v1608_v21 = vadd.f32 %v6041_v7, %v5929_v1  ;;  %v5931_v24 = vpop.f32.mrf.mxu0 }
 0x11f   : > { %v5932_v28 = vadd.f32 %v5931_v24, %v5930_v8  ;;  %v6043_v31 = vpop.f32.mrf.mxu1 }
 0x120   : > { %v1834_v33 = vadd.f32 %v1797_v26, %v1608_v21  ;;  %v6044_v35 = vadd.f32 %v6043_v31, %v6042_v12  ;;  %v5933_v37 = vpop.f32.mrf.mxu0  ;;  %v1788_v26 = vmul.f32 %v8138_v18, %v1776_v61 }
 0x121   : > { %v6045_v38 = vpop.f32.mrf.mxu1 }
 0x122   : > { %v1846_v41 = vmul.f32 %v8141_v22, %v1834_v33  ;;  %v1611_v42 = vadd.f32 %v6044_v35, %v5932_v28  ;;  %v5934_v43 = vpop.f32.mrf.mxu0  ;;  %v1777_v28 = vadd.f32 %v8092_v54, %v8098_v2 }
 0x123   : > { %v5935_v49 = vadd.f32 %v5934_v43, %v5933_v37  ;;  %v6046_v50 = vpop.f32.mrf.mxu1 }
 0x124   : > { %v8146_v51 = vadd.f32 %v1846_v41, %v1786_v39  ;;  %v1835_v52 = vadd.f32 %v1802_v46, %v1611_v42  ;;  %v6047_v53 = vadd.f32 %v6046_v50, %v6045_v38  ;;  %v5936_v55 = vpop.f32.mrf.mxu0  ;;  %v1789_v41 = vmul.f32 %v8138_v18, %v1777_v28 }
 0x125   : > { %v6048_v57 = vpop.f32.mrf.mxu1  ;;  %v1778_v42 = vadd.f32 %v8037_v13, %v8104_v17 }
 0x126   : > { %v1847_v48 = vmul.f32 %v8141_v22, %v1835_v52  ;;  %v1616_v1 = vadd.f32 %v6047_v53, %v5935_v49  ;;  %v5937_v4 = vpop.f32.mrf.mxu0 }
 0x127   : > { %v5938_v7 = vadd.f32 %v5937_v4, %v5936_v55  ;;  %v6049_v8 = vpop.f32.mrf.mxu1 }
 0x128   : > { %v8152_v11 = vadd.f32 %v1847_v48, %v1787_v60  ;;  %v1836_v12 = vadd.f32 %v8096_v58, %v1616_v1  ;;  %v6050_v16 = vadd.f32 %v6049_v8, %v6048_v57  ;;  %v5939_v21 = vpop.f32.mrf.mxu0  ;;  %v1790_v57 = vmul.f32 %v8138_v18, %v1778_v42  ;;  %v8198_v42 = vpop.permute.xlu1 %1947 }
 0x129   : > { %v6051_v24 = vpop.f32.mrf.mxu1  ;;  %v1779_v60 = vadd.f32 %v8042_v15, %v8111_v34  ;;  %v1780_v15 = vadd.f32 %v8001_v63, %v8123_v45  ;;  %v1912_v45 = vsub.s32 2, %v8121_v44 }
 0x12a   : > { %v1848_v32 = vmul.f32 %v8141_v22, %v1836_v12  ;;  %v1619_v56 = vadd.f32 %v6050_v16, %v5938_v7  ;;  %v5940_v31 = vpop.f32.mrf.mxu0 }
 0x12b   : > { %v5941_v33 = vadd.f32 %v5940_v31, %v5939_v21  ;;  %v6052_v35 = vpop.f32.mrf.mxu1  ;;  %v1791_v16 = vmul.f32 %v8138_v18, %v1779_v60 }
 0x12c   : > { %v8159_v37 = vadd.f32 %v1848_v32, %v1788_v26  ;;  %v1837_v38 = vadd.f32 %v8100_v6, %v1619_v56  ;;  %v6053_v39 = vadd.f32 %v6052_v35, %v6051_v24  ;;  %v5942_v58 = vpop.f32.mrf.mxu0  ;;  %v8191_v56 = vpop.permute.xlu0 %1942 }
 0x12d   : > { %v6054_v40 = vpop.f32.mrf.mxu1 }
 0x12e   : > { %v1849_v54 = vmul.f32 %v8141_v22, %v1837_v38  ;;  %v1624_v2 = vadd.f32 %v6053_v39, %v5941_v33  ;;  %v5943_v43 = vpop.f32.mrf.mxu0  ;;  %v1792_v33 = vmul.f32 %v8138_v18, %v1780_v15 }
 0x12f   : > { %v5944_v46 = vadd.f32 %v5943_v43, %v5942_v58  ;;  %v6055_v49 = vpop.f32.mrf.mxu1 }
 0x130   : > { %v8166_v50 = vadd.f32 %v1849_v54, %v1789_v41  ;;  %v1838_v52 = vadd.f32 %v8053_v19, %v1624_v2  ;;  %v6056_v53 = vadd.f32 %v6055_v49, %v6054_v40  ;;  %v5945_v6 = vpop.f32.mrf.mxu0  ;;  %v8201_v2 = vrot.slane %v8134_v62, %v1912_v45 }
 0x131   : > { %v6057_v55 = vpop.f32.mrf.mxu1 }
 0x132   : > { %v1850_v13 = vmul.f32 %v8141_v22, %v1838_v52  ;;  %v1627_v17 = vadd.f32 %v6056_v53, %v5944_v46  ;;  %v5946_v61 = vpop.f32.mrf.mxu0  ;;  %v1865_v46 = vpop.permute.xlu0 %1864 }
 0x133   : > { %v5947_v48 = vadd.f32 %v5946_v61, %v5945_v6  ;;  %v6058_v1 = vpop.f32.mrf.mxu1  ;;  %v1870_v61 = vpop.permute.xlu1 %1869 }
 0x134   : > { %v8173_v4 = vadd.f32 %v1850_v13, %v1790_v57  ;;  %v1839_v7 = vadd.f32 %v8055_v20, %v1627_v17  ;;  %v6059_v8 = vadd.f32 %v6058_v1, %v6057_v55  ;;  %v8176_v19 = vpop.f32.mrf.mxu0 }
 0x135   : > { %v8178_v12 = vpop.f32.mrf.mxu1 }
 0x136   : > { %9800 = vst [vmem:[#allocation11_spill] sm:$0xff] %v8173_v4  ;;  %v1851_v34 = vmul.f32 %v8141_v22, %v1839_v7  ;;  %v1632_v21 = vadd.f32 %v6059_v8, %v5947_v48  ;;  %v8184_v24 = vpop.f32.mrf.mxu0  ;;  %v1933_v9 = vpop.permute.xlu0 %1932 }
 0x137   : > { %v8186_v26 = vpop.f32.mrf.mxu1 }
 0x138   : > { %v8188_v28 = vadd.f32 %v1851_v34, %v1791_v16  ;;  %v1840_v20 = vadd.f32 %v8003_v0, %v1632_v21  ;;  %v5951_v32 = vpop.f32.mrf.mxu0 }
 0x139   : > { %v6063_v31 = vpop.f32.mrf.mxu1 }
 0x13a   : > { %9801 = vst [vmem:[#allocation12_spill] sm:$0xff] %v8188_v28  ;;  %v1852_v35 = vmul.f32 %v8141_v22, %v1840_v20  ;;  %v5952_v63 = vpop.f32.mrf.mxu0 }
 0x13b   : > { %v5953_v38 = vadd.f32 %v5952_v63, %v5951_v32  ;;  %v6064_v39 = vpop.f32.mrf.mxu1 }
 0x13c   : > { %v8196_v58 = vadd.f32 %v1852_v35, %v1792_v33  ;;  %v6065_v40 = vadd.f32 %v6064_v39, %v6063_v31  ;;  %v5954_v41 = vpop.f32.mrf.mxu0 }
 0x13d   : > { %v6066_v0 = vpop.f32.mrf.mxu1 }
 0x13e   : > { %9802 = vst [vmem:[#allocation13_spill] sm:$0xff] %v8196_v58  ;;  %v1640_v54 = vadd.f32 %v6065_v40, %v5953_v38  ;;  %v5955_v43 = vpop.f32.mrf.mxu0 }
 0x13f   : > { %v5956_v49 = vadd.f32 %v5955_v43, %v5954_v41  ;;  %v6067_v52 = vpop.f32.mrf.mxu1 }
 0x140   : > { %v1902_v53 = vadd.f32 %v1865_v46, %v1640_v54  ;;  %v6068_v6 = vadd.f32 %v6067_v52, %v6066_v0  ;;  %v5957_v55 = vpop.f32.mrf.mxu0 }
 0x141   : > { %v6069_v57 = vpop.f32.mrf.mxu1 }
 0x142   : > { %v1914_v60 = vmul.f32 %v8201_v2, %v1902_v53  ;;  %v1643_v13 = vadd.f32 %v6068_v6, %v5956_v49  ;;  %v5958_v17 = vpop.f32.mrf.mxu0 }
 0x143   : > { %v6070_v48 = vpop.f32.mrf.mxu1  ;;  %v5959_v53 = vadd.f32 %v5958_v17, %v5957_v55  ;;  %v8229_v55 = vrot.slane %v8134_v62, %v1980_v25 }
 0x144   : > { %v8205_v1 = vadd.f32 %v1914_v60, %v8146_v51  ;;  %v1903_v7 = vadd.f32 %v1870_v61, %v1643_v13  ;;  %v5960_v8 = vpop.f32.mrf.mxu0  ;;  %v6071_v60 = vadd.f32 %v6070_v48, %v6069_v57 }
 0x145   : > { %v6072_v16 = vpop.f32.mrf.mxu1 }
 0x146   : > { %v1915_v15 = vmul.f32 %v8201_v2, %v1903_v7  ;;  %v5961_v34 = vpop.f32.mrf.mxu0  ;;  %v1648_v28 = vadd.f32 %v6071_v60, %v5959_v53 }
 0x147   : > { %v6073_v21 = vpop.f32.mrf.mxu1  ;;  %v5962_v13 = vadd.f32 %v5961_v34, %v5960_v8  ;;  %v1938_v34 = vpop.permute.xlu1 %1937 }
 0x148   : > { %v8209_v20 = vadd.f32 %v1915_v15, %v8152_v11  ;;  %v5963_v32 = vpop.f32.mrf.mxu0  ;;  %v6074_v61 = vadd.f32 %v6073_v21, %v6072_v16  ;;  %v1904_v44 = vadd.f32 %v8113_v36, %v1648_v28 }
 0x149   : > { %v6075_v31 = vpop.f32.mrf.mxu1 }
 0x14a   : > { %v5964_v33 = vpop.f32.mrf.mxu0  ;;  %v1651_v4 = vadd.f32 %v6074_v61, %v5962_v13  ;;  %v1916_v36 = vmul.f32 %v8201_v2, %v1904_v44  ;;  %v5950_v61 = vadd.f32 %v8184_v24, %v8176_v19 }
 0x14b   : > { %v6076_v35 = vpop.f32.mrf.mxu1 }
 0x14c   : > { %v5966_v63 = vpop.f32.mrf.mxu0  ;;  %v6077_v25 = vadd.f32 %v6076_v35, %v6075_v31 }
 0x14d   : > { %v6078_v45 = vpop.f32.mrf.mxu1 }
 0x14e   : > { %v5967_v38 = vpop.f32.mrf.mxu0 }
 0x14f   : > { %v6079_v39 = vpop.f32.mrf.mxu1  ;;  %v5968_v62 = vadd.f32 %v5967_v38, %v5966_v63 }
 0x150   : > { %v8211_v51 = vpop.f32.mrf.mxu0 }
 0x151   : > { %v8213_v40 = vpop.f32.mrf.mxu1 }
 0x152   : > { %v8215_v41 = vpop.f32.mrf.mxu0 }
 0x153   : > { %v8217_v0 = vpop.f32.mrf.mxu1  ;;  %v5971_v19 = vadd.f32 %v8215_v41, %v8211_v51 }
 0x154   : > { %v8219_v54 = vpop.f32.mrf.mxu0 }
 0x155   : > { %v8221_v11 = vpop.f32.mrf.mxu1 }
 0x156   : > { %v8223_v43 = vpop.f32.mrf.mxu0 }
 0x157   : > { %v8225_v46 = vpop.f32.mrf.mxu1 }
 0x158   : > { %v5975_v49 = vpop.f32.mrf.mxu0  ;;  %v6086_v24 = vadd.f32 %v8225_v46, %v8221_v11 }
 0x159   : > { %v6087_v52 = vpop.f32.mrf.mxu1 }
 0x15a   : > { %v5976_v6 = vpop.f32.mrf.mxu0 }
 0x15b   : > { %v5977_v7 = vadd.f32 %v5976_v6, %v5975_v49  ;;  %v6088_v15 = vpop.f32.mrf.mxu1 }
 0x15c   : > { %v6089_v58 = vadd.f32 %v6088_v15, %v6087_v52  ;;  %v5978_v18 = vpop.f32.mrf.mxu0 }
 0x15d   : > { %v6090_v23 = vpop.f32.mrf.mxu1 }
 0x15e   : > { %v1672_v22 = vadd.f32 %v6089_v58, %v5977_v7  ;;  %v5979_v10 = vpop.f32.mrf.mxu0  ;;  %v1905_v58 = vadd.f32 %v8125_v47, %v1651_v4  ;;  %v6062_v7 = vadd.f32 %v8186_v26, %v8178_v12 }
 0x15f   : > { %v5980_v3 = vadd.f32 %v5979_v10, %v5978_v18  ;;  %v6091_v59 = vpop.f32.mrf.mxu1 }
 0x160   : > { %v1970_v27 = vadd.f32 %v1933_v9, %v1672_v22  ;;  %v6092_v57 = vadd.f32 %v6091_v59, %v6090_v23  ;;  %v5981_v17 = vpop.f32.mrf.mxu0  ;;  %v5965_v22 = vadd.f32 %v5964_v33, %v5963_v32  ;;  %v6080_v23 = vadd.f32 %v6079_v39, %v6078_v45 }
 0x161   : > { %v6093_v48 = vpop.f32.mrf.mxu1  ;;  %v1917_v47 = vmul.f32 %v8201_v2, %v1905_v58 }
 0x162   : > { %v1675_v8 = vadd.f32 %v6092_v57, %v5980_v3  ;;  %v5982_v16 = vpop.f32.mrf.mxu0  ;;  %v1982_v52 = vmul.f32 %v8229_v55, %v1970_v27  ;;  %v1656_v33 = vadd.f32 %v6077_v25, %v5965_v22  ;;  %v1659_v35 = vadd.f32 %v6080_v23, %v5968_v62 }
 0x163   : > { %v5983_v21 = vadd.f32 %v5982_v16, %v5981_v17  ;;  %v6094_v49 = vpop.f32.mrf.mxu1  ;;  %v1925_v57 = vadd.f32 %v1917_v47, %v8166_v50  ;;  %v5974_v50 = vadd.f32 %v8223_v43, %v8219_v54  ;;  %v9806_v47 = vld [vmem:[#allocation11_spill] sm:$0xff] }
 0x164   : > { %v1971_v10 = vadd.f32 %v1938_v34, %v1675_v8  ;;  %v6095_v18 = vadd.f32 %v6094_v49, %v6093_v48  ;;  %v5984_v9 = vpop.f32.mrf.mxu0  ;;  %v1990_v27 = vadd.f32 %v1982_v52, %v8205_v1  ;;  %v1924_v1 = vadd.f32 %v1916_v36, %v8159_v37 }
 0x165   : > { %v6096_v59 = vpop.f32.mrf.mxu1  ;;  %v1906_v16 = vadd.f32 %v8079_v29, %v1656_v33  ;;  %v1907_v34 = vadd.f32 %v8081_v30, %v1659_v35  ;;  %v6083_v37 = vadd.f32 %v8217_v0, %v8213_v40  ;;  %v1635_v29 = vadd.f32 %v6062_v7, %v5950_v61 }
 0x166   : > { %v1983_v3 = vmul.f32 %v8229_v55, %v1971_v10  ;;  %v1680_v53 = vadd.f32 %v6095_v18, %v5983_v21  ;;  %v5985_v6 = vpop.f32.mrf.mxu0  ;;  %v1667_v11 = vadd.f32 %v6086_v24, %v5974_v50  ;;  %v9813_v50 = vld [vmem:[#allocation6_spill] sm:$0xff] }
 0x167   : > { %v5986_v4 = vadd.f32 %v5985_v6, %v5984_v9  ;;  %v6097_v28 = vpop.f32.mrf.mxu1  ;;  %v1918_v0 = vmul.f32 %v8201_v2, %v1906_v16  ;;  %v1919_v54 = vmul.f32 %v8201_v2, %v1907_v34  ;;  %v1664_v52 = vadd.f32 %v6083_v37, %v5971_v19  ;;  %v9805_v6 = vld [vmem:[#allocation2_spill] sm:$0xff] }
 0x168   : > { %v1972_v60 = vadd.f32 %v8191_v56, %v1680_v53  ;;  %v6098_v13 = vadd.f32 %v6097_v28, %v6096_v59  ;;  %v5987_v32 = vpop.f32.mrf.mxu0  ;;  %v1991_v31 = vadd.f32 %v1983_v3, %v8209_v20  ;;  %v1841_v9 = vadd.f32 %v8016_v5, %v1635_v29  ;;  %v9804_v53 = vld [vmem:[#allocation8_spill] sm:$0xff] }
 0x169   : > { %v6099_v63 = vpop.f32.mrf.mxu1  ;;  %v1781_v36 = vadd.f32 %v9805_v6, %v9804_v53  ;;  %v9807_v28 = vld [vmem:[#allocation12_spill] sm:$0xff] }
 0x16a   : > { %v1683_v45 = vadd.f32 %v6098_v13, %v5986_v4  ;;  %v5988_v38 = vpop.f32.mrf.mxu0  ;;  %v8240_v39 = vpack.c.bf16 %v1991_v31, %v1990_v27  ;;  %v1984_v20 = vmul.f32 %v8229_v55, %v1972_v60  ;;  %v1926_v4 = vadd.f32 %v1918_v0, %v9806_v47  ;;  %v9808_v13 = vld [vmem:[#allocation3_spill] sm:$0xff]  ;;  %v9809_v31 = vld [vmem:[#allocation4_spill] sm:$0xff] }
 0x16b   : > { %v5989_v56 = vadd.f32 %v5988_v38, %v5987_v32  ;;  %v6100_v15 = vpop.f32.mrf.mxu1  ;;  %v1927_v27 = vadd.f32 %v1919_v54, %v9807_v28  ;;  %v1908_v32 = vadd.f32 %v9808_v13, %v1664_v52  ;;  %v1909_v5 = vadd.f32 %v9809_v31, %v1667_v11  ;;  %v838_v52 = vld [vmem:[%s8287_s23 + $0x178] sm:$0xff]  ;;  %v819_v11 = vld [vmem:[%s8287_s23 + $0xe0] sm:$0xff]  ;;  %v817_v47 = vld [vmem:[%s8287_s23 + $0xd0] sm:$0xff] }
 0x16c   : > { %v1973_v17 = vadd.f32 %v8198_v42, %v1683_v45  ;;  %v6101_v48 = vadd.f32 %v6100_v15, %v6099_v63  ;;  %v5990_v8 = vpop.f32.mrf.mxu0  ;;  %v1992_v21 = vadd.f32 %v1984_v20, %v1924_v1  ;;  %v9810_v45 = vld [vmem:[#allocation10_spill] sm:$0xff]  ;;  %v849_v28 = vld [vmem:[%s8287_s23 + $0x1d0] sm:$0xff]  ;;  %v802_v31 = vld [vmem:[%s8287_s23 + $0x58] sm:$0xff] }
 0x16d   : > { %v6102_v12 = vpop.f32.mrf.mxu1  ;;  %v1853_v38 = vmul.f32 %v9810_v45, %v1841_v9  ;;  %v1921_v16 = vmul.f32 %v8201_v2, %v1909_v5  ;;  %v852_v9 = vld [vmem:[%s8287_s23 + $0x1e8] sm:$0xff]  ;;  %v815_v45 = vld [vmem:[%s8287_s23 + $0xc0] sm:$0xff] }
 0x16e   : > { %v1985_v26 = vmul.f32 %v8229_v55, %v1973_v17  ;;  %v1688_v42 = vadd.f32 %v6101_v48, %v5989_v56  ;;  %v5991_v44 = vpop.f32.mrf.mxu0  ;;  %v9811_v56 = vld [vmem:[#allocation5_spill] sm:$0xff] }
 0x16f   : > { %v5992_v58 = vadd.f32 %v5991_v44, %v5990_v8  ;;  %v6103_v30 = vpop.f32.mrf.mxu1  ;;  %v9812_v17 = vld [vmem:[#allocation9_spill] sm:$0xff]  ;;  %v1920_v8 = vmul.f32 %v8201_v2, %v1908_v32  ;;  %v821_v2 = vld [vmem:[%s8287_s23 + $0xf0] sm:$0xff] }
 0x170   : > { %v1974_v51 = vadd.f32 %v8102_v14, %v1688_v42  ;;  %v6104_v41 = vadd.f32 %v6103_v30, %v6102_v12  ;;  %v5993_v49 = vpop.f32.mrf.mxu0  ;;  %v1993_v40 = vadd.f32 %v1985_v26, %v1925_v57  ;;  %v9803_v14 = vld [vmem:[#allocation7_spill] sm:$0xff]  ;;  %v1793_v48 = vmul.f32 %v9812_v17, %v1781_v36  ;;  %v9814_v26 = vld [vmem:[#allocation13_spill] sm:$0xff]  ;;  %v7022_v36 = vld [vmem:[%s9774_s6 + $0x50] sm:$0xff]  }
 0x171   : > { %v6105_v43 = vpop.f32.mrf.mxu1  ;;  %v1928_v42 = vadd.f32 %v1920_v8, %v9814_v26  ;;  %v801_v32 = vld [vmem:[%s8287_s23 + $0x50] sm:$0xff]  ;;  %v800_v17 = vld [vmem:[%s8287_s23 + $0x48] sm:$0xff]  ;;  %v846_v26 = vld [vmem:[%s8287_s23 + $0x1b8] sm:$0xff] }
 0x172   : > { %v1691_v46 = vadd.f32 %v6104_v41, %v5992_v58  ;;  %v5994_v10 = vpop.f32.mrf.mxu0  ;;  %v1999_v18 = vpack.c.bf16 %v1993_v40, %v1992_v21  ;;  %v1986_v62 = vmul.f32 %v8229_v55, %v1974_v51  ;;  %v1861_v37 = vadd.f32 %v1853_v38, %v1793_v48  ;;  %v853_v51 = vld [vmem:[%s8287_s23 + $0x1f0] sm:$0xff]  ;;  %v854_v41 = vld [vmem:[%s8287_s23 + $0x1f8] sm:$0xff]  ;;  %v816_v38 = vld [vmem:[%s8287_s23 + $0xc8] sm:$0xff] }
 0x173   : > { %v5995_v22 = vadd.f32 %v5994_v10, %v5993_v49  ;;  %v6106_v25 = vpop.f32.mrf.mxu1  ;;  %v805_v49 = vld [vmem:[%s8287_s23 + $0x70] sm:$0xff]  ;;  %v806_v40 = vld [vmem:[%s8287_s23 + $0x78] sm:$0xff]  ;;  %v958_v54 = vpack.c.bf16 %v854_v41, %v853_v51  ;;  %v851_v10 = vld [vmem:[%s8287_s23 + $0x1e0] sm:$0xff] }
 0x174   : > { %v1975_v23 = vadd.f32 %v9803_v14, %v1691_v46  ;;  %v6107_v59 = vadd.f32 %v6106_v25, %v6105_v43  ;;  %v5996_v3 = vpop.f32.mrf.mxu0  ;;  %v1994_v1 = vadd.f32 %v1986_v62, %v1926_v4  ;;  %v1929_v44 = vadd.f32 %v1921_v16, %v1861_v37  ;;  %v837_v43 = vld [vmem:[%s8287_s23 + $0x170] sm:$0xff]  ;;  %v820_v46 = vld [vmem:[%s8287_s23 + $0xe8] sm:$0xff]  ;;  %v803_v25 = vld [vmem:[%s8287_s23 + $0x60] sm:$0xff] }
 0x175   : > { %v6108_v60 = vpop.f32.mrf.mxu1  ;;  %v934_v62 = vpack.c.bf16 %v806_v40, %v805_v49  ;;  %v950_v14 = vpack.c.bf16 %v838_v52, %v837_v43  ;;  %v941_v53 = vpack.c.bf16 %v820_v46, %v819_v11  ;;  %v957_v6 = vpack.c.bf16 %v852_v9, %v851_v10  ;;  %v818_v4 = vld [vmem:[%s8287_s23 + $0xd8] sm:$0xff]  ;;  %v831_v48 = vld [vmem:[%s8287_s23 + $0x140] sm:$0xff]  ;;  %v832_v8 = vld [vmem:[%s8287_s23 + $0x148] sm:$0xff] }
 0x176   : > { %v1987_v33 = vmul.f32 %v8229_v55, %v1975_v23  ;;  %v1696_v35 = vadd.f32 %v6107_v59, %v5995_v22  ;;  %v5997_v63 = vpop.f32.mrf.mxu0  ;;  %v7021_v22 = vld [vmem:[%s9774_s6 + $0x8] sm:$0xff]   ;;  %v835_v59 = vld [vmem:[%s8287_s23 + $0x160] sm:$0xff]  ;;  %v940_v5 = vpack.c.bf16 %v818_v4, %v817_v47  ;;  %v939_v16 = vpack.c.bf16 %v816_v38, %v815_v45  ;;  %v813_v37 = vld [vmem:[%s8287_s23 + $0xb0] sm:$0xff] }
 0x177   : > { %v5998_v61 = vadd.f32 %v5997_v63, %v5996_v3  ;;  %v6109_v7 = vpop.f32.mrf.mxu1  ;;  %v804_v23 = vld [vmem:[%s8287_s23 + $0x68] sm:$0xff]  ;;  %v834_v63 = vld [vmem:[%s8287_s23 + $0x158] sm:$0xff]  ;;  %v811_v51 = vld [vmem:[%s8287_s23 + $0xa0] sm:$0xff] }
 0x178   : > { %v1976_v15 = vadd.f32 %v9811_v56, %v1696_v35  ;;  %v6110_v57 = vadd.f32 %v6109_v7, %v6108_v60  ;;  %v1995_v20 = vadd.f32 %v1987_v33, %v1927_v27  ;;  %v836_v3 = vld [vmem:[%s8287_s23 + $0x168] sm:$0xff]  ;;  %v850_v27 = vld [vmem:[%s8287_s23 + $0x1d8] sm:$0xff]  ;;  %v933_v60 = vpack.c.bf16 %v804_v23, %v803_v25  ;;  %v833_v35 = vld [vmem:[%s8287_s23 + $0x150] sm:$0xff] }
 0x179   : > { %v949_v13 = vpack.c.bf16 %v836_v3, %v835_v59  ;;  %v956_v33 = vpack.c.bf16 %v850_v27, %v849_v28  ;;  %v848_v7 = vld [vmem:[%s8287_s23 + $0x1c8] sm:$0xff]  ;;  %v7025_v56 = vld [vmem:[%s9774_s6 + $0x18] sm:$0xff]   ;;  %v843_v49 = vld [vmem:[%s8287_s23 + $0x1a0] sm:$0xff] }
 0x17a   : > { %v1699_v34 = vadd.f32 %v6110_v57, %v5998_v61  ;;  %v2000_v19 = vpack.c.bf16 %v1995_v20, %v1994_v1  ;;  %v1988_v12 = vmul.f32 %v8229_v55, %v1976_v15  ;;  %v847_v61 = vld [vmem:[%s8287_s23 + $0x1c0] sm:$0xff]  ;;  %v7023_v1 = vld [vmem:[%s9774_s6 + $0x58] sm:$0xff]   ;;  %v932_v57 = vpack.c.bf16 %v802_v31, %v801_v32  ;;  %v812_v41 = vld [vmem:[%s8287_s23 + $0xa8] sm:$0xff] }
 0x17b   : > { %v799_v15 = vld [vmem:[%s8287_s23 + $0x40] sm:$0xff]  ;;  %v948_v20 = vpack.c.bf16 %v834_v63, %v833_v35  ;;  %v844_v40 = vld [vmem:[%s8287_s23 + $0x1a8] sm:$0xff]  ;;  %v7030_v25 = vld [vmem:[%s9774_s6 + $0x70] sm:$0xff]  }
 0x17c   : > { %v1977_v24 = vadd.f32 %v9813_v50, %v1699_v34  ;;  %v1996_v58 = vadd.f32 %v1988_v12, %v1928_v42  ;;  %v955_v34 = vpack.c.bf16 %v848_v7, %v847_v61  ;;  %v814_v12 = vld [vmem:[%s8287_s23 + $0xb8] sm:$0xff]  ;;  %v7028_v50 = vld [vmem:[%s9774_s6 + $0x20] sm:$0xff]   ;;  %v931_v42 = vpack.c.bf16 %v800_v17, %v799_v15  ;;  %v796_v46 = vld [vmem:[%s8287_s23 + $0x28] sm:$0xff] }
 0x17d   : > { %v795_v43 = vld [vmem:[%s8287_s23 + $0x20] sm:$0xff]  ;;  %v828_v9 = vld [vmem:[%s8287_s23 + $0x128] sm:$0xff]  ;;  %v7032_v23 = vld [vmem:[%s9774_s6 + $0x30] sm:$0xff]  }
 0x17e   : > { %v1989_v29 = vmul.f32 %v8229_v55, %v1977_v24  ;;  %v822_v55 = vld [vmem:[%s8287_s23 + $0xf8] sm:$0xff]  ;;  %v845_v24 = vld [vmem:[%s8287_s23 + $0x1b0] sm:$0xff]  ;;  %v827_v10 = vld [vmem:[%s8287_s23 + $0x120] sm:$0xff] }
 0x17f   : > { %v942_v0 = vpack.c.bf16 %v822_v55, %v821_v2  ;;  %v829_v2 = vld [vmem:[%s8287_s23 + $0x130] sm:$0xff]  ;;  %v830_v55 = vld [vmem:[%s8287_s23 + $0x138] sm:$0xff]  ;;  %v839_v32 = vld [vmem:[%s8287_s23 + $0x180] sm:$0xff] }
 0x180   : > { %v1997_v30 = vadd.f32 %v1989_v29, %v1929_v44  ;;  %v947_v44 = vpack.c.bf16 %v832_v8, %v831_v48  ;;  %v797_v29 = vld [vmem:[%s8287_s23 + $0x30] sm:$0xff]  ;;  %v946_v11 = vpack.c.bf16 %v830_v55, %v829_v2  ;;  %v842_v3 = vld [vmem:[%s8287_s23 + $0x198] sm:$0xff]  ;;  %v840_v31 = vld [vmem:[%s8287_s23 + $0x188] sm:$0xff] }
 0x181   : > { %v841_v59 = vld [vmem:[%s8287_s23 + $0x190] sm:$0xff]  ;;  %v794_v47 = vld [vmem:[%s8287_s23 + $0x18] sm:$0xff]  ;;  %v791_v35 = vld [vmem:[%s8287_s23] sm:$0xff] }
 0x182   : > { %v2001_v21 = vpack.c.bf16 %v1997_v30, %v1996_v58  ;;  %v798_v58 = vld [vmem:[%s8287_s23 + $0x38] sm:$0xff]  ;;  %v938_v30 = vpack.c.bf16 %v814_v12, %v813_v37  ;;  %v825_v28 = vld [vmem:[%s8287_s23 + $0x110] sm:$0xff]  ;;  %v792_v38 = vld [vmem:[%s8287_s23 + $0x8] sm:$0xff] }
 0x183   : > { %v930_v52 = vpack.c.bf16 %v798_v58, %v797_v29  ;;  %v826_v27 = vld [vmem:[%s8287_s23 + $0x118] sm:$0xff]  ;;  %v823_v61 = vld [vmem:[%s8287_s23 + $0x100] sm:$0xff]  ;;  %v824_v7 = vld [vmem:[%s8287_s23 + $0x108] sm:$0xff] }
 0x184   : > { %6784 = vmatprep.subr.bf16.mxu0 %v2001_v21  ;;  %6884 = vmatprep.subr.bf16.mxu1 %v2001_v21  ;;  %v944_v45 = vpack.c.bf16 %v826_v27, %v825_v28  ;;  %v7036_v15 = vld [vmem:[%s9773_s5 + $0x4] ss:$36 sps:$4 sm:$0xff]   ;;  %v886_v17 = vld [vmem:[%s8287_s23 + $0x2f8] sm:$0xff]  ;;  %v917_v48 = vld [vmem:[%s8287_s23 + $0x3f0] sm:$0xff] }
 0x185   : > { %6785 = vmatpush3.bf16.msra.mxu0 %v2001_v21  ;;  %6888 = vmatpush3.bf16.msra.mxu1 %v2001_v21  ;;  %v954_v21 = vpack.c.bf16 %v846_v26, %v845_v24  ;;  %v918_v8 = vld [vmem:[%s8287_s23 + $0x3f8] sm:$0xff]  ;;  %v7037_v37 = vld [vmem:[%s9773_s5 + $0x8] ss:$36 sps:$4 sm:$0xff]   ;;  %v883_v29 = vld [vmem:[%s8287_s23 + $0x2e0] sm:$0xff] }
 0x186   : > { %6786 = vmatprep.subr.bf16.mxu0 %v2000_v19  ;;  %6885 = vmatprep.subr.bf16.mxu1 %v2000_v19  ;;  %v870_v24 = vld [vmem:[%s8287_s23 + $0x278] sm:$0xff]  ;;  %v990_v26 = vpack.c.bf16 %v918_v8, %v917_v48  ;;  %v884_v58 = vld [vmem:[%s8287_s23 + $0x2e8] sm:$0xff] }
 0x187   : > { %v7040_v2 = vld [vmem:[%s9773_s5 + $0x4c] ss:$36 sps:$4 sm:$0xff]   ;;  %v7043_v55 = vld [vmem:[%s9773_s5 + $0x54] ss:$36 sps:$4 sm:$0xff]   ;;  %v7049_v27 = vld [vmem:[%s9773_s5 + $0x9c] ss:$36 sps:$4 sm:$0xff]  }
 0x188   : > { %v7046_v28 = vld [vmem:[%s9773_s5 + $0x94] ss:$36 sps:$4 sm:$0xff]  }
 0x189   : > { %6787 = vmatpush3.bf16.msra.mxu0 %v2000_v19  ;;  %6889 = vmatpush3.bf16.msra.mxu1 %v2000_v19  ;;  %v7026_v19 = vld [vmem:[%s9774_s6 + $0x60] sm:$0xff]  }
 0x18a   : > { %6788 = vmatprep.subr.bf16.mxu0 %v1999_v18  ;;  %6886 = vmatprep.subr.bf16.mxu1 %v1999_v18 }
 0x18d   : > { %6789 = vmatpush3.bf16.msra.mxu0 %v1999_v18  ;;  %6890 = vmatpush3.bf16.msra.mxu1 %v1999_v18  ;;  %v7019_v18 = vld [vmem:[%s9774_s6 + $0x48] sm:$0xff]  }
 0x18e   : > { %6790 = vmatprep.subr.bf16.mxu0 %v8240_v39  ;;  %6887 = vmatprep.subr.bf16.mxu1 %v8240_v39 }
 0x191   : > { %6791 = vmatpush3.bf16.msra.mxu0 %v8240_v39  ;;  %6891 = vmatpush3.bf16.msra.mxu1 %v8240_v39  ;;  %v7024_v39 = vld [vmem:[%s9774_s6 + $0x10] sm:$0xff]  }
 0x192   : > { %6131 = vmatprep.subr.bf16.mxu1 %v942_v0  ;;  %6243 = vmatprep.subr.bf16.mxu0 %v958_v54  ;;  %v7027_v0 = vld [vmem:[%s9774_s6 + $0x68] sm:$0xff]  }
 0x193   : > { %v7029_v54 = vld [vmem:[%s9774_s6 + $0x28] sm:$0xff]  }
 0x194   : > { %6809 = vmatmul.mubr.msk.bf16.vlgmr.msra.gmra.mxu1 %vm2274_vm0, %v7019_v18  ;;  %6793 = vmatmul.mubr.msk.bf16.vlgmr.msra.gmra.mxu0 %vm2274_vm0, %v7021_v22  ;;  %v937_v18 = vpack.c.bf16 %v812_v41, %v811_v51  ;;  %v953_v22 = vpack.c.bf16 %v844_v40, %v843_v49  ;;  %v867_v49 = vld [vmem:[%s8287_s23 + $0x260] sm:$0xff]  ;;  %v868_v40 = vld [vmem:[%s8287_s23 + $0x268] sm:$0xff] }
 0x195   : > { %6132 = vmatpush3.bf16.msra.mxu1 %v934_v62  ;;  %6244 = vmatpush3.bf16.msra.mxu0 %v950_v14  ;;  %v809_v62 = vld [vmem:[%s8287_s23 + $0x90] sm:$0xff]  ;;  %v810_v14 = vld [vmem:[%s8287_s23 + $0x98] sm:$0xff] }
 0x196   : > { %6133 = vmatprep.subr.bf16.mxu1 %v941_v53  ;;  %6245 = vmatprep.subr.bf16.mxu0 %v957_v6  ;;  %v929_v53 = vpack.c.bf16 %v796_v46, %v795_v43  ;;  %v945_v6 = vpack.c.bf16 %v828_v9, %v827_v10  ;;  %v936_v4 = vpack.c.bf16 %v810_v14, %v809_v62  ;;  %v899_v43 = vld [vmem:[%s8287_s23 + $0x360] sm:$0xff]  ;;  %v882_v46 = vld [vmem:[%s8287_s23 + $0x2d8] sm:$0xff]  ;;  %v913_v10 = vld [vmem:[%s8287_s23 + $0x3d0] sm:$0xff] }
 0x197   : > { %6812 = vmatprep.mubr.msk.bf16.mxu1 %vm2274_vm0, %v7022_v36  ;;  %6796 = vmatprep.mubr.msk.bf16.mxu0 %vm2274_vm0, %v7024_v39  ;;  %v793_v36 = vld [vmem:[%s8287_s23 + $0x10] sm:$0xff]  ;;  %v952_v39 = vpack.c.bf16 %v842_v3, %v841_v59  ;;  %v914_v9 = vld [vmem:[%s8287_s23 + $0x3d8] sm:$0xff] }
 0x198   : > { %v928_v63 = vpack.c.bf16 %v794_v47, %v793_v36  ;;  %v865_v14 = vld [vmem:[%s8287_s23 + $0x250] sm:$0xff]  ;;  %v988_v3 = vpack.c.bf16 %v914_v9, %v913_v10  ;;  %v879_v36 = vld [vmem:[%s8287_s23 + $0x2c0] sm:$0xff]  ;;  %v880_v47 = vld [vmem:[%s8287_s23 + $0x2c8] sm:$0xff] }
 0x199   : > { %6134 = vmatpush3.bf16.msra.mxu1 %v933_v60  ;;  %6246 = vmatpush3.bf16.msra.mxu0 %v949_v13  ;;  %v807_v60 = vld [vmem:[%s8287_s23 + $0x80] sm:$0xff]  ;;  %v808_v13 = vld [vmem:[%s8287_s23 + $0x88] sm:$0xff] }
 0x19a   : > { %6135 = vmatprep.subr.bf16.mxu1 %v940_v5  ;;  %6247 = vmatprep.subr.bf16.mxu0 %v956_v33  ;;  %v7031_v5 = vld [vmem:[%s9774_s6 + $0x78] sm:$0xff]  }
 0x19b   : > { %v7033_v33 = vld [vmem:[%s9774_s6 + $0x38] sm:$0xff]  }
 0x19c   : > { %6813 = vmatmul.mubr.msk.bf16.gmra.mxu1 %vm2274_vm0, %v7023_v1  ;;  %6797 = vmatmul.mubr.msk.bf16.gmra.mxu0 %vm2274_vm0, %v7025_v56  ;;  %v935_v1 = vpack.c.bf16 %v808_v13, %v807_v60  ;;  %v951_v56 = vpack.c.bf16 %v840_v31, %v839_v32  ;;  %v863_v32 = vld [vmem:[%s8287_s23 + $0x240] sm:$0xff]  ;;  %v864_v31 = vld [vmem:[%s8287_s23 + $0x248] sm:$0xff] }
 0x19d   : > { %6136 = vmatpush3.bf16.msra.mxu1 %v932_v57  ;;  %6248 = vmatpush3.bf16.msra.mxu0 %v948_v20  ;;  %v7039_v57 = vld [vmem:[%s9773_s5 + $0xc] ss:$36 sps:$4 sm:$0xff]  }
 0x19e   : > { %6137 = vmatprep.subr.bf16.mxu1 %v939_v16  ;;  %6249 = vmatprep.subr.bf16.mxu0 %v955_v34  ;;  %v885_v20 = vld [vmem:[%s8287_s23 + $0x2f0] sm:$0xff]  ;;  %v927_v16 = vpack.c.bf16 %v792_v38, %v791_v35  ;;  %v943_v34 = vpack.c.bf16 %v824_v7, %v823_v61  ;;  %v895_v35 = vld [vmem:[%s8287_s23 + $0x340] sm:$0xff]  ;;  %v878_v38 = vld [vmem:[%s8287_s23 + $0x2b8] sm:$0xff] }
 0x19f   : > { %6816 = vmatprep.mubr.msk.bf16.mxu1 %vm2274_vm0, %v7026_v19  ;;  %6800 = vmatprep.mubr.msk.bf16.mxu0 %vm2274_vm0, %v7028_v50  ;;  %v7034_v19 = vld [vmem:[%s9773_s5] ss:$36 sps:$4 sm:$0xff]   ;;  %v974_v12 = vpack.c.bf16 %v886_v17, %v885_v20  ;;  %v869_v50 = vld [vmem:[%s8287_s23 + $0x270] sm:$0xff]  ;;  %v910_v7 = vld [vmem:[%s8287_s23 + $0x3b8] sm:$0xff] }
 0x1a0   : > { %v966_v51 = vpack.c.bf16 %v870_v24, %v869_v50  ;;  %v909_v61 = vld [vmem:[%s8287_s23 + $0x3b0] sm:$0xff]  ;;  %v862_v17 = vld [vmem:[%s8287_s23 + $0x238] sm:$0xff]  ;;  %v908_v50 = vld [vmem:[%s8287_s23 + $0x3a8] sm:$0xff] }
 0x1a1   : > { %6138 = vmatpush3.bf16.msra.mxu1 %v931_v42  ;;  %6250 = vmatpush3.bf16.msra.mxu0 %v947_v44  ;;  %v901_v42 = vld [vmem:[%s8287_s23 + $0x370] sm:$0xff]  ;;  %v902_v44 = vld [vmem:[%s8287_s23 + $0x378] sm:$0xff]  ;;  %v986_v8 = vpack.c.bf16 %v910_v7, %v909_v61 }
 0x1a2   : > { %6139 = vmatprep.subr.bf16.mxu1 %v938_v30  ;;  %6251 = vmatprep.subr.bf16.mxu0 %v954_v21  ;;  %v915_v30 = vld [vmem:[%s8287_s23 + $0x3e0] sm:$0xff]  ;;  %v916_v21 = vld [vmem:[%s8287_s23 + $0x3e8] sm:$0xff]  ;;  %v982_v41 = vpack.c.bf16 %v902_v44, %v901_v42  ;;  %v861_v20 = vld [vmem:[%s8287_s23 + $0x230] sm:$0xff] }
 0x1a3   : > { %v7052_v24 = vld [vmem:[%s9773_s5 + $0xdc] ss:$36 sps:$4 sm:$0xff]   ;;  %v962_v42 = vpack.c.bf16 %v862_v17, %v861_v20  ;;  %v7072_v61 = vld [vmem:[%s9773_s5 + $0x1b0] ss:$36 sps:$4 sm:$0xff]   ;;  %v7084_v20 = vld [vmem:[%s9773_s5 + $0x244] ss:$36 sps:$4 sm:$0xff]  }
 0x1a4   : > { %6817 = vmatmul.mubr.msk.bf16.gmra.mxu1 %vm2274_vm0, %v7027_v0  ;;  %6801 = vmatmul.mubr.msk.bf16.gmra.mxu0 %vm2274_vm0, %v7029_v54  ;;  %v973_v0 = vpack.c.bf16 %v884_v58, %v883_v29  ;;  %v989_v54 = vpack.c.bf16 %v916_v21, %v915_v30  ;;  %v859_v29 = vld [vmem:[%s8287_s23 + $0x220] sm:$0xff]  ;;  %v860_v58 = vld [vmem:[%s8287_s23 + $0x228] sm:$0xff]  ;;  %v7075_v7 = vld [vmem:[%s9773_s5 + $0x1b8] ss:$36 sps:$4 sm:$0xff]  }
 0x1a5   : > { %6140 = vmatpush3.bf16.msra.mxu1 %v930_v52  ;;  %6252 = vmatpush3.bf16.msra.mxu0 %v946_v11  ;;  %v900_v52 = vld [vmem:[%s8287_s23 + $0x368] sm:$0xff]  ;;  %v881_v11 = vld [vmem:[%s8287_s23 + $0x2d0] sm:$0xff] }
 0x1a6   : > { %6141 = vmatprep.subr.bf16.mxu1 %v937_v18  ;;  %6253 = vmatprep.subr.bf16.mxu0 %v953_v22  ;;  %v7042_v18 = vld [vmem:[%s9773_s5 + $0x48] ss:$36 sps:$4 sm:$0xff]   ;;  %v7045_v22 = vld [vmem:[%s9773_s5 + $0x50] ss:$36 sps:$4 sm:$0xff]   ;;  %v981_v62 = vpack.c.bf16 %v900_v52, %v899_v43  ;;  %v972_v59 = vpack.c.bf16 %v882_v46, %v881_v11  ;;  %v961_v43 = vpack.c.bf16 %v860_v58, %v859_v29  ;;  %v858_v46 = vld [vmem:[%s8287_s23 + $0x218] sm:$0xff] }
 0x1a7   : > { %6820 = vmatprep.mubr.msk.bf16.mxu1 %vm2274_vm0, %v7030_v25  ;;  %6804 = vmatprep.mubr.msk.bf16.mxu0 %vm2274_vm0, %v7032_v23  ;;  %v965_v25 = vpack.c.bf16 %v868_v40, %v867_v49  ;;  %v866_v23 = vld [vmem:[%s8287_s23 + $0x258] sm:$0xff]  ;;  %v905_v49 = vld [vmem:[%s8287_s23 + $0x390] sm:$0xff]  ;;  %v7103_v58 = vld [vmem:[%s9773_s5 + $0x320] ss:$36 sps:$4 sm:$0xff]  }
 0x1a8   : > { %v964_v60 = vpack.c.bf16 %v866_v23, %v865_v14  ;;  %v906_v40 = vld [vmem:[%s8287_s23 + $0x398] sm:$0xff]  ;;  %v857_v11 = vld [vmem:[%s8287_s23 + $0x210] sm:$0xff]  ;;  %v903_v14 = vld [vmem:[%s8287_s23 + $0x380] sm:$0xff] }
 0x1a9   : > { %6142 = vmatpush3.bf16.msra.mxu1 %v929_v53  ;;  %6254 = vmatpush3.bf16.msra.mxu0 %v945_v6  ;;  %v897_v53 = vld [vmem:[%s8287_s23 + $0x350] sm:$0xff]  ;;  %v898_v6 = vld [vmem:[%s8287_s23 + $0x358] sm:$0xff]  ;;  %v984_v9 = vpack.c.bf16 %v906_v40, %v905_v49  ;;  %v904_v23 = vld [vmem:[%s8287_s23 + $0x388] sm:$0xff] }
 0x1aa   : > { %6143 = vmatprep.subr.bf16.mxu1 %v936_v4  ;;  %6255 = vmatprep.subr.bf16.mxu0 %v952_v39  ;;  %v911_v4 = vld [vmem:[%s8287_s23 + $0x3c0] sm:$0xff]  ;;  %v912_v39 = vld [vmem:[%s8287_s23 + $0x3c8] sm:$0xff]  ;;  %v980_v13 = vpack.c.bf16 %v898_v6, %v897_v53  ;;  %v960_v53 = vpack.c.bf16 %v858_v46, %v857_v11  ;;  %v7100_v29 = vld [vmem:[%s9773_s5 + $0x318] ss:$36 sps:$4 sm:$0xff]  }
 0x1ab   : > { %v7087_v17 = vld [vmem:[%s9773_s5 + $0x24c] ss:$36 sps:$4 sm:$0xff]   ;;  %v7126_v11 = vld [vmem:[%s9773_s5 + $0x43c] ss:$36 sps:$4 sm:$0xff]   ;;  %v7129_v46 = vld [vmem:[%s9773_s5 + $0x444] ss:$36 sps:$4 sm:$0xff]  }
 0x1ac   : > { %6821 = vmatmul.mubr.msk.bf16.gmra.mxu1 %vm2274_vm0, %v7031_v5  ;;  %6805 = vmatmul.mubr.msk.bf16.gmra.mxu0 %vm2274_vm0, %v7033_v33  ;;  %v971_v5 = vpack.c.bf16 %v880_v47, %v879_v36  ;;  %v987_v33 = vpack.c.bf16 %v912_v39, %v911_v4  ;;  %v855_v36 = vld [vmem:[%s8287_s23 + $0x200] sm:$0xff]  ;;  %v856_v4 = vld [vmem:[%s8287_s23 + $0x208] sm:$0xff]  ;;  %v983_v39 = vpack.c.bf16 %v904_v23, %v903_v14  ;;  %v7115_v40 = vld [vmem:[%s9773_s5 + $0x3b0] ss:$36 sps:$4 sm:$0xff]  }
 0x1ad   : > { %6144 = vmatpush3.bf16.msra.mxu1 %v928_v63  ;;  %6256 = vmatpush3.bf16.msra.mxu0 %v944_v45  ;;  %v896_v63 = vld [vmem:[%s8287_s23 + $0x348] sm:$0xff]  ;;  %v877_v45 = vld [vmem:[%s8287_s23 + $0x2b0] sm:$0xff]  ;;  %v7135_v14 = vld [vmem:[%s9773_s5 + $0x1c] ss:$36 sps:$4 sm:$0xff]  }
 0x1ae   : > { %6145 = vmatprep.subr.bf16.mxu1 %v935_v1  ;;  %6257 = vmatprep.subr.bf16.mxu0 %v951_v56  ;;  %v7048_v1 = vld [vmem:[%s9773_s5 + $0x90] ss:$36 sps:$4 sm:$0xff]   ;;  %v7051_v56 = vld [vmem:[%s9773_s5 + $0x98] ss:$36 sps:$4 sm:$0xff]   ;;  %v970_v48 = vpack.c.bf16 %v878_v38, %v877_v45  ;;  %v7112_v49 = vld [vmem:[%s9773_s5 + $0x3a8] ss:$36 sps:$4 sm:$0xff]  }
 0x1af   : > { %3284 = vmatprep.mubr.bf16.mxu1 %v7036_v15  ;;  %3445 = vmatprep.mubr.bf16.mxu0 %v7039_v57  ;;  %v963_v15 = vpack.c.bf16 %v864_v31, %v863_v32  ;;  %v979_v57 = vpack.c.bf16 %v896_v63, %v895_v35  ;;  %v7060_v32 = vld [vmem:[%s9773_s5 + $0x120] ss:$36 sps:$4 sm:$0xff]   ;;  %v7063_v31 = vld [vmem:[%s9773_s5 + $0x128] ss:$36 sps:$4 sm:$0xff]   ;;  %v7069_v63 = vld [vmem:[%s9773_s5 + $0x170] ss:$36 sps:$4 sm:$0xff]  }
 0x1b0   : > { %v7066_v35 = vld [vmem:[%s9773_s5 + $0x168] ss:$36 sps:$4 sm:$0xff]   ;;  %v7070_v45 = vld [vmem:[%s9773_s5 + $0x1b4] ss:$36 sps:$4 sm:$0xff]   ;;  %v7073_v38 = vld [vmem:[%s9773_s5 + $0x1bc] ss:$36 sps:$4 sm:$0xff]  }
 0x1b1   : > { %6146 = vmatpush3.bf16.msra.mxu1 %v927_v16  ;;  %6258 = vmatpush3.bf16.msra.mxu0 %v943_v34  ;;  %v893_v16 = vld [vmem:[%s8287_s23 + $0x330] sm:$0xff]  ;;  %v894_v34 = vld [vmem:[%s8287_s23 + $0x338] sm:$0xff] }
 0x1b2   : > { %6355 = vmatprep.subr.bf16.mxu1 %v974_v12  ;;  %6467 = vmatprep.subr.bf16.mxu0 %v990_v26  ;;  %v907_v12 = vld [vmem:[%s8287_s23 + $0x3a0] sm:$0xff]  ;;  %v978_v44 = vpack.c.bf16 %v894_v34, %v893_v16  ;;  %v7090_v16 = vld [vmem:[%s9773_s5 + $0x28c] ss:$36 sps:$4 sm:$0xff]   ;;  %v7093_v34 = vld [vmem:[%s9773_s5 + $0x294] ss:$36 sps:$4 sm:$0xff]  }
 0x1b3   : > { %v7055_v26 = vld [vmem:[%s9773_s5 + $0xe4] ss:$36 sps:$4 sm:$0xff]   ;;  %v985_v21 = vpack.c.bf16 %v908_v50, %v907_v12  ;;  %v7096_v12 = vld [vmem:[%s9773_s5 + $0x2d4] ss:$36 sps:$4 sm:$0xff]   ;;  %v7099_v50 = vld [vmem:[%s9773_s5 + $0x2dc] ss:$36 sps:$4 sm:$0xff]  }
 0x1b4   : > { %3285 = vmatmul.mubr.bf16.vlgmr.msra.gmra.mxu1 %v7034_v19  ;;  %3446 = vmatmul.mubr.bf16.vlgmr.msra.gmra.mxu0 %v7037_v37  ;;  %v875_v19 = vld [vmem:[%s8287_s23 + $0x2a0] sm:$0xff]  ;;  %v876_v37 = vld [vmem:[%s8287_s23 + $0x2a8] sm:$0xff]  ;;  %v7130_v23 = vld [vmem:[%s9773_s5 + $0x10] ss:$36 sps:$4 sm:$0xff]  }
 0x1b5   : > { %3292 = vmatprep.mubr.bf16.mxu1 %v7040_v2  ;;  %3453 = vmatprep.mubr.bf16.mxu0 %v7043_v55  ;;  %v969_v30 = vpack.c.bf16 %v876_v37, %v875_v19  ;;  %v891_v2 = vld [vmem:[%s8287_s23 + $0x320] sm:$0xff]  ;;  %v892_v55 = vld [vmem:[%s8287_s23 + $0x328] sm:$0xff]  ;;  %v7091_v37 = vld [vmem:[%s9773_s5 + $0x290] ss:$36 sps:$4 sm:$0xff]  }
 0x1b6   : > { %6356 = vmatpush3.bf16.msra.mxu1 %v966_v51  ;;  %6468 = vmatpush3.bf16.msra.mxu0 %v982_v41  ;;  %v873_v51 = vld [vmem:[%s8287_s23 + $0x290] sm:$0xff]  ;;  %v874_v41 = vld [vmem:[%s8287_s23 + $0x298] sm:$0xff]  ;;  %v977_v52 = vpack.c.bf16 %v892_v55, %v891_v2  ;;  %v7088_v19 = vld [vmem:[%s9773_s5 + $0x288] ss:$36 sps:$4 sm:$0xff]  }
 0x1b7   : > { %6357 = vmatprep.subr.bf16.mxu1 %v973_v0  ;;  %6469 = vmatprep.subr.bf16.mxu0 %v989_v54  ;;  %v7054_v0 = vld [vmem:[%s9773_s5 + $0xd8] ss:$36 sps:$4 sm:$0xff]   ;;  %v7057_v54 = vld [vmem:[%s9773_s5 + $0xe0] ss:$36 sps:$4 sm:$0xff]   ;;  %v968_v10 = vpack.c.bf16 %v874_v41, %v873_v51  ;;  %v7109_v55 = vld [vmem:[%s9773_s5 + $0x368] ss:$36 sps:$4 sm:$0xff]  }
 0x1b8   : > { %v7106_v2 = vld [vmem:[%s9773_s5 + $0x360] ss:$36 sps:$4 sm:$0xff]   ;;  %v7114_v51 = vld [vmem:[%s9773_s5 + $0x3ac] ss:$36 sps:$4 sm:$0xff]   ;;  %v7117_v41 = vld [vmem:[%s9773_s5 + $0x3b4] ss:$36 sps:$4 sm:$0xff]  }
 0x1ba   : > { %6358 = vmatpush3.bf16.msra.mxu1 %v965_v25  ;;  %6470 = vmatpush3.bf16.msra.mxu0 %v981_v62  ;;  %v871_v25 = vld [vmem:[%s8287_s23 + $0x280] sm:$0xff]  ;;  %v872_v62 = vld [vmem:[%s8287_s23 + $0x288] sm:$0xff] }
 0x1bb   : > { %6359 = vmatprep.subr.bf16.mxu1 %v972_v59  ;;  %6471 = vmatprep.subr.bf16.mxu0 %v988_v3  ;;  %v7058_v59 = vld [vmem:[%s9773_s5 + $0x124] ss:$36 sps:$4 sm:$0xff]   ;;  %v7061_v3 = vld [vmem:[%s9773_s5 + $0x12c] ss:$36 sps:$4 sm:$0xff]   ;;  %v967_v47 = vpack.c.bf16 %v872_v62, %v871_v25  ;;  %v7132_v62 = vld [vmem:[%s9773_s5 + $0x14] ss:$36 sps:$4 sm:$0xff]  }
 0x1bc   : > { %3293 = vmatmul.mubr.bf16.gmra.mxu1 %v7042_v18  ;;  %3454 = vmatmul.mubr.bf16.gmra.mxu0 %v7045_v22  ;;  %v889_v18 = vld [vmem:[%s8287_s23 + $0x310] sm:$0xff]  ;;  %v890_v22 = vld [vmem:[%s8287_s23 + $0x318] sm:$0xff]  ;;  %v7127_v25 = vld [vmem:[%s9773_s5 + $0x440] ss:$36 sps:$4 sm:$0xff]  }
 0x1bd   : > { %3300 = vmatprep.mubr.bf16.mxu1 %v7046_v28  ;;  %3461 = vmatprep.mubr.bf16.mxu0 %v7049_v27  ;;  %v976_v6 = vpack.c.bf16 %v890_v22, %v889_v18  ;;  %v887_v28 = vld [vmem:[%s8287_s23 + $0x300] sm:$0xff]  ;;  %v888_v27 = vld [vmem:[%s8287_s23 + $0x308] sm:$0xff]  ;;  %v7124_v22 = vld [vmem:[%s9773_s5 + $0x438] ss:$36 sps:$4 sm:$0xff]  }
 0x1be   : > { %6360 = vmatpush3.bf16.msra.mxu1 %v964_v60  ;;  %6472 = vmatpush3.bf16.msra.mxu0 %v980_v13  ;;  %v959_v60 = vpack.c.bf16 %v856_v4, %v855_v36  ;;  %v975_v13 = vpack.c.bf16 %v888_v27, %v887_v28  ;;  %v7141_v36 = vld [vmem:[%s9773_s5 + $0x64] ss:$36 sps:$4 sm:$0xff]   ;;  %v921_v4 = vld [vmem:[%s8287_s23 + $0x410] sm:$0xff]  ;;  %v7136_v28 = vld [vmem:[%s9773_s5 + $0x58] ss:$36 sps:$4 sm:$0xff]  }
 0x1bf   : > { %6361 = vmatprep.subr.bf16.mxu1 %v971_v5  ;;  %6473 = vmatprep.subr.bf16.mxu0 %v987_v33  ;;  %v7064_v5 = vld [vmem:[%s9773_s5 + $0x16c] ss:$36 sps:$4 sm:$0xff]   ;;  %v7067_v33 = vld [vmem:[%s9773_s5 + $0x174] ss:$36 sps:$4 sm:$0xff]  }
 0x1c2   : > { %6362 = vmatpush3.bf16.msra.mxu1 %v963_v15  ;;  %6474 = vmatpush3.bf16.msra.mxu0 %v979_v57  ;;  %v7078_v15 = vld [vmem:[%s9773_s5 + $0x1f8] ss:$36 sps:$4 sm:$0xff]   ;;  %v7081_v57 = vld [vmem:[%s9773_s5 + $0x200] ss:$36 sps:$4 sm:$0xff]  }
 0x1c3   : > { %6363 = vmatprep.subr.bf16.mxu1 %v970_v48  ;;  %6475 = vmatprep.subr.bf16.mxu0 %v986_v8  ;;  %v7082_v48 = vld [vmem:[%s9773_s5 + $0x240] ss:$36 sps:$4 sm:$0xff]   ;;  %v7085_v8 = vld [vmem:[%s9773_s5 + $0x248] ss:$36 sps:$4 sm:$0xff]  }
 0x1c4   : > { %3301 = vmatmul.mubr.bf16.gmra.mxu1 %v7048_v1  ;;  %3462 = vmatmul.mubr.bf16.gmra.mxu0 %v7051_v56  ;;  %v7076_v1 = vld [vmem:[%s9773_s5 + $0x1fc] ss:$36 sps:$4 sm:$0xff]   ;;  %v7079_v56 = vld [vmem:[%s9773_s5 + $0x204] ss:$36 sps:$4 sm:$0xff]  }
 0x1c5   : > { %3308 = vmatprep.mubr.bf16.mxu1 %v7052_v24  ;;  %3469 = vmatprep.mubr.bf16.mxu0 %v7055_v26  ;;  %v7094_v24 = vld [vmem:[%s9773_s5 + $0x2d0] ss:$36 sps:$4 sm:$0xff]   ;;  %v7097_v26 = vld [vmem:[%s9773_s5 + $0x2d8] ss:$36 sps:$4 sm:$0xff]  }
 0x1c6   : > { %6364 = vmatpush3.bf16.msra.mxu1 %v962_v42  ;;  %6476 = vmatpush3.bf16.msra.mxu0 %v978_v44  ;;  %v7102_v42 = vld [vmem:[%s9773_s5 + $0x31c] ss:$36 sps:$4 sm:$0xff]   ;;  %v7105_v44 = vld [vmem:[%s9773_s5 + $0x324] ss:$36 sps:$4 sm:$0xff]  }
 0x1c7   : > { %6365 = vmatprep.subr.bf16.mxu1 %v969_v30  ;;  %6477 = vmatprep.subr.bf16.mxu0 %v985_v21  ;;  %v7108_v30 = vld [vmem:[%s9773_s5 + $0x364] ss:$36 sps:$4 sm:$0xff]   ;;  %v7111_v21 = vld [vmem:[%s9773_s5 + $0x36c] ss:$36 sps:$4 sm:$0xff]  }
 0x1ca   : > { %6366 = vmatpush3.bf16.msra.mxu1 %v961_v43  ;;  %6478 = vmatpush3.bf16.msra.mxu0 %v977_v52  ;;  %v7118_v43 = vld [vmem:[%s9773_s5 + $0x3f0] ss:$36 sps:$4 sm:$0xff]   ;;  %v7121_v52 = vld [vmem:[%s9773_s5 + $0x3f8] ss:$36 sps:$4 sm:$0xff]  }
 0x1cb   : > { %6367 = vmatprep.subr.bf16.mxu1 %v968_v10  ;;  %6479 = vmatprep.subr.bf16.mxu0 %v984_v9  ;;  %v925_v10 = vld [vmem:[%s8287_s23 + $0x430] sm:$0xff]  ;;  %v926_v9 = vld [vmem:[%s8287_s23 + $0x438] sm:$0xff] }
 0x1cc   : > { %3309 = vmatmul.mubr.bf16.gmra.mxu1 %v7054_v0  ;;  %3470 = vmatmul.mubr.bf16.gmra.mxu0 %v7057_v54  ;;  %v7120_v0 = vld [vmem:[%s9773_s5 + $0x3f4] ss:$36 sps:$4 sm:$0xff]   ;;  %v7123_v54 = vld [vmem:[%s9773_s5 + $0x3fc] ss:$36 sps:$4 sm:$0xff]   ;;  %v994_v18 = vpack.c.bf16 %v926_v9, %v925_v10 }
 0x1cd   : > { %3316 = vmatprep.mubr.bf16.mxu1 %v7058_v59  ;;  %3477 = vmatprep.mubr.bf16.mxu0 %v7061_v3  ;;  %v7133_v59 = vld [vmem:[%s9773_s5 + $0x18] ss:$36 sps:$4 sm:$0xff]   ;;  %v923_v3 = vld [vmem:[%s8287_s23 + $0x420] sm:$0xff] }
 0x1ce   : > { %6368 = vmatpush3.bf16.msra.mxu1 %v960_v53  ;;  %6480 = vmatpush3.bf16.msra.mxu0 %v976_v6  ;;  %v924_v53 = vld [vmem:[%s8287_s23 + $0x428] sm:$0xff]  ;;  %v7138_v6 = vld [vmem:[%s9773_s5 + $0x5c] ss:$36 sps:$4 sm:$0xff]  }
 0x1cf   : > { %6369 = vmatprep.subr.bf16.mxu1 %v967_v47  ;;  %6481 = vmatprep.subr.bf16.mxu0 %v983_v39  ;;  %v993_v47 = vpack.c.bf16 %v924_v53, %v923_v3  ;;  %v922_v39 = vld [vmem:[%s8287_s23 + $0x418] sm:$0xff] }
 0x1d0   : > { %v992_v27 = vpack.c.bf16 %v922_v39, %v921_v4  ;;  %v7178_v4 = vld [vmem:[%s9773_s5 + $0x250] ss:$36 sps:$4 sm:$0xff]   ;;  %v7181_v39 = vld [vmem:[%s9773_s5 + $0x258] ss:$36 sps:$4 sm:$0xff]  }
 0x1d2   : > { %6370 = vmatpush3.bf16.msra.mxu1 %v959_v60  ;;  %6482 = vmatpush3.bf16.msra.mxu0 %v975_v13  ;;  %v7139_v60 = vld [vmem:[%s9773_s5 + $0x60] ss:$36 sps:$4 sm:$0xff]  }
 0x1d3   : > { %6824 = vmatprep.subr.bf16.mxu1 %v994_v18  ;;  %v919_v13 = vld [vmem:[%s8287_s23 + $0x400] sm:$0xff] }
 0x1d4   : > { %3317 = vmatmul.mubr.bf16.gmra.mxu1 %v7060_v32  ;;  %3478 = vmatmul.mubr.bf16.gmra.mxu0 %v7063_v31  ;;  %v920_v32 = vld [vmem:[%s8287_s23 + $0x408] sm:$0xff] }
 0x1d5   : > { %3324 = vmatprep.mubr.bf16.mxu1 %v7064_v5  ;;  %3485 = vmatprep.mubr.bf16.mxu0 %v7067_v33  ;;  %v7144_v31 = vld [vmem:[%s9773_s5 + $0xa4] ss:$36 sps:$4 sm:$0xff]   ;;  %v7147_v5 = vld [vmem:[%s9773_s5 + $0xac] ss:$36 sps:$4 sm:$0xff]   ;;  %v991_v33 = vpack.c.bf16 %v920_v32, %v919_v13 }
 0x1dc   : > { %3325 = vmatmul.mubr.bf16.gmra.mxu1 %v7066_v35  ;;  %3486 = vmatmul.mubr.bf16.gmra.mxu0 %v7069_v63  ;;  %v7142_v35 = vld [vmem:[%s9773_s5 + $0xa0] ss:$36 sps:$4 sm:$0xff]   ;;  %v7145_v63 = vld [vmem:[%s9773_s5 + $0xa8] ss:$36 sps:$4 sm:$0xff]  }
 0x1dd   : > { %3332 = vmatprep.mubr.bf16.mxu1 %v7070_v45  ;;  %3493 = vmatprep.mubr.bf16.mxu0 %v7073_v38  ;;  %v7150_v45 = vld [vmem:[%s9773_s5 + $0xec] ss:$36 sps:$4 sm:$0xff]   ;;  %v7153_v38 = vld [vmem:[%s9773_s5 + $0xf4] ss:$36 sps:$4 sm:$0xff]  }
 0x1e4   : > { %3333 = vmatmul.mubr.bf16.gmra.mxu1 %v7072_v61  ;;  %3494 = vmatmul.mubr.bf16.gmra.mxu0 %v7075_v7  ;;  %v7148_v61 = vld [vmem:[%s9773_s5 + $0xe8] ss:$36 sps:$4 sm:$0xff]   ;;  %v7151_v7 = vld [vmem:[%s9773_s5 + $0xf0] ss:$36 sps:$4 sm:$0xff]  }
 0x1e5   : > { %3340 = vmatprep.mubr.bf16.mxu1 %v7076_v1  ;;  %3501 = vmatprep.mubr.bf16.mxu0 %v7079_v56  ;;  %v7156_v1 = vld [vmem:[%s9773_s5 + $0x134] ss:$36 sps:$4 sm:$0xff]   ;;  %v7159_v56 = vld [vmem:[%s9773_s5 + $0x13c] ss:$36 sps:$4 sm:$0xff]  }
 0x1ec   : > { %3341 = vmatmul.mubr.bf16.gmra.mxu1 %v7078_v15  ;;  %3502 = vmatmul.mubr.bf16.gmra.mxu0 %v7081_v57  ;;  %v7154_v15 = vld [vmem:[%s9773_s5 + $0x130] ss:$36 sps:$4 sm:$0xff]   ;;  %v7157_v57 = vld [vmem:[%s9773_s5 + $0x138] ss:$36 sps:$4 sm:$0xff]  }
 0x1ed   : > { %3348 = vmatprep.mubr.bf16.mxu1 %v7084_v20  ;;  %3509 = vmatprep.mubr.bf16.mxu0 %v7087_v17  ;;  %v7162_v20 = vld [vmem:[%s9773_s5 + $0x17c] ss:$36 sps:$4 sm:$0xff]   ;;  %v7165_v17 = vld [vmem:[%s9773_s5 + $0x184] ss:$36 sps:$4 sm:$0xff]  }
 0x1f4   : > { %3349 = vmatmul.mubr.bf16.gmra.mxu1 %v7082_v48  ;;  %3510 = vmatmul.mubr.bf16.gmra.mxu0 %v7085_v8 }
 0x1f5   : > { %3356 = vmatprep.mubr.bf16.mxu1 %v7090_v16  ;;  %3517 = vmatprep.mubr.bf16.mxu0 %v7093_v34 }
 0x1fc   : > { %3357 = vmatmul.mubr.bf16.gmra.mxu1 %v7088_v19  ;;  %3518 = vmatmul.mubr.bf16.gmra.mxu0 %v7091_v37 }
 0x1fd   : > { %3364 = vmatprep.mubr.bf16.mxu1 %v7096_v12  ;;  %3525 = vmatprep.mubr.bf16.mxu0 %v7099_v50  ;;  %v7160_v12 = vld [vmem:[%s9773_s5 + $0x178] ss:$36 sps:$4 sm:$0xff]   ;;  %v7163_v50 = vld [vmem:[%s9773_s5 + $0x180] ss:$36 sps:$4 sm:$0xff]  }
 0x204   : > { %3365 = vmatmul.mubr.bf16.gmra.mxu1 %v7094_v24  ;;  %3526 = vmatmul.mubr.bf16.gmra.mxu0 %v7097_v26  ;;  %v7168_v24 = vld [vmem:[%s9773_s5 + $0x1c4] ss:$36 sps:$4 sm:$0xff]   ;;  %v7171_v26 = vld [vmem:[%s9773_s5 + $0x1cc] ss:$36 sps:$4 sm:$0xff]  }
 0x205   : > { %3372 = vmatprep.mubr.bf16.mxu1 %v7102_v42  ;;  %3533 = vmatprep.mubr.bf16.mxu0 %v7105_v44 }
 0x20c   : > { %3373 = vmatmul.mubr.bf16.gmra.mxu1 %v7100_v29  ;;  %3534 = vmatmul.mubr.bf16.gmra.mxu0 %v7103_v58 }
 0x20d   : > { %3380 = vmatprep.mubr.bf16.mxu1 %v7108_v30  ;;  %3541 = vmatprep.mubr.bf16.mxu0 %v7111_v21 }
 0x214   : > { %3381 = vmatmul.mubr.bf16.gmra.mxu1 %v7106_v2  ;;  %3542 = vmatmul.mubr.bf16.gmra.mxu0 %v7109_v55 }
 0x215   : > { %3388 = vmatprep.mubr.bf16.mxu1 %v7114_v51  ;;  %3549 = vmatprep.mubr.bf16.mxu0 %v7117_v41  ;;  %v7166_v51 = vld [vmem:[%s9773_s5 + $0x1c0] ss:$36 sps:$4 sm:$0xff]   ;;  %v7169_v41 = vld [vmem:[%s9773_s5 + $0x1c8] ss:$36 sps:$4 sm:$0xff]  }
 0x21c   : > { %3389 = vmatmul.mubr.bf16.gmra.mxu1 %v7112_v49  ;;  %3550 = vmatmul.mubr.bf16.gmra.mxu0 %v7115_v40  ;;  %v7174_v49 = vld [vmem:[%s9773_s5 + $0x20c] ss:$36 sps:$4 sm:$0xff]   ;;  %v7177_v40 = vld [vmem:[%s9773_s5 + $0x214] ss:$36 sps:$4 sm:$0xff]  }
 0x21d   : > { %3396 = vmatprep.mubr.bf16.mxu1 %v7120_v0  ;;  %3557 = vmatprep.mubr.bf16.mxu0 %v7123_v54 }
 0x224   : > { %3397 = vmatmul.mubr.bf16.gmra.mxu1 %v7118_v43  ;;  %3558 = vmatmul.mubr.bf16.gmra.mxu0 %v7121_v52 }
 0x225   : > { %3404 = vmatprep.mubr.bf16.mxu1 %v7126_v11  ;;  %3565 = vmatprep.mubr.bf16.mxu0 %v7129_v46 }
 0x22c   : > { %3405 = vmatmul.mubr.bf16.gmra.mxu1 %v7124_v22  ;;  %3566 = vmatmul.mubr.bf16.gmra.mxu0 %v7127_v25  ;;  %v7175_v22 = vld [vmem:[%s9773_s5 + $0x210] ss:$36 sps:$4 sm:$0xff]  }
 0x22d   : > { %3606 = vmatprep.mubr.bf16.mxu1 %v7132_v62  ;;  %3767 = vmatprep.mubr.bf16.mxu0 %v7135_v14  ;;  %v7180_v25 = vld [vmem:[%s9773_s5 + $0x254] ss:$36 sps:$4 sm:$0xff]   ;;  %v7183_v62 = vld [vmem:[%s9773_s5 + $0x25c] ss:$36 sps:$4 sm:$0xff]  }
 0x234   : > { %3607 = vmatmul.mubr.bf16.vlgmr.msra.gmra.mxu1 %v7130_v23  ;;  %3768 = vmatmul.mubr.bf16.vlgmr.msra.gmra.mxu0 %v7133_v59 }
 0x235   : > { %3614 = vmatprep.mubr.bf16.mxu1 %v7138_v6  ;;  %3775 = vmatprep.mubr.bf16.mxu0 %v7141_v36 }
 0x236   : > { %6825 = vmatpush3.bf16.msra.mxu1 %v994_v18  ;;  %v7172_v18 = vld [vmem:[%s9773_s5 + $0x208] ss:$36 sps:$4 sm:$0xff]  }
 0x237   : > { %6826 = vmatprep.subr.bf16.mxu1 %v993_v47 }
 0x23a   : > { %6827 = vmatpush3.bf16.msra.mxu1 %v993_v47 }
 0x23b   : > { %6828 = vmatprep.subr.bf16.mxu1 %v992_v27 }
 0x23c   : > { %3615 = vmatmul.mubr.bf16.gmra.mxu1 %v7136_v28  ;;  %3776 = vmatmul.mubr.bf16.gmra.mxu0 %v7139_v60  ;;  %v7186_v28 = vld [vmem:[%s9773_s5 + $0x29c] ss:$36 sps:$4 sm:$0xff]  }
 0x23d   : > { %3622 = vmatprep.mubr.bf16.mxu1 %v7144_v31  ;;  %3783 = vmatprep.mubr.bf16.mxu0 %v7147_v5 }
 0x23e   : > { %6829 = vmatpush3.bf16.msra.mxu1 %v992_v27  ;;  %v7189_v27 = vld [vmem:[%s9773_s5 + $0x2a4] ss:$36 sps:$4 sm:$0xff]  }
 0x23f   : > { %6830 = vmatprep.subr.bf16.mxu1 %v991_v33 }
 0x242   : > { %6831 = vmatpush3.bf16.msra.mxu1 %v991_v33 }
 0x244   : > { %3623 = vmatmul.mubr.bf16.gmra.mxu1 %v7142_v35  ;;  %3784 = vmatmul.mubr.bf16.gmra.mxu0 %v7145_v63 }
 0x245   : > { %3630 = vmatprep.mubr.bf16.mxu1 %v7150_v45  ;;  %3791 = vmatprep.mubr.bf16.mxu0 %v7153_v38 }
 0x24c   : > { %3631 = vmatmul.mubr.bf16.gmra.mxu1 %v7148_v61  ;;  %3792 = vmatmul.mubr.bf16.gmra.mxu0 %v7151_v7  ;;  %v7184_v61 = vld [vmem:[%s9773_s5 + $0x298] ss:$36 sps:$4 sm:$0xff]   ;;  %v7187_v7 = vld [vmem:[%s9773_s5 + $0x2a0] ss:$36 sps:$4 sm:$0xff]  }
 0x24d   : > { %3638 = vmatprep.mubr.bf16.mxu1 %v7156_v1  ;;  %3799 = vmatprep.mubr.bf16.mxu0 %v7159_v56  ;;  %v7192_v56 = vld [vmem:[%s9773_s5 + $0x2e4] ss:$36 sps:$4 sm:$0xff]  }
 0x254   : > { %v8743_v48 = vpop.f32.mrf.mxu1  ;;  %3639 = vmatmul.mubr.bf16.gmra.mxu1 %v7154_v15  ;;  %v8745_v8 = vpop.f32.mrf.mxu0  ;;  %3800 = vmatmul.mubr.bf16.gmra.mxu0 %v7157_v57  ;;  %v7195_v15 = vld [vmem:[%s9773_s5 + $0x2ec] ss:$36 sps:$4 sm:$0xff]  }
 0x255   : > { %3646 = vmatprep.mubr.bf16.mxu1 %v7162_v20  ;;  %3807 = vmatprep.mubr.bf16.mxu0 %v7165_v17 }
 0x256   : > { %v8747_v16 = vpop.f32.mrf.mxu1  ;;  %v8749_v34 = vpop.f32.mrf.mxu0 }
 0x258   : > { %v8751_v19 = vpop.f32.mrf.mxu1  ;;  %v8753_v37 = vpop.f32.mrf.mxu0 }
 0x25a   : > { %v8767_v42 = vpop.f32.mrf.mxu1  ;;  %v8769_v44 = vpop.f32.mrf.mxu0 }
 0x25c   : > { %v8771_v29 = vpop.f32.mrf.mxu1  ;;  %3647 = vmatmul.mubr.bf16.gmra.mxu1 %v7160_v12  ;;  %v8773_v58 = vpop.f32.mrf.mxu0  ;;  %3808 = vmatmul.mubr.bf16.gmra.mxu0 %v7163_v50 }
 0x25d   : > { %3654 = vmatprep.mubr.bf16.mxu1 %v7168_v24  ;;  %3815 = vmatprep.mubr.bf16.mxu0 %v7171_v26 }
 0x25e   : > { %v8775_v30 = vpop.f32.mrf.mxu1  ;;  %v8777_v21 = vpop.f32.mrf.mxu0 }
 0x260   : > { %v8779_v2 = vpop.f32.mrf.mxu1  ;;  %v8781_v55 = vpop.f32.mrf.mxu0 }
 0x262   : > { %v8795_v0 = vpop.f32.mrf.mxu1  ;;  %v8797_v54 = vpop.f32.mrf.mxu0 }
 0x264   : > { %v8799_v43 = vpop.f32.mrf.mxu1  ;;  %3655 = vmatmul.mubr.bf16.gmra.mxu1 %v7166_v51  ;;  %v8801_v52 = vpop.f32.mrf.mxu0  ;;  %3816 = vmatmul.mubr.bf16.gmra.mxu0 %v7169_v41 }
 0x265   : > { %3662 = vmatprep.mubr.bf16.mxu1 %v7174_v49  ;;  %3823 = vmatprep.mubr.bf16.mxu0 %v7177_v40 }
 0x266   : > { %v8803_v11 = vpop.f32.mrf.mxu1  ;;  %v8805_v46 = vpop.f32.mrf.mxu0 }
 0x268   : > { %v8807_v10 = vpop.f32.mrf.mxu1  ;;  %v8809_v9 = vpop.f32.mrf.mxu0 }
 0x26a   : > { %v8823_v14 = vpop.f32.mrf.mxu1  ;;  %v8825_v23 = vpop.f32.mrf.mxu0 }
 0x26c   : > { %v8827_v59 = vpop.f32.mrf.mxu1  ;;  %3663 = vmatmul.mubr.bf16.gmra.mxu1 %v7172_v18  ;;  %v8829_v3 = vpop.f32.mrf.mxu0  ;;  %3824 = vmatmul.mubr.bf16.gmra.mxu0 %v7175_v22 }
 0x26d   : > { %3670 = vmatprep.mubr.bf16.mxu1 %v7180_v25  ;;  %3831 = vmatprep.mubr.bf16.mxu0 %v7183_v62  ;;  %v7190_v62 = vld [vmem:[%s9773_s5 + $0x2e0] ss:$36 sps:$4 sm:$0xff]  }
 0x26e   : > { %v8831_v53 = vpop.f32.mrf.mxu1  ;;  %v8833_v6 = vpop.f32.mrf.mxu0 }
 0x270   : > { %v8835_v36 = vpop.f32.mrf.mxu1  ;;  %v8837_v47 = vpop.f32.mrf.mxu0 }
 0x272   : > { %v8851_v60 = vpop.f32.mrf.mxu1  ;;  %v8853_v13 = vpop.f32.mrf.mxu0 }
 0x274   : > { %v6147_v32 = vpop.f32.mrf.mxu1  ;;  %3671 = vmatmul.mubr.bf16.gmra.mxu1 %v7178_v4  ;;  %v6259_v31 = vpop.f32.mrf.mxu0  ;;  %3832 = vmatmul.mubr.bf16.gmra.mxu0 %v7181_v39  ;;  %v7193_v4 = vld [vmem:[%s9773_s5 + $0x2e8] ss:$36 sps:$4 sm:$0xff]  }
 0x275   : > { %3678 = vmatprep.mubr.bf16.mxu1 %v7186_v28  ;;  %3839 = vmatprep.mubr.bf16.mxu0 %v7189_v27  ;;  %v7198_v39 = vld [vmem:[%s9773_s5 + $0x32c] ss:$36 sps:$4 sm:$0xff]   ;;  %v7201_v28 = vld [vmem:[%s9773_s5 + $0x334] ss:$36 sps:$4 sm:$0xff]  }
 0x276   : > { %v6148_v5 = vpop.f32.mrf.mxu1  ;;  %v6260_v33 = vpop.f32.mrf.mxu0 }
 0x277   : > { %v6149_v35 = vadd.f32 %v6148_v5, %v6147_v32  ;;  %v6261_v63 = vadd.f32 %v6260_v33, %v6259_v31 }
 0x278   : > { %v6150_v45 = vpop.f32.mrf.mxu1  ;;  %v6262_v38 = vpop.f32.mrf.mxu0 }
 0x279   : > { %v3287_v1 = vadd.f32 %v6149_v35, %v8749_v34 }
 0x27a   : > { %v6151_v57 = vpop.f32.mrf.mxu1  ;;  %v6263_v20 = vpop.f32.mrf.mxu0 }
 0x27b   : > { %v8868_v17 = vadd.f32 %v6261_v63, %v3287_v1  ;;  %v6152_v12 = vadd.f32 %v6151_v57, %v6150_v45  ;;  %v6264_v50 = vadd.f32 %v6263_v20, %v6262_v38  ;;  %v7196_v57 = vld [vmem:[%s9773_s5 + $0x328] ss:$36 sps:$4 sm:$0xff]   ;;  %v7199_v20 = vld [vmem:[%s9773_s5 + $0x330] ss:$36 sps:$4 sm:$0xff]  }
 0x27c   : > { %v6153_v24 = vpop.f32.mrf.mxu1  ;;  %3679 = vmatmul.mubr.bf16.gmra.mxu1 %v7184_v61  ;;  %v6265_v26 = vpop.f32.mrf.mxu0  ;;  %3840 = vmatmul.mubr.bf16.gmra.mxu0 %v7187_v7 }
 0x27d   : > { %v3290_v34 = vadd.f32 %v6152_v12, %v8769_v44  ;;  %3686 = vmatprep.mubr.bf16.mxu1 %v7192_v56  ;;  %3847 = vmatprep.mubr.bf16.mxu0 %v7195_v15  ;;  %v7204_v12 = vld [vmem:[%s9773_s5 + $0x374] ss:$36 sps:$4 sm:$0xff]  }
 0x27e   : > { %v6154_v51 = vpop.f32.mrf.mxu1  ;;  %v6266_v41 = vpop.f32.mrf.mxu0 }
 0x27f   : > { %v8871_v49 = vadd.f32 %v6264_v50, %v3290_v34  ;;  %v6155_v40 = vadd.f32 %v6154_v51, %v6153_v24  ;;  %v6267_v18 = vadd.f32 %v6266_v41, %v6265_v26  ;;  %v7207_v50 = vld [vmem:[%s9773_s5 + $0x37c] ss:$36 sps:$4 sm:$0xff]  }
 0x280   : > { %v6156_v22 = vpop.f32.mrf.mxu1  ;;  %v6268_v25 = vpop.f32.mrf.mxu0 }
 0x281   : > { %v3295_v44 = vadd.f32 %v8745_v8, %v6155_v40 }
 0x282   : > { %v6157_v27 = vpop.f32.mrf.mxu1  ;;  %v6269_v32 = vpop.f32.mrf.mxu0 }
 0x283   : > { %v8886_v31 = vadd.f32 %v6267_v18, %v3295_v44  ;;  %v6158_v5 = vadd.f32 %v6157_v27, %v6156_v22  ;;  %v6270_v33 = vadd.f32 %v6269_v32, %v6268_v25  ;;  %v7202_v27 = vld [vmem:[%s9773_s5 + $0x370] ss:$36 sps:$4 sm:$0xff]   ;;  %v7205_v32 = vld [vmem:[%s9773_s5 + $0x378] ss:$36 sps:$4 sm:$0xff]  }
 0x284   : > { %v6159_v35 = vpop.f32.mrf.mxu1  ;;  %3687 = vmatmul.mubr.bf16.gmra.mxu1 %v7190_v62  ;;  %v6271_v63 = vpop.f32.mrf.mxu0  ;;  %3848 = vmatmul.mubr.bf16.gmra.mxu0 %v7193_v4 }
 0x285   : > { %v3298_v8 = vadd.f32 %v8753_v37, %v6158_v5  ;;  %3694 = vmatprep.mubr.bf16.mxu1 %v7198_v39  ;;  %3855 = vmatprep.mubr.bf16.mxu0 %v7201_v28  ;;  %v7210_v5 = vld [vmem:[%s9773_s5 + $0x3bc] ss:$36 sps:$4 sm:$0xff]  }
 0x286   : > { %v6160_v45 = vpop.f32.mrf.mxu1  ;;  %v6272_v38 = vpop.f32.mrf.mxu0 }
 0x287   : > { %v8889_v61 = vadd.f32 %v6270_v33, %v3298_v8  ;;  %v6161_v7 = vadd.f32 %v6160_v45, %v6159_v35  ;;  %v6273_v1 = vadd.f32 %v6272_v38, %v6271_v63  ;;  %v7213_v33 = vld [vmem:[%s9773_s5 + $0x3c4] ss:$36 sps:$4 sm:$0xff]  }
 0x288   : > { %v6162_v56 = vpop.f32.mrf.mxu1  ;;  %v6274_v15 = vpop.f32.mrf.mxu0 }
 0x289   : > { %v3303_v37 = vadd.f32 %v6161_v7, %v8777_v21 }
 0x28a   : > { %v6163_v24 = vpop.f32.mrf.mxu1  ;;  %v6275_v26 = vpop.f32.mrf.mxu0 }
 0x28b   : > { %v8904_v34 = vadd.f32 %v6273_v1, %v3303_v37  ;;  %v6164_v51 = vadd.f32 %v6163_v24, %v6162_v56  ;;  %v6276_v41 = vadd.f32 %v6275_v26, %v6274_v15  ;;  %v7208_v24 = vld [vmem:[%s9773_s5 + $0x3b8] ss:$36 sps:$4 sm:$0xff]   ;;  %v7211_v26 = vld [vmem:[%s9773_s5 + $0x3c0] ss:$36 sps:$4 sm:$0xff]  }
 0x28c   : > { %v6165_v40 = vpop.f32.mrf.mxu1  ;;  %3695 = vmatmul.mubr.bf16.gmra.mxu1 %v7196_v57  ;;  %v6277_v18 = vpop.f32.mrf.mxu0  ;;  %3856 = vmatmul.mubr.bf16.gmra.mxu0 %v7199_v20 }
 0x28d   : > { %v3306_v21 = vadd.f32 %v6164_v51, %v8797_v54  ;;  %3702 = vmatprep.mubr.bf16.mxu1 %v7204_v12  ;;  %3863 = vmatprep.mubr.bf16.mxu0 %v7207_v50  ;;  %v7216_v51 = vld [vmem:[%s9773_s5 + $0x404] ss:$36 sps:$4 sm:$0xff]  }
 0x28e   : > { %v6166_v22 = vpop.f32.mrf.mxu1  ;;  %v6278_v25 = vpop.f32.mrf.mxu0 }
 0x28f   : > { %v8907_v62 = vadd.f32 %v6276_v41, %v3306_v21  ;;  %v6167_v4 = vadd.f32 %v6166_v22, %v6165_v40  ;;  %v6279_v44 = vadd.f32 %v6278_v25, %v6277_v18  ;;  %v7219_v41 = vld [vmem:[%s9773_s5 + $0x40c] ss:$36 sps:$4 sm:$0xff]  }
 0x290   : > { %v6168_v39 = vpop.f32.mrf.mxu1  ;;  %v6280_v28 = vpop.f32.mrf.mxu0 }
 0x291   : > { %v3311_v54 = vadd.f32 %v8773_v58, %v6167_v4 }
 0x292   : > { %v6169_v35 = vpop.f32.mrf.mxu1  ;;  %v6281_v63 = vpop.f32.mrf.mxu0 }
 0x293   : > { %v8922_v8 = vadd.f32 %v6279_v44, %v3311_v54  ;;  %v6170_v45 = vadd.f32 %v6169_v35, %v6168_v39  ;;  %v6282_v38 = vadd.f32 %v6281_v63, %v6280_v28  ;;  %v7214_v35 = vld [vmem:[%s9773_s5 + $0x400] ss:$36 sps:$4 sm:$0xff]   ;;  %v7217_v63 = vld [vmem:[%s9773_s5 + $0x408] ss:$36 sps:$4 sm:$0xff]  }
 0x294   : > { %v6171_v7 = vpop.f32.mrf.mxu1  ;;  %3703 = vmatmul.mubr.bf16.gmra.mxu1 %v7202_v27  ;;  %v6283_v1 = vpop.f32.mrf.mxu0  ;;  %3864 = vmatmul.mubr.bf16.gmra.mxu0 %v7205_v32 }
 0x295   : > { %v3314_v58 = vadd.f32 %v8781_v55, %v6170_v45  ;;  %3710 = vmatprep.mubr.bf16.mxu1 %v7210_v5  ;;  %3871 = vmatprep.mubr.bf16.mxu0 %v7213_v33  ;;  %v7222_v45 = vld [vmem:[%s9773_s5 + $0x44c] ss:$36 sps:$4 sm:$0xff]  }
 0x296   : > { %v6172_v56 = vpop.f32.mrf.mxu1  ;;  %v6284_v15 = vpop.f32.mrf.mxu0 }
 0x297   : > { %v8925_v57 = vadd.f32 %v6282_v38, %v3314_v58  ;;  %v6173_v20 = vadd.f32 %v6172_v56, %v6171_v7  ;;  %v6285_v37 = vadd.f32 %v6284_v15, %v6283_v1  ;;  %v7225_v38 = vld [vmem:[%s9773_s5 + $0x454] ss:$36 sps:$4 sm:$0xff]  }
 0x298   : > { %v6174_v12 = vpop.f32.mrf.mxu1  ;;  %v6286_v50 = vpop.f32.mrf.mxu0 }
 0x299   : > { %v3319_v55 = vadd.f32 %v6173_v20, %v8805_v46 }
 0x29a   : > { %v6175_v40 = vpop.f32.mrf.mxu1  ;;  %v6287_v18 = vpop.f32.mrf.mxu0 }
 0x29b   : > { %v8940_v21 = vadd.f32 %v6285_v37, %v3319_v55  ;;  %v6176_v22 = vadd.f32 %v6175_v40, %v6174_v12  ;;  %v6288_v25 = vadd.f32 %v6287_v18, %v6286_v50  ;;  %v7220_v40 = vld [vmem:[%s9773_s5 + $0x448] ss:$36 sps:$4 sm:$0xff]   ;;  %v7223_v18 = vld [vmem:[%s9773_s5 + $0x450] ss:$36 sps:$4 sm:$0xff]  }
 0x29c   : > { %v6177_v4 = vpop.f32.mrf.mxu1  ;;  %3711 = vmatmul.mubr.bf16.gmra.mxu1 %v7208_v24  ;;  %v6289_v44 = vpop.f32.mrf.mxu0  ;;  %3872 = vmatmul.mubr.bf16.gmra.mxu0 %v7211_v26 }
 0x29d   : > { %v3322_v46 = vadd.f32 %v6176_v22, %v8825_v23  ;;  %3718 = vmatprep.mubr.bf16.mxu1 %v7216_v51  ;;  %3879 = vmatprep.mubr.bf16.mxu0 %v7219_v41  ;;  %v7226_v22 = vld [vmem:[%s9773_s5 + $0x20] ss:$36 sps:$4 sm:$0xff]  }
 0x29e   : > { %v6178_v39 = vpop.f32.mrf.mxu1  ;;  %v6290_v28 = vpop.f32.mrf.mxu0 }
 0x29f   : > { %v8943_v27 = vadd.f32 %v6288_v25, %v3322_v46  ;;  %v6179_v32 = vadd.f32 %v6178_v39, %v6177_v4  ;;  %v6291_v54 = vadd.f32 %v6290_v28, %v6289_v44 }
 0x2a0   : > { %v6180_v5 = vpop.f32.mrf.mxu1  ;;  %v6292_v33 = vpop.f32.mrf.mxu0 }
 0x2a1   : > { %v3327_v23 = vadd.f32 %v8801_v52, %v6179_v32 }
 0x2a2   : > { %v6181_v7 = vpop.f32.mrf.mxu1  ;;  %v6293_v1 = vpop.f32.mrf.mxu0 }
 0x2a3   : > { %v8958_v58 = vadd.f32 %v6291_v54, %v3327_v23  ;;  %v6182_v56 = vadd.f32 %v6181_v7, %v6180_v5  ;;  %v6294_v15 = vadd.f32 %v6293_v1, %v6292_v33 }
 0x2a4   : > { %v6183_v20 = vpop.f32.mrf.mxu1  ;;  %3719 = vmatmul.mubr.bf16.gmra.mxu1 %v7214_v35  ;;  %v6295_v37 = vpop.f32.mrf.mxu0  ;;  %3880 = vmatmul.mubr.bf16.gmra.mxu0 %v7217_v63 }
 0x2a5   : > { %v3330_v52 = vadd.f32 %v8809_v9, %v6182_v56  ;;  %3726 = vmatprep.mubr.bf16.mxu1 %v7222_v45  ;;  %3887 = vmatprep.mubr.bf16.mxu0 %v7225_v38  ;;  %v7227_v38 = vld [vmem:[%s9773_s5 + $0x68] ss:$36 sps:$4 sm:$0xff]  }
 0x2a6   : > { %v6184_v12 = vpop.f32.mrf.mxu1  ;;  %v6296_v50 = vpop.f32.mrf.mxu0 }
 0x2a7   : > { %v8961_v24 = vadd.f32 %v6294_v15, %v3330_v52  ;;  %v6185_v26 = vadd.f32 %v6184_v12, %v6183_v20  ;;  %v6297_v55 = vadd.f32 %v6296_v50, %v6295_v37 }
 0x2a8   : > { %v6186_v51 = vpop.f32.mrf.mxu1  ;;  %v6298_v41 = vpop.f32.mrf.mxu0 }
 0x2a9   : > { %v3335_v9 = vadd.f32 %v6185_v26, %v8833_v6 }
 0x2aa   : > { %v6187_v25 = vpop.f32.mrf.mxu1  ;;  %v6299_v4 = vpop.f32.mrf.mxu0 }
 0x2ab   : > { %v8973_v44 = vadd.f32 %v6297_v55, %v3335_v9  ;;  %v6188_v46 = vadd.f32 %v6187_v25, %v6186_v51  ;;  %v6300_v39 = vadd.f32 %v6299_v4, %v6298_v41  ;;  %v7229_v9 = vld [vmem:[%s9773_s5 + $0xf8] ss:$36 sps:$4 sm:$0xff]  }
 0x2ac   : > { %v6189_v28 = vpop.f32.mrf.mxu1  ;;  %3727 = vmatmul.mubr.bf16.gmra.mxu1 %v7220_v40  ;;  %v6301_v32 = vpop.f32.mrf.mxu0  ;;  %3888 = vmatmul.mubr.bf16.gmra.mxu0 %v7223_v18 }
 0x2ad   : > { %v3338_v54 = vadd.f32 %v6188_v46, %v8853_v13  ;;  %6832 = vmatprep.mubr.msk.bf16.mxu1 %vm2274_vm0, %v7226_v22  ;;  %v7228_v13 = vld [vmem:[%s9773_s5 + $0xb0] ss:$36 sps:$4 sm:$0xff]  }
 0x2ae   : > { %v6190_v5 = vpop.f32.mrf.mxu1  ;;  %v6302_v6 = vpop.f32.mrf.mxu0 }
 0x2af   : > { %v8977_v33 = vadd.f32 %v6300_v39, %v3338_v54  ;;  %v6191_v35 = vadd.f32 %v6190_v5, %v6189_v28  ;;  %v6303_v63 = vadd.f32 %v6302_v6, %v6301_v32 }
 0x2b0   : > { %v6192_v23 = vpop.f32.mrf.mxu1  ;;  %v6304_v45 = vpop.f32.mrf.mxu0 }
 0x2b1   : > { %v3343_v7 = vadd.f32 %v8829_v3, %v6191_v35 }
 0x2b2   : > { %v6193_v1 = vpop.f32.mrf.mxu1  ;;  %v6305_v56 = vpop.f32.mrf.mxu0 }
 0x2b3   : > { %v8986_v15 = vadd.f32 %v6303_v63, %v3343_v7  ;;  %v6194_v20 = vadd.f32 %v6193_v1, %v6192_v23  ;;  %v6306_v37 = vadd.f32 %v6305_v56, %v6304_v45  ;;  %v7231_v7 = vld [vmem:[%s9773_s5 + $0x188] ss:$36 sps:$4 sm:$0xff]  }
 0x2b4   : > { %v6195_v52 = vpop.f32.mrf.mxu1  ;;  %6833 = vmatmul.mubr.msk.bf16.vlgmr.msra.gmra.mxu1 %vm2274_vm0, %v7227_v38  ;;  %v6307_v12 = vpop.f32.mrf.mxu0 }
 0x2b5   : > { %v3346_v50 = vadd.f32 %v8837_v47, %v6194_v20  ;;  %6836 = vmatprep.mubr.msk.bf16.mxu1 %vm2274_vm0, %v7228_v13  ;;  %v7230_v47 = vld [vmem:[%s9773_s5 + $0x140] ss:$36 sps:$4 sm:$0xff]  }
 0x2b6   : > { %v6196_v26 = vpop.f32.mrf.mxu1  ;;  %v6308_v3 = vpop.f32.mrf.mxu0 }
 0x2b7   : > { %v8991_v55 = vadd.f32 %v6306_v37, %v3346_v50  ;;  %v6197_v51 = vadd.f32 %v6196_v26, %v6195_v52  ;;  %v6309_v41 = vadd.f32 %v6308_v3, %v6307_v12 }
 0x2b8   : > { %v6198_v40 = vpop.f32.mrf.mxu1  ;;  %v6310_v18 = vpop.f32.mrf.mxu0 }
 0x2b9   : > { %v3351_v22 = vadd.f32 %v6197_v51, %v8747_v16 }
 0x2ba   : > { %v6199_v25 = vpop.f32.mrf.mxu1  ;;  %v6311_v4 = vpop.f32.mrf.mxu0 }
 0x2bb   : > { %v9000_v46 = vadd.f32 %v6309_v41, %v3351_v22  ;;  %v6200_v39 = vadd.f32 %v6199_v25, %v6198_v40  ;;  %v6312_v28 = vadd.f32 %v6311_v4, %v6310_v18  ;;  %v7233_v22 = vld [vmem:[%s9773_s5 + $0x218] ss:$36 sps:$4 sm:$0xff]  }
 0x2bc   : > { %v6201_v32 = vpop.f32.mrf.mxu1  ;;  %6837 = vmatmul.mubr.msk.bf16.gmra.mxu1 %vm2274_vm0, %v7229_v9  ;;  %v6313_v54 = vpop.f32.mrf.mxu0 }
 0x2bd   : > { %v3354_v5 = vadd.f32 %v6200_v39, %v8767_v42  ;;  %6840 = vmatprep.mubr.msk.bf16.mxu1 %vm2274_vm0, %v7230_v47  ;;  %v7232_v42 = vld [vmem:[%s9773_s5 + $0x1d0] ss:$36 sps:$4 sm:$0xff]  }
 0x2be   : > { %v6202_v6 = vpop.f32.mrf.mxu1  ;;  %v6314_v16 = vpop.f32.mrf.mxu0 }
 0x2bf   : > { %v9005_v35 = vadd.f32 %v6312_v28, %v3354_v5  ;;  %v6203_v63 = vadd.f32 %v6202_v6, %v6201_v32  ;;  %v6315_v23 = vadd.f32 %v6314_v16, %v6313_v54 }
 0x2c0   : > { %v6204_v45 = vpop.f32.mrf.mxu1  ;;  %v6316_v38 = vpop.f32.mrf.mxu0 }
 0x2c1   : > { %v3359_v13 = vadd.f32 %v8743_v48, %v6203_v63 }
 0x2c2   : > { %v6205_v1 = vpop.f32.mrf.mxu1  ;;  %v6317_v56 = vpop.f32.mrf.mxu0 }
 0x2c3   : > { %v9014_v20 = vadd.f32 %v6315_v23, %v3359_v13  ;;  %v6206_v37 = vadd.f32 %v6205_v1, %v6204_v45  ;;  %v6318_v52 = vadd.f32 %v6317_v56, %v6316_v38  ;;  %v7235_v13 = vld [vmem:[%s9773_s5 + $0x2a8] ss:$36 sps:$4 sm:$0xff]  }
 0x2c4   : > { %v6207_v12 = vpop.f32.mrf.mxu1  ;;  %6841 = vmatmul.mubr.msk.bf16.gmra.mxu1 %vm2274_vm0, %v7231_v7  ;;  %v6319_v50 = vpop.f32.mrf.mxu0 }
 0x2c5   : > { %v3362_v26 = vadd.f32 %v8751_v19, %v6206_v37  ;;  %6844 = vmatprep.mubr.msk.bf16.mxu1 %vm2274_vm0, %v7232_v42  ;;  %v7234_v19 = vld [vmem:[%s9773_s5 + $0x260] ss:$36 sps:$4 sm:$0xff]  }
 0x2c6   : > { %v6208_v3 = vpop.f32.mrf.mxu1  ;;  %v6320_v48 = vpop.f32.mrf.mxu0 }
 0x2c7   : > { %v9019_v51 = vadd.f32 %v6318_v52, %v3362_v26  ;;  %v6209_v41 = vadd.f32 %v6208_v3, %v6207_v12  ;;  %v6321_v40 = vadd.f32 %v6320_v48, %v6319_v50 }
 0x2c8   : > { %v6210_v18 = vpop.f32.mrf.mxu1  ;;  %v6322_v9 = vpop.f32.mrf.mxu0 }
 0x2c9   : > { %v3367_v47 = vadd.f32 %v6209_v41, %v8775_v30 }
 0x2ca   : > { %v6211_v25 = vpop.f32.mrf.mxu1  ;;  %v6323_v4 = vpop.f32.mrf.mxu0 }
 0x2cb   : > { %v9028_v39 = vadd.f32 %v6321_v40, %v3367_v47  ;;  %v6212_v28 = vadd.f32 %v6211_v25, %v6210_v18  ;;  %v6324_v32 = vadd.f32 %v6323_v4, %v6322_v9  ;;  %v7237_v47 = vld [vmem:[%s9773_s5 + $0x338] ss:$36 sps:$4 sm:$0xff]  }
 0x2cc   : > { %v6213_v54 = vpop.f32.mrf.mxu1  ;;  %6845 = vmatmul.mubr.msk.bf16.gmra.mxu1 %vm2274_vm0, %v7233_v22  ;;  %v6325_v5 = vpop.f32.mrf.mxu0 }
 0x2cd   : > { %v3370_v6 = vadd.f32 %v6212_v28, %v8795_v0  ;;  %6848 = vmatprep.mubr.msk.bf16.mxu1 %vm2274_vm0, %v7234_v19  ;;  %v7236_v0 = vld [vmem:[%s9773_s5 + $0x2f0] ss:$36 sps:$4 sm:$0xff]  }
 0x2ce   : > { %v6214_v16 = vpop.f32.mrf.mxu1  ;;  %v6326_v30 = vpop.f32.mrf.mxu0 }
 0x2cf   : > { %v9033_v63 = vadd.f32 %v6324_v32, %v3370_v6  ;;  %v6215_v23 = vadd.f32 %v6214_v16, %v6213_v54  ;;  %v6327_v45 = vadd.f32 %v6326_v30, %v6325_v5 }
 0x2d0   : > { %v6216_v38 = vpop.f32.mrf.mxu1  ;;  %v6328_v7 = vpop.f32.mrf.mxu0 }
 0x2d1   : > { %v3375_v42 = vadd.f32 %v8771_v29, %v6215_v23 }
 0x2d2   : > { %v6217_v1 = vpop.f32.mrf.mxu1  ;;  %v6329_v56 = vpop.f32.mrf.mxu0 }
 0x2d3   : > { %v9042_v37 = vadd.f32 %v6327_v45, %v3375_v42  ;;  %v6218_v52 = vadd.f32 %v6217_v1, %v6216_v38  ;;  %v6330_v12 = vadd.f32 %v6329_v56, %v6328_v7  ;;  %v7239_v42 = vld [vmem:[%s9773_s5 + $0x3c8] ss:$36 sps:$4 sm:$0xff]  }
 0x2d4   : > { %v6219_v50 = vpop.f32.mrf.mxu1  ;;  %6849 = vmatmul.mubr.msk.bf16.gmra.mxu1 %vm2274_vm0, %v7235_v13  ;;  %v6331_v26 = vpop.f32.mrf.mxu0 }
 0x2d5   : > { %v3378_v3 = vadd.f32 %v8779_v2, %v6218_v52  ;;  %6852 = vmatprep.mubr.msk.bf16.mxu1 %vm2274_vm0, %v7236_v0  ;;  %v7238_v2 = vld [vmem:[%s9773_s5 + $0x380] ss:$36 sps:$4 sm:$0xff]  }
 0x2d6   : > { %v6220_v48 = vpop.f32.mrf.mxu1  ;;  %v6332_v29 = vpop.f32.mrf.mxu0 }
 0x2d7   : > { %v9047_v41 = vadd.f32 %v6330_v12, %v3378_v3  ;;  %v6221_v40 = vadd.f32 %v6220_v48, %v6219_v50  ;;  %v6333_v18 = vadd.f32 %v6332_v29, %v6331_v26 }
 0x2d8   : > { %v6222_v9 = vpop.f32.mrf.mxu1  ;;  %v6334_v22 = vpop.f32.mrf.mxu0 }
 0x2d9   : > { %v3383_v19 = vadd.f32 %v6221_v40, %v8803_v11 }
 0x2da   : > { %v6223_v25 = vpop.f32.mrf.mxu1  ;;  %v6335_v4 = vpop.f32.mrf.mxu0 }
 0x2db   : > { %v9056_v28 = vadd.f32 %v6333_v18, %v3383_v19  ;;  %v6224_v32 = vadd.f32 %v6223_v25, %v6222_v9  ;;  %v6336_v54 = vadd.f32 %v6335_v4, %v6334_v22  ;;  %v7241_v19 = vld [vmem:[%s9773_s5 + $0x458] ss:$36 sps:$4 sm:$0xff]  }
 0x2dc   : > { %v6225_v5 = vpop.f32.mrf.mxu1  ;;  %6853 = vmatmul.mubr.msk.bf16.gmra.mxu1 %vm2274_vm0, %v7237_v47  ;;  %v6337_v6 = vpop.f32.mrf.mxu0 }
 0x2dd   : > { %v3386_v16 = vadd.f32 %v6224_v32, %v8823_v14  ;;  %6856 = vmatprep.mubr.msk.bf16.mxu1 %vm2274_vm0, %v7238_v2  ;;  %v7240_v14 = vld [vmem:[%s9773_s5 + $0x410] ss:$36 sps:$4 sm:$0xff]  }
 0x2de   : > { %v6226_v30 = vpop.f32.mrf.mxu1  ;;  %v6338_v11 = vpop.f32.mrf.mxu0 }
 0x2df   : > { %v9061_v23 = vadd.f32 %v6336_v54, %v3386_v16  ;;  %v6227_v45 = vadd.f32 %v6226_v30, %v6225_v5  ;;  %v6339_v38 = vadd.f32 %v6338_v11, %v6337_v6 }
 0x2e0   : > { %v6228_v7 = vpop.f32.mrf.mxu1  ;;  %v6340_v13 = vpop.f32.mrf.mxu0 }
 0x2e1   : > { %v3391_v0 = vadd.f32 %v8799_v43, %v6227_v45 }
 0x2e2   : > { %v6229_v1 = vpop.f32.mrf.mxu1  ;;  %v6341_v56 = vpop.f32.mrf.mxu0 }
 0x2e3   : > { %v9070_v52 = vadd.f32 %v6339_v38, %v3391_v0  ;;  %v6230_v12 = vadd.f32 %v6229_v1, %v6228_v7  ;;  %v6342_v50 = vadd.f32 %v6341_v56, %v6340_v13 }
 0x2e4   : > { %v6231_v26 = vpop.f32.mrf.mxu1  ;;  %6857 = vmatmul.mubr.msk.bf16.gmra.mxu1 %vm2274_vm0, %v7239_v42  ;;  %v6343_v3 = vpop.f32.mrf.mxu0 }
 0x2e5   : > { %v3394_v48 = vadd.f32 %v8807_v10, %v6230_v12  ;;  %6860 = vmatprep.mubr.msk.bf16.mxu1 %vm2274_vm0, %v7240_v14 }
 0x2e6   : > { %v6232_v29 = vpop.f32.mrf.mxu1  ;;  %v6344_v43 = vpop.f32.mrf.mxu0 }
 0x2e7   : > { %v9075_v40 = vadd.f32 %v6342_v50, %v3394_v48  ;;  %v6233_v18 = vadd.f32 %v6232_v29, %v6231_v26  ;;  %v6345_v9 = vadd.f32 %v6344_v43, %v6343_v3 }
 0x2e8   : > { %v6234_v22 = vpop.f32.mrf.mxu1  ;;  %v6346_v47 = vpop.f32.mrf.mxu0 }
 0x2e9   : > { %v3399_v2 = vadd.f32 %v6233_v18, %v8831_v53 }
 0x2ea   : > { %v6235_v25 = vpop.f32.mrf.mxu1  ;;  %v6347_v4 = vpop.f32.mrf.mxu0 }
 0x2eb   : > { %v9081_v32 = vadd.f32 %v6345_v9, %v3399_v2  ;;  %v6236_v10 = vadd.f32 %v6235_v25, %v6234_v22  ;;  %v6348_v54 = vadd.f32 %v6347_v4, %v6346_v47 }
 0x2ec   : > { %v6237_v5 = vpop.f32.mrf.mxu1  ;;  %6861 = vmatmul.mubr.msk.bf16.gmra.mxu1 %vm2274_vm0, %v7241_v19  ;;  %v6349_v6 = vpop.f32.mrf.mxu0 }
 0x2ed   : > { %v3402_v16 = vadd.f32 %v6236_v10, %v8851_v60 }
 0x2ee   : > { %v6238_v30 = vpop.f32.mrf.mxu1  ;;  %v6350_v11 = vpop.f32.mrf.mxu0 }
 0x2ef   : > { %v9085_v45 = vadd.f32 %v6348_v54, %v3402_v16  ;;  %v6239_v38 = vadd.f32 %v6238_v30, %v6237_v5  ;;  %v6351_v7 = vadd.f32 %v6350_v11, %v6349_v6 }
 0x2f0   : > { %v6240_v13 = vpop.f32.mrf.mxu1  ;;  %v6352_v53 = vpop.f32.mrf.mxu0 }
 0x2f1   : > { %v3407_v42 = vadd.f32 %v8827_v59, %v6239_v38 }
 0x2f2   : > { %v6241_v0 = vpop.f32.mrf.mxu1  ;;  %v6353_v14 = vpop.f32.mrf.mxu0 }
 0x2f3   : > { %v9088_v1 = vadd.f32 %v6351_v7, %v3407_v42  ;;  %v6242_v56 = vadd.f32 %v6241_v0, %v6240_v13  ;;  %v6354_v12 = vadd.f32 %v6353_v14, %v6352_v53 }
 0x2f4   : > { %v6371_v50 = vpop.f32.mrf.mxu1  ;;  %v6483_v26 = vpop.f32.mrf.mxu0 }
 0x2f5   : > { %9816 = vst [vmem:[#allocation7_spill] sm:$0xff] %v9088_v1  ;;  %v3410_v60 = vadd.f32 %v8835_v36, %v6242_v56 }
 0x2f6   : > { %v6372_v3 = vpop.f32.mrf.mxu1  ;;  %v6484_v48 = vpop.f32.mrf.mxu0 }
 0x2f7   : > { %v9091_v29 = vadd.f32 %v6354_v12, %v3410_v60  ;;  %v6373_v43 = vadd.f32 %v6372_v3, %v6371_v50  ;;  %v6485_v18 = vadd.f32 %v6484_v48, %v6483_v26 }
 0x2f8   : > { %v6374_v9 = vpop.f32.mrf.mxu1  ;;  %v6486_v22 = vpop.f32.mrf.mxu0 }
 0x2f9   : > { %9817 = vst [vmem:[#allocation8_spill] sm:$0xff] %v9091_v29  ;;  %v3609_v59 = vadd.f32 %v6373_v43, %v8868_v17 }
 0x2fa   : > { %v6375_v47 = vpop.f32.mrf.mxu1  ;;  %v6487_v19 = vpop.f32.mrf.mxu0 }
 0x2fb   : > { %v6376_v2 = vadd.f32 %v6375_v47, %v6374_v9  ;;  %v6488_v25 = vadd.f32 %v6487_v19, %v6486_v22  ;;  %v9094_v4 = vadd.f32 %v6485_v18, %v3609_v59 }
 0x2fc   : > { %v6377_v10 = vpop.f32.mrf.mxu1  ;;  %v6489_v54 = vpop.f32.mrf.mxu0 }
 0x2fd   : > { %v3612_v36 = vadd.f32 %v6376_v2, %v8871_v49 }
 0x2fe   : > { %v6378_v5 = vpop.f32.mrf.mxu1  ;;  %v6490_v6 = vpop.f32.mrf.mxu0 }
 0x2ff   : > { %v6379_v16 = vadd.f32 %v6378_v5, %v6377_v10  ;;  %v6491_v30 = vadd.f32 %v6490_v6, %v6489_v54  ;;  %v9097_v11 = vadd.f32 %v6488_v25, %v3612_v36 }
 0x300   : > { %v6380_v38 = vpop.f32.mrf.mxu1  ;;  %v6492_v7 = vpop.f32.mrf.mxu0 }
 0x301   : > { %v3617_v17 = vadd.f32 %v6379_v16, %v8886_v31 }
 0x302   : > { %v6381_v13 = vpop.f32.mrf.mxu1  ;;  %v6493_v53 = vpop.f32.mrf.mxu0 }
 0x303   : > { %v6382_v42 = vadd.f32 %v6381_v13, %v6380_v38  ;;  %v6494_v0 = vadd.f32 %v6493_v53, %v6492_v7  ;;  %v9100_v14 = vadd.f32 %v6491_v30, %v3617_v17 }
 0x304   : > { %v6383_v56 = vpop.f32.mrf.mxu1  ;;  %v6495_v12 = vpop.f32.mrf.mxu0 }
 0x305   : > { %v3620_v49 = vadd.f32 %v6382_v42, %v8889_v61 }
 0x306   : > { %v6384_v50 = vpop.f32.mrf.mxu1  ;;  %v6496_v26 = vpop.f32.mrf.mxu0 }
 0x307   : > { %v6385_v60 = vadd.f32 %v6384_v50, %v6383_v56  ;;  %v6497_v3 = vadd.f32 %v6496_v26, %v6495_v12  ;;  %v9103_v48 = vadd.f32 %v6494_v0, %v3620_v49 }
 0x308   : > { %v6386_v43 = vpop.f32.mrf.mxu1  ;;  %v6498_v18 = vpop.f32.mrf.mxu0 }
 0x309   : > { %v3625_v31 = vadd.f32 %v6385_v60, %v8904_v34 }
 0x30a   : > { %v6387_v9 = vpop.f32.mrf.mxu1  ;;  %v6499_v22 = vpop.f32.mrf.mxu0 }
 0x30b   : > { %v6388_v59 = vadd.f32 %v6387_v9, %v6386_v43  ;;  %v6500_v47 = vadd.f32 %v6499_v22, %v6498_v18  ;;  %v9106_v19 = vadd.f32 %v6497_v3, %v3625_v31 }
 0x30c   : > { %v6389_v2 = vpop.f32.mrf.mxu1  ;;  %v6501_v25 = vpop.f32.mrf.mxu0 }
 0x30d   : > { %v3628_v61 = vadd.f32 %v6388_v59, %v8907_v62 }
 0x30e   : > { %v6390_v10 = vpop.f32.mrf.mxu1  ;;  %v6502_v54 = vpop.f32.mrf.mxu0 }
 0x30f   : > { %v6391_v36 = vadd.f32 %v6390_v10, %v6389_v2  ;;  %v6503_v5 = vadd.f32 %v6502_v54, %v6501_v25  ;;  %v9109_v6 = vadd.f32 %v6500_v47, %v3628_v61  ;;  %v9121_v61 = vpop.permute.xlu0 %4241 }
 0x310   : > { %v6392_v16 = vpop.f32.mrf.mxu1  ;;  %v6504_v30 = vpop.f32.mrf.mxu0  ;;  %9818 = vst [vmem:[#allocation2_spill] sm:$0xff] %v9121_v61 }
 0x311   : > { %v3633_v34 = vadd.f32 %v6391_v36, %v8922_v8 }
 0x312   : > { %v6393_v38 = vpop.f32.mrf.mxu1  ;;  %v6505_v7 = vpop.f32.mrf.mxu0 }
 0x313   : > { %v6394_v17 = vadd.f32 %v6393_v38, %v6392_v16  ;;  %v6506_v13 = vadd.f32 %v6505_v7, %v6504_v30  ;;  %v9112_v53 = vadd.f32 %v6503_v5, %v3633_v34  ;;  %v9125_v16 = vpop.permute.xlu1 %4246 }
 0x314   : > { %v6395_v42 = vpop.f32.mrf.mxu1  ;;  %v6507_v0 = vpop.f32.mrf.mxu0  ;;  %9819 = vst [vmem:[#allocation11_spill] sm:$0xff] %v9125_v16 }
 0x315   : > { %v3636_v62 = vadd.f32 %v6394_v17, %v8925_v57 }
 0x316   : > { %v6396_v56 = vpop.f32.mrf.mxu1  ;;  %v6508_v12 = vpop.f32.mrf.mxu0 }
 0x317   : > { %v6397_v49 = vadd.f32 %v6396_v56, %v6395_v42  ;;  %v6509_v50 = vadd.f32 %v6508_v12, %v6507_v0  ;;  %v9115_v26 = vadd.f32 %v6506_v13, %v3636_v62  ;;  %v9130_v0 = vpop.permute.xlu0 %4161 }
 0x318   : > { %v6398_v60 = vpop.f32.mrf.mxu1  ;;  %v6510_v3 = vpop.f32.mrf.mxu0 }
 0x319   : > { %v3641_v8 = vadd.f32 %v6397_v49, %v8940_v21  ;;  %v9133_v49 = vpop.permute.xlu1 %4166 }
 0x31a   : > { %v6399_v43 = vpop.f32.mrf.mxu1  ;;  %v6511_v18 = vpop.f32.mrf.mxu0 }
 0x31b   : > { %v6400_v31 = vadd.f32 %v6399_v43, %v6398_v60  ;;  %v6512_v9 = vadd.f32 %v6511_v18, %v6510_v3  ;;  %v9118_v22 = vadd.f32 %v6509_v50, %v3641_v8 }
 0x31c   : > { %v6401_v59 = vpop.f32.mrf.mxu1  ;;  %v6513_v47 = vpop.f32.mrf.mxu0 }
 0x31d   : > { %v3644_v57 = vadd.f32 %v6400_v31, %v8943_v27 }
 0x31e   : > { %v6402_v2 = vpop.f32.mrf.mxu1  ;;  %v6514_v25 = vpop.f32.mrf.mxu0 }
 0x31f   : > { %v6403_v10 = vadd.f32 %v6402_v2, %v6401_v59  ;;  %v6515_v54 = vadd.f32 %v6514_v25, %v6513_v47  ;;  %v9123_v36 = vadd.f32 %v6512_v9, %v3644_v57  ;;  %v9138_v9 = vpop.permute.xlu0 %4231  ;;  %v9142_v25 = vpop.permute.xlu1 %4236 }
 0x320   : > { %v6404_v5 = vpop.f32.mrf.mxu1  ;;  %v6516_v21 = vpop.f32.mrf.mxu0  ;;  %9820 = vst [vmem:[#allocation12_spill] sm:$0xff] %v9138_v9  ;;  %9821 = vst [vmem:[#allocation3_spill] sm:$0xff] %v9142_v25 }
 0x321   : > { %v3649_v30 = vadd.f32 %v6403_v10, %v8958_v58 }
 0x322   : > { %v6405_v34 = vpop.f32.mrf.mxu1  ;;  %v6517_v38 = vpop.f32.mrf.mxu0 }
 0x323   : > { %v6406_v7 = vadd.f32 %v6405_v34, %v6404_v5  ;;  %v6518_v17 = vadd.f32 %v6517_v38, %v6516_v21  ;;  %v9128_v13 = vadd.f32 %v6515_v54, %v3649_v30 }
 0x324   : > { %v6407_v27 = vpop.f32.mrf.mxu1  ;;  %v6519_v42 = vpop.f32.mrf.mxu0 }
 0x325   : > { %v3652_v62 = vadd.f32 %v6406_v7, %v8961_v24  ;;  %v9147_v7 = vpop.permute.xlu0 %4151 }
 0x326   : > { %v6408_v56 = vpop.f32.mrf.mxu1  ;;  %v6520_v12 = vpop.f32.mrf.mxu0 }
 0x327   : > { %v6409_v50 = vadd.f32 %v6408_v56, %v6407_v27  ;;  %v6521_v60 = vadd.f32 %v6520_v12, %v6519_v42  ;;  %v9135_v3 = vadd.f32 %v6518_v17, %v3652_v62  ;;  %v9150_v62 = vpop.permute.xlu1 %4156 }
 0x328   : > { %v6410_v58 = vpop.f32.mrf.mxu1  ;;  %v6522_v8 = vpop.f32.mrf.mxu0 }
 0x329   : > { %v3657_v43 = vadd.f32 %v6409_v50, %v8973_v44 }
 0x32a   : > { %v6411_v18 = vpop.f32.mrf.mxu1  ;;  %v6523_v31 = vpop.f32.mrf.mxu0 }
 0x32b   : > { %v6412_v59 = vadd.f32 %v6411_v18, %v6410_v58  ;;  %v6524_v47 = vadd.f32 %v6523_v31, %v6522_v8  ;;  %v9140_v57 = vadd.f32 %v6521_v60, %v3657_v43  ;;  %v9155_v18 = vpop.permute.xlu0 %4221 }
 0x32c   : > { %v6413_v24 = vpop.f32.mrf.mxu1  ;;  %v6525_v2 = vpop.f32.mrf.mxu0  ;;  %9822 = vst [vmem:[#allocation4_spill] sm:$0xff] %v9155_v18 }
 0x32d   : > { %v3660_v10 = vadd.f32 %v6412_v59, %v8977_v33 }
 0x32e   : > { %v6414_v54 = vpop.f32.mrf.mxu1  ;;  %v6526_v5 = vpop.f32.mrf.mxu0 }
 0x32f   : > { %v6415_v21 = vadd.f32 %v6414_v54, %v6413_v24  ;;  %v6527_v30 = vadd.f32 %v6526_v5, %v6525_v2  ;;  %v9145_v34 = vadd.f32 %v6524_v47, %v3660_v10  ;;  %v9159_v2 = vpop.permute.xlu1 %4226 }
 0x330   : > { %v6416_v44 = vpop.f32.mrf.mxu1  ;;  %v6528_v38 = vpop.f32.mrf.mxu0  ;;  %9823 = vst [vmem:[#allocation10_spill] sm:$0xff] %v9159_v2 }
 0x331   : > { %v3665_v17 = vadd.f32 %v6415_v21, %v8986_v15 }
 0x332   : > { %v6417_v27 = vpop.f32.mrf.mxu1  ;;  %v6529_v42 = vpop.f32.mrf.mxu0 }
 0x333   : > { %v6418_v56 = vadd.f32 %v6417_v27, %v6416_v44  ;;  %v6530_v12 = vadd.f32 %v6529_v42, %v6528_v38  ;;  %v9152_v50 = vadd.f32 %v6527_v30, %v3665_v17  ;;  %v9164_v17 = vpop.permute.xlu0 %4141 }
 0x334   : > { %v6419_v33 = vpop.f32.mrf.mxu1  ;;  %v6531_v60 = vpop.f32.mrf.mxu0 }
 0x335   : > { %v3668_v58 = vadd.f32 %v6418_v56, %v8991_v55 }
 0x336   : > { %v6420_v8 = vpop.f32.mrf.mxu1  ;;  %v6532_v43 = vpop.f32.mrf.mxu0 }
 0x337   : > { %v6421_v31 = vadd.f32 %v6420_v8, %v6419_v33  ;;  %v6533_v59 = vadd.f32 %v6532_v43, %v6531_v60  ;;  %v9157_v47 = vadd.f32 %v6530_v12, %v3668_v58  ;;  %v9167_v12 = vpop.permute.xlu1 %4146 }
 0x338   : > { %v6422_v15 = vpop.f32.mrf.mxu1  ;;  %v6534_v24 = vpop.f32.mrf.mxu0 }
 0x339   : > { %v3673_v10 = vadd.f32 %v6421_v31, %v9000_v46 }
 0x33a   : > { %v6423_v54 = vpop.f32.mrf.mxu1  ;;  %v6535_v5 = vpop.f32.mrf.mxu0 }
 0x33b   : > { %v6424_v21 = vadd.f32 %v6423_v54, %v6422_v15  ;;  %v6536_v30 = vadd.f32 %v6535_v5, %v6534_v24  ;;  %v9162_v44 = vadd.f32 %v6533_v59, %v3673_v10  ;;  %v9172_v15 = vpop.permute.xlu0 %4211 }
 0x33c   : > { %v6425_v55 = vpop.f32.mrf.mxu1  ;;  %v6537_v38 = vpop.f32.mrf.mxu0  ;;  %9824 = vst [vmem:[#allocation5_spill] sm:$0xff] %v9172_v15 }
 0x33d   : > { %v3676_v27 = vadd.f32 %v6424_v21, %v9005_v35  ;;  %v9176_v21 = vpop.permute.xlu1 %4216 }
 0x33e   : > { %v6426_v42 = vpop.f32.mrf.mxu1  ;;  %v6538_v56 = vpop.f32.mrf.mxu0  ;;  %9825 = vst [vmem:[#allocation9_spill] sm:$0xff] %v9176_v21 }
 0x33f   : > { %v6427_v33 = vadd.f32 %v6426_v42, %v6425_v55  ;;  %v6539_v60 = vadd.f32 %v6538_v56, %v6537_v38  ;;  %v9169_v58 = vadd.f32 %v6536_v30, %v3676_v27  ;;  %v9182_v25 = vpop.permute.xlu0 %4131 }
 0x340   : > { %v6428_v46 = vpop.f32.mrf.mxu1  ;;  %v6540_v8 = vpop.f32.mrf.mxu0 }
 0x341   : > { %v3681_v43 = vadd.f32 %v6427_v33, %v9014_v20 }
 0x342   : > { %v6429_v31 = vpop.f32.mrf.mxu1  ;;  %v6541_v59 = vpop.f32.mrf.mxu0 }
 0x343   : > { %v6430_v24 = vadd.f32 %v6429_v31, %v6428_v46  ;;  %v6542_v10 = vadd.f32 %v6541_v59, %v6540_v8  ;;  %v9174_v54 = vadd.f32 %v6539_v60, %v3681_v43  ;;  %v9186_v43 = vpop.permute.xlu1 %4136 }
 0x344   : > { %v6431_v35 = vpop.f32.mrf.mxu1  ;;  %v6543_v5 = vpop.f32.mrf.mxu0 }
 0x345   : > { %v3684_v55 = vadd.f32 %v6430_v24, %v9019_v51 }
 0x346   : > { %v6432_v30 = vpop.f32.mrf.mxu1  ;;  %v6544_v38 = vpop.f32.mrf.mxu0 }
 0x347   : > { %v6433_v27 = vadd.f32 %v6432_v30, %v6431_v35  ;;  %v6545_v42 = vadd.f32 %v6544_v38, %v6543_v5  ;;  %v9179_v56 = vadd.f32 %v6542_v10, %v3684_v55  ;;  %v9191_v35 = vpop.permute.xlu0 %4201 }
 0x348   : > { %v6434_v20 = vpop.f32.mrf.mxu1  ;;  %9827 = vst [vmem:[#allocation13_spill] sm:$0xff] %v9191_v35  ;;  %v9198_v30 = vpop.f32.mrf.mxu0 }
 0x349   : > { %v3689_v33 = vadd.f32 %v6433_v27, %v9028_v39  ;;  %v9196_v39 = vpop.permute.xlu1 %4206 }
 0x34a   : > { %v6435_v46 = vpop.f32.mrf.mxu1  ;;  %9828 = vst [vmem:[#allocation14_spill] sm:$0xff] %v9196_v39 }
 0x34b   : > { %v6436_v60 = vadd.f32 %v6435_v46, %v6434_v20  ;;  %v9184_v8 = vadd.f32 %v6545_v42, %v3689_v33  ;;  %v7244_v33 = vld [vmem:[%s9776_s8 + $0x4] ss:$8 sps:$4 sm:$0xff]   ;;  %v9208_v46 = vpop.f32.mrf.mxu0 }
 0x34c   : > { %v6437_v31 = vpop.f32.mrf.mxu1  ;;  %4745 = vmatprep.mubr.bf16.mxu0 %v7244_v33 }
 0x34d   : > { %v9189_v51 = vadd.f32 %v6436_v60, %v9033_v63  ;;  %v9203_v63 = vpop.permute.xlu0 %4121  ;;  %v9210_v60 = vpop.permute.xlu1 %4126 }
 0x34e   : > { %v6438_v59 = vpop.f32.mrf.mxu1 }
 0x34f   : > { %9826 = vst [vmem:[#allocation6_spill] sm:$0xff] %v9189_v51  ;;  %v6439_v24 = vadd.f32 %v6438_v59, %v6437_v31 }
 0x350   : > { %v6440_v10 = vpop.f32.mrf.mxu1 }
 0x351   : > { %v9194_v5 = vadd.f32 %v6439_v24, %v9042_v37  ;;  %v9222_v9 = vpop.permute.xlu1 %4196 }
 0x352   : > { %v6441_v55 = vpop.f32.mrf.mxu1  ;;  %9832 = vst [vmem:[#allocation18_spill] sm:$0xff] %v9222_v9 }
 0x353   : > { %v6442_v38 = vadd.f32 %v6441_v55, %v6440_v10  ;;  %v9217_v55 = vpop.permute.xlu0 %4191 }
 0x354   : > { %v6443_v27 = vpop.f32.mrf.mxu1  ;;  %9830 = vst [vmem:[#allocation16_spill] sm:$0xff] %v9217_v55 }
 0x355   : > { %v9201_v42 = vadd.f32 %v6442_v38, %v9047_v41  ;;  %v9215_v41 = vpop.f32.mrf.mxu0 }
 0x356   : > { %v6444_v20 = vpop.f32.mrf.mxu1 }
 0x357   : > { %v6445_v37 = vadd.f32 %v6444_v20, %v6443_v27  ;;  %v9224_v20 = vpop.f32.mrf.mxu0 }
 0x358   : > { %v6446_v31 = vpop.f32.mrf.mxu1 }
 0x359   : > { %v9213_v59 = vadd.f32 %v6445_v37, %v9056_v28  ;;  %v4112_v37 = vpop.permute.xlu0 %4111  ;;  %v9229_v2 = vpop.f32.mrf.mxu0 }
 0x35a   : > { %v6447_v24 = vpop.f32.mrf.mxu1 }
 0x35b   : > { %9829 = vst [vmem:[#allocation15_spill] sm:$0xff] %v9213_v59  ;;  %v6448_v10 = vadd.f32 %v6447_v24, %v6446_v31  ;;  %v4117_v24 = vpop.permute.xlu1 %4116  ;;  %v9234_v29 = vpop.f32.mrf.mxu0 }
 0x35c   : > { %v6449_v38 = vpop.f32.mrf.mxu1 }
 0x35d   : > { %v9220_v16 = vadd.f32 %v6448_v10, %v9061_v23  ;;  %v9236_v18 = vpop.permute.xlu0 %4181  ;;  %v9243_v1 = vpop.f32.mrf.mxu0 }
 0x35e   : > { %v6450_v27 = vpop.f32.mrf.mxu1  ;;  %9836 = vst [vmem:[#allocation22_spill] sm:$0xff] %v9243_v1 }
 0x35f   : > { %9831 = vst [vmem:[#allocation17_spill] sm:$0xff] %v9220_v16  ;;  %v6451_v61 = vadd.f32 %v6450_v27, %v6449_v38 }
 0x360   : > { %v6452_v33 = vpop.f32.mrf.mxu1 }
 0x361   : > { %v9227_v28 = vadd.f32 %v6451_v61, %v9070_v52  ;;  %v9241_v61 = vpop.permute.xlu1 %4186 }
 0x362   : > { %v6453_v21 = vpop.f32.mrf.mxu1 }
 0x363   : > { %9833 = vst [vmem:[#allocation19_spill] sm:$0xff] %v9227_v28  ;;  %v6454_v31 = vadd.f32 %v6453_v21, %v6452_v33 }
 0x364   : > { %v6455_v15 = vpop.f32.mrf.mxu1 }
 0x365   : > { %v9232_v23 = vadd.f32 %v6454_v31, %v9075_v40  ;;  %v4102_v31 = vpop.permute.xlu0 %4101 }
 0x366   : > { %v6456_v10 = vpop.f32.mrf.mxu1 }
 0x367   : > { %9834 = vst [vmem:[#allocation20_spill] sm:$0xff] %v9232_v23  ;;  %v6457_v16 = vadd.f32 %v6456_v10, %v6455_v15  ;;  %v9252_v15 = vpop.f32.mrf.mxu0  ;;  %v4107_v10 = vpop.permute.xlu1 %4106 }
 0x368   : > { %v6458_v38 = vpop.f32.mrf.mxu1  ;;  %9840 = vst [vmem:[#allocation26_spill] sm:$0xff] %v9252_v15 }
 0x369   : > { %v9239_v52 = vadd.f32 %v6457_v16, %v9081_v32  ;;  %v9258_v16 = vpop.f32.mrf.mxu0 }
 0x36a   : > { %v6459_v27 = vpop.f32.mrf.mxu1  ;;  %9843 = vst [vmem:[#allocation29_spill] sm:$0xff] %v9258_v16 }
 0x36b   : > { %9835 = vst [vmem:[#allocation21_spill] sm:$0xff] %v9239_v52  ;;  %v6460_v21 = vadd.f32 %v6459_v27, %v6458_v38  ;;  %v9260_v52 = vpop.permute.xlu0 %4171  ;;  %v9263_v59 = vpop.permute.xlu1 %4176 }
 0x36c   : > { %v9245_v33 = vpop.f32.mrf.mxu1 }
 0x36d   : > { %9837 = vst [vmem:[#allocation23_spill] sm:$0xff] %v9245_v33  ;;  %v9248_v40 = vadd.f32 %v6460_v21, %v9085_v45  ;;  %v9265_v21 = vpop.f32.mrf.mxu0 }
 0x36e   : > { %v9250_v23 = vpop.f32.mrf.mxu1  ;;  %9844 = vst [vmem:[#allocation30_spill] sm:$0xff] %v9265_v21 }
 0x36f   : > { %9838 = vst [vmem:[#allocation24_spill] sm:$0xff] %v9248_v40  ;;  %9839 = vst [vmem:[#allocation25_spill] sm:$0xff] %v9250_v23  ;;  %v4092_v55 = vpop.permute.xlu0 %4091  ;;  %v9269_v23 = vpop.f32.mrf.mxu0 }
 0x370   : > { %v9254_v9 = vpop.f32.mrf.mxu1 }
 0x371   : > { %9841 = vst [vmem:[#allocation27_spill] sm:$0xff] %v9254_v9 }
 0x372   : > { %v9256_v32 = vpop.f32.mrf.mxu1 }
 0x373   : > { %9842 = vst [vmem:[#allocation28_spill] sm:$0xff] %v9256_v32 }
 0x374   : > { %v6834_v38 = vpop.f32.mrf.mxu1 }
 0x375   : > { %v3939_v27 = vadd.f32 %v6834_v38, %v9100_v14  ;;  %v4097_v14 = vpop.permute.xlu1 %4096 }
 0x376   : > { %v3930_v45 = vpop.f32.mrf.mxu1 }
 0x377   : > { %v3931_v40 = vadd.f32 %v3930_v45, %v9094_v4  ;;  %v4251_v39 = vadd.f32 %v4102_v31, %v3939_v27  ;;  %v9273_v45 = vpop.f32.mrf.mxu0 }
 0x378   : > { %v6835_v28 = vpop.f32.mrf.mxu1 }
 0x379   : > { %v3942_v9 = vadd.f32 %v6835_v28, %v9103_v48  ;;  %v4249_v16 = vadd.f32 %v4092_v55, %v3931_v40  ;;  %v4283_v35 = vmax.f32 %v4251_v39, 0.0 }
 0x37a   : > { %v3933_v32 = vpop.f32.mrf.mxu1 }
 0x37b   : > { %v4252_v33 = vadd.f32 %v4107_v10, %v3942_v9  ;;  %v3934_v51 = vadd.f32 %v3933_v32, %v9097_v11  ;;  %v4281_v31 = vmax.f32 %v4249_v16, 0.0 }
 0x37c   : > { %v6838_v38 = vpop.f32.mrf.mxu1 }
 0x37d   : > { %v4284_v15 = vmax.f32 %v4252_v33, 0.0  ;;  %v4250_v1 = vadd.f32 %v4097_v14, %v3934_v51  ;;  %v3955_v21 = vadd.f32 %v6838_v38, %v9112_v53  ;;  %v9282_v51 = vpop.f32.mrf.mxu0 }
 0x37e   : > { %v3946_v4 = vpop.f32.mrf.mxu1 }
 0x37f   : > { %v9275_v48 = vpack.c.bf16 %v4284_v15, %v4283_v35  ;;  %v4282_v28 = vmax.f32 %v4250_v1, 0.0  ;;  %v3947_v27 = vadd.f32 %v3946_v4, %v9106_v19  ;;  %v4255_v11 = vadd.f32 %v9203_v63, %v3955_v21  ;;  %v9287_v14 = vpop.f32.mrf.mxu0 }
 0x380   : > { %v6839_v55 = vpop.f32.mrf.mxu1 }
 0x381   : > { %v9278_v9 = vpack.c.bf16 %v4282_v28, %v4281_v31  ;;  %v3958_v39 = vadd.f32 %v6839_v55, %v9115_v26  ;;  %v4253_v53 = vadd.f32 %v4112_v37, %v3947_v27  ;;  %v4287_v15 = vmax.f32 %v4255_v11, 0.0 }
 0x382   : > { %v3949_v33 = vpop.f32.mrf.mxu1 }
 0x383   : > { %v4256_v40 = vadd.f32 %v9210_v60, %v3958_v39  ;;  %v3950_v10 = vadd.f32 %v3949_v33, %v9109_v6  ;;  %v4285_v63 = vmax.f32 %v4253_v53, 0.0 }
 0x384   : > { %v6842_v35 = vpop.f32.mrf.mxu1 }
 0x385   : > { %v4288_v1 = vmax.f32 %v4256_v40, 0.0  ;;  %v4254_v32 = vadd.f32 %v4117_v24, %v3950_v10  ;;  %v3971_v19 = vadd.f32 %v6842_v35, %v9128_v13  ;;  %v9296_v24 = vpop.f32.mrf.mxu0 }
 0x386   : > { %v3962_v16 = vpop.f32.mrf.mxu1 }
 0x387   : > { %v9289_v21 = vpack.c.bf16 %v4288_v1, %v4287_v15  ;;  %v4286_v26 = vmax.f32 %v4254_v32, 0.0  ;;  %v3963_v38 = vadd.f32 %v3962_v16, %v9118_v22  ;;  %v4259_v6 = vadd.f32 %v9164_v17, %v3971_v19  ;;  %v9303_v17 = vpop.f32.mrf.mxu0 }
 0x388   : > { %v6843_v37 = vpop.f32.mrf.mxu1 }
 0x389   : > { %v9292_v4 = vpack.c.bf16 %v4286_v26, %v4285_v63  ;;  %v3974_v60 = vadd.f32 %v6843_v37, %v9135_v3  ;;  %v4257_v13 = vadd.f32 %v9182_v25, %v3963_v38  ;;  %v4291_v11 = vmax.f32 %v4259_v6, 0.0 }
 0x38a   : > { %v3965_v31 = vpop.f32.mrf.mxu1 }
 0x38b   : > { %v4260_v28 = vadd.f32 %v9167_v12, %v3974_v60  ;;  %v3966_v27 = vadd.f32 %v3965_v31, %v9123_v36  ;;  %v4289_v3 = vmax.f32 %v4257_v13, 0.0 }
 0x38c   : > { %v6846_v55 = vpop.f32.mrf.mxu1 }
 0x38d   : > { %v4292_v39 = vmax.f32 %v4260_v28, 0.0  ;;  %v4258_v22 = vadd.f32 %v9186_v43, %v3966_v27  ;;  %v3987_v33 = vadd.f32 %v6846_v55, %v9152_v50  ;;  %v9312_v43 = vpop.f32.mrf.mxu0 }
 0x38e   : > { %v3978_v53 = vpop.f32.mrf.mxu1 }
 0x38f   : > { %v9305_v40 = vpack.c.bf16 %v4292_v39, %v4291_v11  ;;  %v4290_v10 = vmax.f32 %v4258_v22, 0.0  ;;  %v3979_v25 = vadd.f32 %v3978_v53, %v9140_v57  ;;  %v4263_v36 = vadd.f32 %v9130_v0, %v3987_v33  ;;  %v9321_v37 = vpop.f32.mrf.mxu0 }
 0x390   : > { %v6847_v35 = vpop.f32.mrf.mxu1  ;;  %v6551_v0 = vadd.f32 %v9224_v20, %v9215_v41  ;;  %v6548_v11 = vadd.f32 %v9208_v46, %v9198_v30  ;;  %v9845_v30 = vld [vmem:[#allocation22_spill] sm:$0xff] }
 0x391   : > { %v9308_v12 = vpack.c.bf16 %v4290_v10, %v4289_v3  ;;  %v3990_v15 = vadd.f32 %v6847_v35, %v9157_v47  ;;  %v4261_v50 = vadd.f32 %v9147_v7, %v3979_v25  ;;  %v4295_v63 = vmax.f32 %v4263_v36, 0.0  ;;  %v6573_v20 = vpop.f32.mrf.mxu0  ;;  %v9846_v46 = vld [vmem:[#allocation26_spill] sm:$0xff]  ;;  %v9847_v35 = vld [vmem:[#allocation13_spill] sm:$0xff] }
 0x392   : > { %v3981_v1 = vpop.f32.mrf.mxu1  ;;  %v6557_v10 = vadd.f32 %v9846_v46, %v9845_v30  ;;  %v9862_v46 = vld [vmem:[#allocation4_spill] sm:$0xff] }
 0x393   : > { %v4264_v32 = vadd.f32 %v9133_v49, %v3990_v15  ;;  %v3982_v19 = vadd.f32 %v3981_v1, %v9145_v34  ;;  %v4293_v6 = vmax.f32 %v4261_v50, 0.0  ;;  %v9848_v15 = vld [vmem:[#allocation6_spill] sm:$0xff]  ;;  %v9850_v50 = vld [vmem:[#allocation25_spill] sm:$0xff] }
 0x394   : > { %v6850_v16 = vpop.f32.mrf.mxu1  ;;  %v3853_v1 = vadd.f32 %v6548_v11, %v9848_v15  ;;  %v9859_v11 = vld [vmem:[#allocation27_spill] sm:$0xff] }
 0x395   : > { %v4296_v26 = vmax.f32 %v4264_v32, 0.0  ;;  %v4262_v57 = vadd.f32 %v9150_v62, %v3982_v19  ;;  %v4003_v38 = vadd.f32 %v6850_v16, %v9174_v54  ;;  %v6554_v54 = vadd.f32 %v9234_v29, %v9229_v2  ;;  %v9851_v16 = vld [vmem:[#allocation16_spill] sm:$0xff] }
 0x396   : > { %v3994_v47 = vpop.f32.mrf.mxu1  ;;  %v6563_v29 = vadd.f32 %v9273_v45, %v9269_v23  ;;  %v9849_v45 = vld [vmem:[#allocation23_spill] sm:$0xff] }
 0x397   : > { %v9323_v60 = vpack.c.bf16 %v4296_v26, %v4295_v63  ;;  %v4294_v7 = vmax.f32 %v4262_v57, 0.0  ;;  %v3995_v49 = vadd.f32 %v3994_v47, %v9162_v44  ;;  %v4267_v13 = vadd.f32 %v9236_v18, %v4003_v38  ;;  %v9852_v26 = vld [vmem:[#allocation14_spill] sm:$0xff] }
 0x398   : > { %v6851_v34 = vpop.f32.mrf.mxu1  ;;  %v3858_v44 = vadd.f32 %v6551_v0, %v9194_v5  ;;  %v6463_v32 = vadd.f32 %v9850_v50, %v9849_v45  ;;  %v9853_v0 = vld [vmem:[#allocation19_spill] sm:$0xff]  ;;  %v9866_v50 = vld [vmem:[#allocation10_spill] sm:$0xff] }
 0x399   : > { %v9326_v31 = vpack.c.bf16 %v4294_v7, %v4293_v6  ;;  %v4006_v62 = vadd.f32 %v6851_v34, %v9179_v56  ;;  %v4265_v28 = vadd.f32 %v9260_v52, %v3995_v49  ;;  %v4299_v18 = vmax.f32 %v4267_v13, 0.0  ;;  %v9854_v6 = vld [vmem:[#allocation29_spill] sm:$0xff]  ;;  %v9855_v7 = vld [vmem:[#allocation30_spill] sm:$0xff]  ;;  %v9856_v13 = vld [vmem:[#allocation15_spill] sm:$0xff] }
 0x39a   : > { %v3997_v41 = vpop.f32.mrf.mxu1  ;;  %v3861_v52 = vadd.f32 %v6554_v54, %v9201_v42  ;;  %v6566_v42 = vadd.f32 %v9287_v14, %v9282_v51  ;;  %v3874_v47 = vadd.f32 %v6563_v29, %v9853_v0  ;;  %v6560_v49 = vadd.f32 %v9855_v7, %v9854_v6  ;;  %v9857_v14 = vld [vmem:[#allocation18_spill] sm:$0xff]  ;;  %v9868_v0 = vld [vmem:[#allocation9_spill] sm:$0xff] }
 0x39b   : > { %v4268_v27 = vadd.f32 %v9241_v61, %v4006_v62  ;;  %v3998_v55 = vadd.f32 %v3997_v41, %v9169_v58  ;;  %v6574_v61 = vpop.f32.mrf.mxu0  ;;  %v4297_v53 = vmax.f32 %v4265_v28, 0.0  ;;  %v3866_v62 = vadd.f32 %v6557_v10, %v9856_v13 }
 0x39c   : > { %v6854_v39 = vpop.f32.mrf.mxu1 }
 0x39d   : > { %v4300_v22 = vmax.f32 %v4268_v27, 0.0  ;;  %v4266_v56 = vadd.f32 %v9263_v59, %v3998_v55  ;;  %v4019_v33 = vadd.f32 %v6854_v39, %v3858_v44  ;;  %v6576_v19 = vpop.f32.mrf.mxu0  ;;  %v9858_v27 = vld [vmem:[#allocation7_spill] sm:$0xff]  ;;  %v6575_v44 = vadd.f32 %v6574_v61, %v6573_v20  ;;  %v9860_v39 = vld [vmem:[#allocation28_spill] sm:$0xff] }
 0x39e   : > { %v4010_v2 = vpop.f32.mrf.mxu1  ;;  %v3729_v55 = vadd.f32 %v6463_v32, %v9858_v27 }
 0x39f   : > { %v4298_v58 = vmax.f32 %v4266_v56, 0.0  ;;  %v4011_v5 = vadd.f32 %v4010_v2, %v9184_v8  ;;  %v9343_v3 = vpack.c.bf16 %v4300_v22, %v4299_v18  ;;  %v4271_v59 = vadd.f32 %v9847_v35, %v4019_v33  ;;  %v9861_v56 = vld [vmem:[#allocation20_spill] sm:$0xff]  ;;  %v6577_v29 = vpop.f32.mrf.mxu0  ;;  %v9863_v35 = vld [vmem:[#allocation17_spill] sm:$0xff] }
 0x3a0   : > { %v6855_v25 = vpop.f32.mrf.mxu1  ;;  %v6466_v18 = vadd.f32 %v9860_v39, %v9859_v11  ;;  %v3877_v33 = vadd.f32 %v6566_v42, %v9861_v56  ;;  %v3869_v20 = vadd.f32 %v6560_v49, %v9863_v35  ;;  %v6578_v15 = vadd.f32 %v6577_v29, %v6576_v19  ;;  %v9865_v42 = vld [vmem:[#allocation5_spill] sm:$0xff]  ;;  %v9872_v11 = vld [vmem:[#allocation11_spill] sm:$0xff] }
 0x3a1   : > { %v4022_v36 = vadd.f32 %v6855_v25, %v3861_v52  ;;  %v9349_v23 = vpack.c.bf16 %v4298_v58, %v4297_v53  ;;  %v4269_v63 = vadd.f32 %v9851_v16, %v4011_v5  ;;  %v4303_v54 = vmax.f32 %v4271_v59, 0.0  ;;  %v9864_v59 = vld [vmem:[#allocation8_spill] sm:$0xff]  ;;  %v7268_v35 = vld [vmem:[%s9776_s8 + $0x84] ss:$8 sps:$4 sm:$0xff]  }
 0x3a2   : > { %v4013_v8 = vpop.f32.mrf.mxu1  ;;  %v6569_v5 = vadd.f32 %v9303_v17, %v9296_v24  ;;  %v3890_v16 = vadd.f32 %v6575_v44, %v3729_v55  ;;  %v6572_v24 = vadd.f32 %v9321_v37, %v9312_v43  ;;  %v9871_v55 = vld [vmem:[#allocation12_spill] sm:$0xff] }
 0x3a3   : > { %v4272_v57 = vadd.f32 %v9852_v26, %v4022_v36  ;;  %v4014_v38 = vadd.f32 %v4013_v8, %v3853_v1  ;;  %v4301_v2 = vmax.f32 %v4269_v63, 0.0  ;;  %v3732_v36 = vadd.f32 %v6466_v18, %v9864_v59  ;;  %v9867_v63 = vld [vmem:[#allocation21_spill] sm:$0xff] }
 0x3a4   : > { %v6858_v34 = vpop.f32.mrf.mxu1  ;;  %v3882_v26 = vadd.f32 %v6569_v5, %v9867_v63  ;;  %v7269_v59 = vld [vmem:[%s9776_s8 + $0x90] ss:$8 sps:$4 sm:$0xff]   ;;  %v7289_v63 = vld [vmem:[%s9776_s8 + $0xf4] ss:$8 sps:$4 sm:$0xff]  }
 0x3a5   : > { %v4304_v51 = vmax.f32 %v4272_v57, 0.0  ;;  %v4270_v41 = vadd.f32 %v9857_v14, %v4014_v38  ;;  %v4035_v28 = vadd.f32 %v6858_v34, %v3874_v47  ;;  %v3893_v19 = vadd.f32 %v6578_v15, %v3732_v36  ;;  %v7274_v36 = vld [vmem:[%s9776_s8 + $0xa4] ss:$8 sps:$4 sm:$0xff]   ;;  %v7272_v15 = vld [vmem:[%s9776_s8 + $0xa0] ss:$8 sps:$4 sm:$0xff]  }
 0x3a6   : > { %v4026_v22 = vpop.f32.mrf.mxu1 }
 0x3a7   : > { %v4302_v52 = vmax.f32 %v4270_v41, 0.0  ;;  %v4027_v53 = vadd.f32 %v4026_v22, %v3866_v62  ;;  %v4356_v58 = vpack.c.bf16 %v4304_v51, %v4303_v54  ;;  %v4275_v10 = vadd.f32 %v9862_v46, %v4035_v28  ;;  %v9869_v51 = vld [vmem:[#allocation2_spill] sm:$0xff]  ;;  %v9870_v28 = vld [vmem:[#allocation24_spill] sm:$0xff] }
 0x3a8   : > { %v6859_v30 = vpop.f32.mrf.mxu1  ;;  %v3885_v43 = vadd.f32 %v6572_v24, %v9870_v28  ;;  %v7260_v46 = vld [vmem:[%s9776_s8 + $0x60] ss:$8 sps:$4 sm:$0xff]   ;;  %v9476_v24 = vpop.permute.xlu0 %4545 }
 0x3a9   : > { %v4038_v25 = vadd.f32 %v6859_v30, %v3877_v33  ;;  %v4355_v61 = vpack.c.bf16 %v4302_v52, %v4301_v2  ;;  %v4273_v45 = vadd.f32 %v9865_v42, %v4027_v53  ;;  %v4307_v57 = vmax.f32 %v4275_v10, 0.0  ;;  %v9873_v33 = vld [vmem:[#allocation3_spill] sm:$0xff]  ;;  %v7265_v10 = vld [vmem:[%s9776_s8 + $0x74] ss:$8 sps:$4 sm:$0xff]   ;;  %v7275_v42 = vld [vmem:[%s9776_s8 + $0xb0] ss:$8 sps:$4 sm:$0xff]  }
 0x3aa   : > { %v4029_v1 = vpop.f32.mrf.mxu1  ;;  %v7262_v30 = vld [vmem:[%s9776_s8 + $0x64] ss:$8 sps:$4 sm:$0xff]  }
 0x3ab   : > { %v4276_v32 = vadd.f32 %v9866_v50, %v4038_v25  ;;  %v4030_v8 = vadd.f32 %v4029_v1, %v3869_v20  ;;  %v4305_v49 = vmax.f32 %v4273_v45, 0.0  ;;  %v7263_v25 = vld [vmem:[%s9776_s8 + $0x70] ss:$8 sps:$4 sm:$0xff]   ;;  %v7266_v20 = vld [vmem:[%s9776_s8 + $0x80] ss:$8 sps:$4 sm:$0xff]  }
 0x3ac   : > { %v6862_v17 = vpop.f32.mrf.mxu1  ;;  %v7277_v1 = vld [vmem:[%s9776_s8 + $0xb4] ss:$8 sps:$4 sm:$0xff]   ;;  %v7280_v45 = vld [vmem:[%s9776_s8 + $0xc4] ss:$8 sps:$4 sm:$0xff]   ;;  %v7278_v50 = vld [vmem:[%s9776_s8 + $0xc0] ss:$8 sps:$4 sm:$0xff]  }
 0x3ad   : > { %v4308_v38 = vmax.f32 %v4276_v32, 0.0  ;;  %v4274_v47 = vadd.f32 %v9868_v0, %v4030_v8  ;;  %v4051_v6 = vadd.f32 %v6862_v17, %v3890_v16  ;;  %v7283_v32 = vld [vmem:[%s9776_s8 + $0xd4] ss:$8 sps:$4 sm:$0xff]   ;;  %v7281_v8 = vld [vmem:[%s9776_s8 + $0xd0] ss:$8 sps:$4 sm:$0xff]  }
 0x3ae   : > { %v4042_v7 = vpop.f32.mrf.mxu1  ;;  %v7286_v16 = vld [vmem:[%s9776_s8 + $0xe4] ss:$8 sps:$4 sm:$0xff]   ;;  %v7284_v17 = vld [vmem:[%s9776_s8 + $0xe0] ss:$8 sps:$4 sm:$0xff]   ;;  %v7287_v0 = vld [vmem:[%s9776_s8 + $0xf0] ss:$8 sps:$4 sm:$0xff]  }
 0x3af   : > { %v4306_v34 = vmax.f32 %v4274_v47, 0.0  ;;  %v4043_v13 = vadd.f32 %v4042_v7, %v3882_v26  ;;  %v4358_v62 = vpack.c.bf16 %v4308_v38, %v4307_v57  ;;  %v4279_v14 = vadd.f32 %v9869_v51, %v4051_v6  ;;  %v9484_v26 = vpop.permute.xlu1 %4550  ;;  %v9486_v57 = vpop.permute.xlu0 %4465 }
 0x3b0   : > { %v6863_v54 = vpop.f32.mrf.mxu1 }
 0x3b1   : > { %v4054_v41 = vadd.f32 %v6863_v54, %v3893_v19  ;;  %v4357_v37 = vpack.c.bf16 %v4306_v34, %v4305_v49  ;;  %v4277_v44 = vadd.f32 %v9871_v55, %v4043_v13  ;;  %v4311_v22 = vmax.f32 %v4279_v14, 0.0 }
 0x3b2   : > { %v4045_v27 = vpop.f32.mrf.mxu1 }
 0x3b3   : > { %v4280_v39 = vadd.f32 %v9872_v11, %v4054_v41  ;;  %v4046_v18 = vadd.f32 %v4045_v27, %v3885_v43  ;;  %v4309_v2 = vmax.f32 %v4277_v44, 0.0  ;;  %v9488_v38 = vpop.permute.xlu1 %4470  ;;  %v9493_v47 = vpop.permute.xlu0 %4535 }
 0x3b5   : > { %v4312_v56 = vmax.f32 %v4280_v39, 0.0  ;;  %v4278_v29 = vadd.f32 %v9873_v33, %v4046_v18 }
 0x3b7   : > { %v4310_v52 = vmax.f32 %v4278_v29, 0.0  ;;  %v4360_v53 = vpack.c.bf16 %v4312_v56, %v4311_v22  ;;  %v9495_v6 = vpop.permute.xlu1 %4540  ;;  %v9497_v7 = vpop.permute.xlu0 %4455 }
 0x3b9   : > { %6599 = vmatprep.subr.bf16.mxu0 %v4360_v53  ;;  %v4359_v5 = vpack.c.bf16 %v4310_v52, %v4309_v2 }
 0x3ba   : > { %6600 = vmatpush3.bf16.msra.mxu0 %v9323_v60  ;;  %v7242_v60 = vld [vmem:[%s9776_s8] ss:$8 sps:$4 sm:$0xff]  }
 0x3bb   : > { %6601 = vmatprep.subr.bf16.mxu0 %v4359_v5  ;;  %v9499_v19 = vpop.permute.xlu1 %4460  ;;  %v9501_v49 = vpop.permute.xlu0 %4525 }
 0x3be   : > { %6602 = vmatpush3.bf16.msra.mxu0 %v9326_v31  ;;  %v7256_v31 = vld [vmem:[%s9776_s8 + $0x44] ss:$8 sps:$4 sm:$0xff]  }
 0x3bf   : > { %6603 = vmatprep.subr.bf16.mxu0 %v4358_v62  ;;  %v9503_v34 = vpop.permute.xlu1 %4530  ;;  %v9505_v13 = vpop.permute.xlu0 %4445 }
 0x3c2   : > { %6604 = vmatpush3.bf16.msra.mxu0 %v9305_v40  ;;  %v7247_v40 = vld [vmem:[%s9776_s8 + $0x14] ss:$8 sps:$4 sm:$0xff]  }
 0x3c3   : > { %6605 = vmatprep.subr.bf16.mxu0 %v4357_v37  ;;  %v9507_v62 = vpop.permute.xlu1 %4450  ;;  %v9509_v54 = vpop.permute.xlu0 %4515 }
 0x3c6   : > { %6606 = vmatpush3.bf16.msra.mxu0 %v9308_v12  ;;  %v7251_v12 = vld [vmem:[%s9776_s8 + $0x30] ss:$8 sps:$4 sm:$0xff]  }
 0x3c7   : > { %6607 = vmatprep.subr.bf16.mxu0 %v4356_v58  ;;  %v7257_v58 = vld [vmem:[%s9776_s8 + $0x50] ss:$8 sps:$4 sm:$0xff]   ;;  %v9511_v51 = vpop.permute.xlu1 %4520  ;;  %v9513_v14 = vpop.permute.xlu0 %4435 }
 0x3ca   : > { %6608 = vmatpush3.bf16.msra.mxu0 %v9289_v21  ;;  %v7245_v21 = vld [vmem:[%s9776_s8 + $0x10] ss:$8 sps:$4 sm:$0xff]  }
 0x3cb   : > { %6609 = vmatprep.subr.bf16.mxu0 %v4355_v61  ;;  %v7271_v61 = vld [vmem:[%s9776_s8 + $0x94] ss:$8 sps:$4 sm:$0xff]   ;;  %v9515_v41 = vpop.permute.xlu1 %4440  ;;  %v9517_v28 = vpop.permute.xlu0 %4505 }
 0x3ce   : > { %6610 = vmatpush3.bf16.msra.mxu0 %v9292_v4  ;;  %v7253_v4 = vld [vmem:[%s9776_s8 + $0x34] ss:$8 sps:$4 sm:$0xff]  }
 0x3cf   : > { %6611 = vmatprep.subr.bf16.mxu0 %v9343_v3  ;;  %v7254_v3 = vld [vmem:[%s9776_s8 + $0x40] ss:$8 sps:$4 sm:$0xff]   ;;  %v9519_v43 = vpop.permute.xlu1 %4510  ;;  %v4426_v37 = vpop.permute.xlu0 %4425 }
 0x3d2   : > { %6612 = vmatpush3.bf16.msra.mxu0 %v9275_v48  ;;  %v7250_v48 = vld [vmem:[%s9776_s8 + $0x24] ss:$8 sps:$4 sm:$0xff]  }
 0x3d3   : > { %6613 = vmatprep.subr.bf16.mxu0 %v9349_v23  ;;  %v7259_v23 = vld [vmem:[%s9776_s8 + $0x54] ss:$8 sps:$4 sm:$0xff]   ;;  %v4431_v27 = vpop.permute.xlu1 %4430  ;;  %v9521_v55 = vpop.permute.xlu0 %4495 }
 0x3d6   : > { %6614 = vmatpush3.bf16.msra.mxu0 %v9278_v9  ;;  %v7248_v9 = vld [vmem:[%s9776_s8 + $0x20] ss:$8 sps:$4 sm:$0xff]  }
 0x3d7   : > { %v9523_v44 = vpop.permute.xlu1 %4500  ;;  %v4416_v11 = vpop.permute.xlu0 %4415 }
 0x3d9   : > { %4746 = vmatmul.mubr.bf16.vlgmr.msra.gmra.mxu0 %v7242_v60 }
 0x3da   : > { %4753 = vmatprep.mubr.bf16.mxu0 %v7247_v40 }
 0x3db   : > { %v4421_v39 = vpop.permute.xlu1 %4420  ;;  %v9525_v18 = vpop.permute.xlu0 %4485 }
 0x3df   : > { %v9527_v22 = vpop.permute.xlu1 %4490  ;;  %v4406_v56 = vpop.permute.xlu0 %4405 }
 0x3e1   : > { %4754 = vmatmul.mubr.bf16.gmra.mxu0 %v7245_v21 }
 0x3e2   : > { %4761 = vmatprep.mubr.bf16.mxu0 %v7250_v48 }
 0x3e3   : > { %v4411_v33 = vpop.permute.xlu1 %4410  ;;  %v9529_v29 = vpop.permute.xlu0 %4475 }
 0x3e7   : > { %v9531_v52 = vpop.permute.xlu1 %4480  ;;  %v4396_v40 = vpop.permute.xlu0 %4395 }
 0x3e9   : > { %4762 = vmatmul.mubr.bf16.gmra.mxu0 %v7248_v9 }
 0x3ea   : > { %4769 = vmatprep.mubr.bf16.mxu0 %v7253_v4 }
 0x3eb   : > { %v4401_v4 = vpop.permute.xlu1 %4400 }
 0x3f1   : > { %4770 = vmatmul.mubr.bf16.gmra.mxu0 %v7251_v12 }
 0x3f2   : > { %4777 = vmatprep.mubr.bf16.mxu0 %v7256_v31 }
 0x3f9   : > { %4778 = vmatmul.mubr.bf16.gmra.mxu0 %v7254_v3 }
 0x3fa   : > { %4785 = vmatprep.mubr.bf16.mxu0 %v7259_v23 }
 0x401   : > { %4786 = vmatmul.mubr.bf16.gmra.mxu0 %v7257_v58 }
 0x402   : > { %4793 = vmatprep.mubr.bf16.mxu0 %v7262_v30 }
 0x409   : > { %4794 = vmatmul.mubr.bf16.gmra.mxu0 %v7260_v46 }
 0x40a   : > { %4801 = vmatprep.mubr.bf16.mxu0 %v7265_v10 }
 0x411   : > { %4802 = vmatmul.mubr.bf16.gmra.mxu0 %v7263_v25 }
 0x412   : > { %4809 = vmatprep.mubr.bf16.mxu0 %v7268_v35 }
 0x419   : > { %4810 = vmatmul.mubr.bf16.gmra.mxu0 %v7266_v20 }
 0x41a   : > { %4817 = vmatprep.mubr.bf16.mxu0 %v7271_v61 }
 0x421   : > { %4818 = vmatmul.mubr.bf16.gmra.mxu0 %v7269_v59 }
 0x422   : > { %4825 = vmatprep.mubr.bf16.mxu0 %v7274_v36 }
 0x429   : > { %4826 = vmatmul.mubr.bf16.gmra.mxu0 %v7272_v15 }
 0x42a   : > { %4833 = vmatprep.mubr.bf16.mxu0 %v7277_v1 }
 0x431   : > { %4834 = vmatmul.mubr.bf16.gmra.mxu0 %v7275_v42 }
 0x432   : > { %4841 = vmatprep.mubr.bf16.mxu0 %v7280_v45 }
 0x439   : > { %4842 = vmatmul.mubr.bf16.gmra.mxu0 %v7278_v50 }
 0x43a   : > { %4849 = vmatprep.mubr.bf16.mxu0 %v7283_v32 }
 0x441   : > { %4850 = vmatmul.mubr.bf16.gmra.mxu0 %v7281_v8 }
 0x442   : > { %4857 = vmatprep.mubr.bf16.mxu0 %v7286_v16 }
 0x449   : > { %4858 = vmatmul.mubr.bf16.gmra.mxu0 %v7284_v17 }
 0x44a   : > { %4865 = vmatprep.mubr.bf16.mxu0 %v7289_v63 }
 0x451   : > { %4866 = vmatmul.mubr.bf16.gmra.mxu0 %v7287_v0 }
 0x499   : > { %v6615_v2 = vpop.f32.mrf.mxu0 }
 0x49b   : > { %v6616_v53 = vpop.f32.mrf.mxu0 }
 0x49c   : > { %v6617_v5 = vadd.f32 %v6616_v53, %v6615_v2 }
 0x49d   : > { %v6618_v60 = vpop.f32.mrf.mxu0 }
 0x49e   : > { %v4748_v48 = vadd.f32 %v6617_v5, %v4396_v40 }
 0x49f   : > { %v6619_v21 = vpop.f32.mrf.mxu0 }
 0x4a0   : > { %v6620_v9 = vadd.f32 %v6619_v21, %v6618_v60  ;;  %v4874_v23 = vmax.f32 %v4748_v48, 0.0 }
 0x4a1   : > { %v6621_v12 = vpop.f32.mrf.mxu0 }
 0x4a2   : > { %v4751_v31 = vadd.f32 %v6620_v9, %v4401_v4 }
 0x4a3   : > { %v6622_v3 = vpop.f32.mrf.mxu0 }
 0x4a4   : > { %v4875_v58 = vmax.f32 %v4751_v31, 0.0  ;;  %v6623_v30 = vadd.f32 %v6622_v3, %v6621_v12 }
 0x4a5   : > { %v6624_v46 = vpop.f32.mrf.mxu0 }
 0x4a6   : > { %v9533_v10 = vpack.c.bf16 %v4875_v58, %v4874_v23  ;;  %v4756_v35 = vadd.f32 %v6623_v30, %v4406_v56 }
 0x4a7   : > { %v6625_v25 = vpop.f32.mrf.mxu0 }
 0x4a8   : > { %v6626_v20 = vadd.f32 %v6625_v25, %v6624_v46  ;;  %v4876_v15 = vmax.f32 %v4756_v35, 0.0 }
 0x4a9   : > { %v6627_v61 = vpop.f32.mrf.mxu0 }
 0x4aa   : > { %v4759_v59 = vadd.f32 %v6626_v20, %v4411_v33 }
 0x4ab   : > { %v6628_v36 = vpop.f32.mrf.mxu0 }
 0x4ac   : > { %v4877_v1 = vmax.f32 %v4759_v59, 0.0  ;;  %v6629_v42 = vadd.f32 %v6628_v36, %v6627_v61 }
 0x4ad   : > { %v6630_v45 = vpop.f32.mrf.mxu0 }
 0x4ae   : > { %v9535_v50 = vpack.c.bf16 %v4877_v1, %v4876_v15  ;;  %v4764_v8 = vadd.f32 %v6629_v42, %v4416_v11 }
 0x4af   : > { %v6631_v32 = vpop.f32.mrf.mxu0 }
 0x4b0   : > { %v6632_v16 = vadd.f32 %v6631_v32, %v6630_v45  ;;  %v4878_v2 = vmax.f32 %v4764_v8, 0.0 }
 0x4b1   : > { %v6633_v17 = vpop.f32.mrf.mxu0 }
 0x4b2   : > { %v4767_v63 = vadd.f32 %v6632_v16, %v4421_v39  ;;  %v7292_v39 = vld [vmem:[%s9778_s10 + $0x4] ss:$8 sps:$4 sm:$0xff]  }
 0x4b3   : > { %v6634_v0 = vpop.f32.mrf.mxu0  ;;  %5146 = vmatprep.mubr.bf16.mxu1 %v7292_v39 }
 0x4b4   : > { %v4879_v53 = vmax.f32 %v4767_v63, 0.0  ;;  %v6635_v5 = vadd.f32 %v6634_v0, %v6633_v17 }
 0x4b5   : > { %v6636_v56 = vpop.f32.mrf.mxu0 }
 0x4b6   : > { %v9537_v60 = vpack.c.bf16 %v4879_v53, %v4878_v2  ;;  %v4772_v40 = vadd.f32 %v6635_v5, %v4426_v37 }
 0x4b7   : > { %v6637_v33 = vpop.f32.mrf.mxu0 }
 0x4b8   : > { %v6638_v21 = vadd.f32 %v6637_v33, %v6636_v56  ;;  %v4880_v12 = vmax.f32 %v4772_v40, 0.0 }
 0x4b9   : > { %v6639_v48 = vpop.f32.mrf.mxu0 }
 0x4ba   : > { %v4775_v9 = vadd.f32 %v6638_v21, %v4431_v27 }
 0x4bb   : > { %v6640_v4 = vpop.f32.mrf.mxu0 }
 0x4bc   : > { %v4881_v31 = vmax.f32 %v4775_v9, 0.0  ;;  %v6641_v3 = vadd.f32 %v6640_v4, %v6639_v48 }
 0x4bd   : > { %v6642_v11 = vpop.f32.mrf.mxu0 }
 0x4be   : > { %v9542_v23 = vpack.c.bf16 %v4881_v31, %v4880_v12  ;;  %v4780_v30 = vadd.f32 %v6641_v3, %v9513_v14 }
 0x4bf   : > { %v6643_v58 = vpop.f32.mrf.mxu0 }
 0x4c0   : > { %v6644_v46 = vadd.f32 %v6643_v58, %v6642_v11  ;;  %v4882_v35 = vmax.f32 %v4780_v30, 0.0 }
 0x4c1   : > { %v6645_v37 = vpop.f32.mrf.mxu0 }
 0x4c2   : > { %v4783_v25 = vadd.f32 %v6644_v46, %v9515_v41 }
 0x4c3   : > { %v6646_v27 = vpop.f32.mrf.mxu0 }
 0x4c4   : > { %v4883_v20 = vmax.f32 %v4783_v25, 0.0  ;;  %v6647_v61 = vadd.f32 %v6646_v27, %v6645_v37 }
 0x4c5   : > { %v6648_v59 = vpop.f32.mrf.mxu0 }
 0x4c6   : > { %v9546_v36 = vpack.c.bf16 %v4883_v20, %v4882_v35  ;;  %v4788_v1 = vadd.f32 %v6647_v61, %v9505_v13 }
 0x4c7   : > { %v6649_v15 = vpop.f32.mrf.mxu0 }
 0x4c8   : > { %v6650_v42 = vadd.f32 %v6649_v15, %v6648_v59  ;;  %v4884_v14 = vmax.f32 %v4788_v1, 0.0 }
 0x4c9   : > { %v6651_v45 = vpop.f32.mrf.mxu0 }
 0x4ca   : > { %v4791_v32 = vadd.f32 %v6650_v42, %v9507_v62 }
 0x4cb   : > { %v6652_v8 = vpop.f32.mrf.mxu0 }
 0x4cc   : > { %v4885_v16 = vmax.f32 %v4791_v32, 0.0  ;;  %v6653_v17 = vadd.f32 %v6652_v8, %v6651_v45 }
 0x4cd   : > { %v6654_v63 = vpop.f32.mrf.mxu0 }
 0x4ce   : > { %v9550_v41 = vpack.c.bf16 %v4885_v16, %v4884_v14  ;;  %v4796_v2 = vadd.f32 %v6653_v17, %v9497_v7 }
 0x4cf   : > { %v6655_v0 = vpop.f32.mrf.mxu0 }
 0x4d0   : > { %v6656_v53 = vadd.f32 %v6655_v0, %v6654_v63  ;;  %v4886_v13 = vmax.f32 %v4796_v2, 0.0 }
 0x4d1   : > { %v6657_v5 = vpop.f32.mrf.mxu0 }
 0x4d2   : > { %v4799_v56 = vadd.f32 %v6656_v53, %v9499_v19 }
 0x4d3   : > { %v6658_v33 = vpop.f32.mrf.mxu0 }
 0x4d4   : > { %v4887_v40 = vmax.f32 %v4799_v56, 0.0  ;;  %v6659_v21 = vadd.f32 %v6658_v33, %v6657_v5 }
 0x4d5   : > { %v6660_v48 = vpop.f32.mrf.mxu0 }
 0x4d6   : > { %v9554_v62 = vpack.c.bf16 %v4887_v40, %v4886_v13  ;;  %v4804_v4 = vadd.f32 %v6659_v21, %v9486_v57 }
 0x4d7   : > { %v6661_v9 = vpop.f32.mrf.mxu0 }
 0x4d8   : > { %v6662_v12 = vadd.f32 %v6661_v9, %v6660_v48  ;;  %v4888_v7 = vmax.f32 %v4804_v4, 0.0 }
 0x4d9   : > { %v6663_v31 = vpop.f32.mrf.mxu0 }
 0x4da   : > { %v4807_v3 = vadd.f32 %v6662_v12, %v9488_v38 }
 0x4db   : > { %v6664_v11 = vpop.f32.mrf.mxu0 }
 0x4dc   : > { %v4889_v39 = vmax.f32 %v4807_v3, 0.0  ;;  %v6665_v58 = vadd.f32 %v6664_v11, %v6663_v31 }
 0x4dd   : > { %v6666_v30 = vpop.f32.mrf.mxu0 }
 0x4de   : > { %v9558_v19 = vpack.c.bf16 %v4889_v39, %v4888_v7  ;;  %v4812_v37 = vadd.f32 %v6665_v58, %v9529_v29 }
 0x4df   : > { %v6667_v46 = vpop.f32.mrf.mxu0 }
 0x4e0   : > { %v6668_v25 = vadd.f32 %v6667_v46, %v6666_v30  ;;  %v4890_v57 = vmax.f32 %v4812_v37, 0.0 }
 0x4e1   : > { %v6669_v27 = vpop.f32.mrf.mxu0 }
 0x4e2   : > { %v4815_v35 = vadd.f32 %v6668_v25, %v9531_v52 }
 0x4e3   : > { %v6670_v20 = vpop.f32.mrf.mxu0 }
 0x4e4   : > { %v4891_v61 = vmax.f32 %v4815_v35, 0.0  ;;  %v6671_v59 = vadd.f32 %v6670_v20, %v6669_v27 }
 0x4e5   : > { %v6672_v15 = vpop.f32.mrf.mxu0 }
 0x4e6   : > { %v9562_v38 = vpack.c.bf16 %v4891_v61, %v4890_v57  ;;  %v4820_v42 = vadd.f32 %v6671_v59, %v9525_v18 }
 0x4e7   : > { %v6673_v1 = vpop.f32.mrf.mxu0 }
 0x4e8   : > { %v6674_v45 = vadd.f32 %v6673_v1, %v6672_v15  ;;  %v4892_v29 = vmax.f32 %v4820_v42, 0.0 }
 0x4e9   : > { %v6675_v32 = vpop.f32.mrf.mxu0 }
 0x4ea   : > { %v4823_v8 = vadd.f32 %v6674_v45, %v9527_v22 }
 0x4eb   : > { %v6676_v14 = vpop.f32.mrf.mxu0 }
 0x4ec   : > { %v4893_v16 = vmax.f32 %v4823_v8, 0.0 }
 0x4ed   : > { %v6678_v17 = vpop.f32.mrf.mxu0 }
 0x4ee   : > { %v9566_v63 = vpack.c.bf16 %v4893_v16, %v4892_v29 }
 0x4ef   : > { %v6679_v52 = vpop.f32.mrf.mxu0 }
 0x4f1   : > { %v6681_v0 = vpop.f32.mrf.mxu0 }
 0x4f3   : > { %v6682_v2 = vpop.f32.mrf.mxu0 }
 0x4f5   : > { %v6684_v53 = vpop.f32.mrf.mxu0 }
 0x4f7   : > { %v6685_v5 = vpop.f32.mrf.mxu0 }
 0x4f9   : > { %v6687_v56 = vpop.f32.mrf.mxu0 }
 0x4fb   : > { %v6688_v33 = vpop.f32.mrf.mxu0 }
 0x4fc   : > { %v6689_v8 = vadd.f32 %v6688_v33, %v6687_v56 }
 0x4fd   : > { %v6690_v13 = vpop.f32.mrf.mxu0 }
 0x4ff   : > { %v6691_v40 = vpop.f32.mrf.mxu0 }
 0x500   : > { %v6692_v59 = vadd.f32 %v6691_v40, %v6690_v13  ;;  %v6680_v13 = vadd.f32 %v6679_v52, %v6678_v17 }
 0x501   : > { %v6693_v18 = vpop.f32.mrf.mxu0 }
 0x502   : > { %v4831_v40 = vadd.f32 %v6680_v13, %v9523_v44  ;;  %v7293_v44 = vld [vmem:[%s9778_s10 + $0x10] ss:$8 sps:$4 sm:$0xff]  }
 0x503   : > { %v6694_v21 = vpop.f32.mrf.mxu0 }
 0x504   : > { %v6695_v20 = vadd.f32 %v6694_v21, %v6693_v18  ;;  %v7313_v21 = vld [vmem:[%s9778_s10 + $0x74] ss:$8 sps:$4 sm:$0xff]  }
 0x505   : > { %v6696_v48 = vpop.f32.mrf.mxu0 }
 0x506   : > { %v4852_v29 = vadd.f32 %v6695_v20, %v9501_v49 }
 0x507   : > { %v6697_v9 = vpop.f32.mrf.mxu0 }
 0x508   : > { %v6698_v37 = vadd.f32 %v6697_v9, %v6696_v48 }
 0x509   : > { %v6699_v22 = vpop.f32.mrf.mxu0 }
 0x50a   : > { %v4855_v15 = vadd.f32 %v6698_v37, %v9503_v34  ;;  %v4900_v34 = vmax.f32 %v4852_v29, 0.0 }
 0x50b   : > { %v6700_v4 = vpop.f32.mrf.mxu0 }
 0x50c   : > { %v6701_v30 = vadd.f32 %v6700_v4, %v6699_v22  ;;  %v4901_v9 = vmax.f32 %v4855_v15, 0.0  ;;  %v7311_v22 = vld [vmem:[%s9778_s10 + $0x70] ss:$8 sps:$4 sm:$0xff]   ;;  %v7345_v4 = vmov 0.0  }
 0x50d   : > { %v6702_v12 = vpop.f32.mrf.mxu0 }
 0x50e   : > { %v4860_v57 = vadd.f32 %v6701_v30, %v9493_v47  ;;  %v4844_v47 = vadd.f32 %v6689_v8, %v9509_v54  ;;  %v4935_v49 = vpack.c.bf16 %v4901_v9, %v4900_v34 }
 0x50f   : > { %v6703_v31 = vpop.f32.mrf.mxu0 }
 0x510   : > { %v6704_v7 = vadd.f32 %v6703_v31, %v6702_v12  ;;  %v4902_v16 = vmax.f32 %v4860_v57, 0.0  ;;  %v9636_v12 = vpop.permute.xlu0 %5026  ;;  %v9638_v31 = vpop.permute.xlu1 %5031 }
 0x511   : > { %v6705_v3 = vpop.f32.mrf.mxu0 }
 0x512   : > { %v4863_v25 = vadd.f32 %v6704_v7, %v9495_v6  ;;  %v6686_v6 = vadd.f32 %v6685_v5, %v6684_v53  ;;  %v6677_v53 = vadd.f32 %v6676_v14, %v6675_v32  ;;  %v4898_v5 = vmax.f32 %v4844_v47, 0.0  ;;  %v7305_v14 = vld [vmem:[%s9778_s10 + $0x50] ss:$8 sps:$4 sm:$0xff]  }
 0x513   : > { %v6706_v11 = vpop.f32.mrf.mxu0 }
 0x514   : > { %v6707_v39 = vadd.f32 %v6706_v11, %v6705_v3  ;;  %v4903_v1 = vmax.f32 %v4863_v25, 0.0  ;;  %v4839_v56 = vadd.f32 %v6686_v6, %v9519_v43  ;;  %v4828_v54 = vadd.f32 %v6677_v53, %v9521_v55  ;;  %v7295_v55 = vld [vmem:[%s9778_s10 + $0x14] ss:$8 sps:$4 sm:$0xff]   ;;  %v9640_v3 = vpop.permute.xlu0 %5016  ;;  %v9642_v11 = vpop.permute.xlu1 %5021 }
 0x515   : > { %v6708_v58 = vpop.f32.mrf.mxu0  ;;  %v4895_v43 = vmax.f32 %v4831_v40, 0.0 }
 0x516   : > { %v4868_v27 = vadd.f32 %v6707_v39, %v9476_v24  ;;  %v4847_v24 = vadd.f32 %v6692_v59, %v9511_v51  ;;  %v4936_v18 = vpack.c.bf16 %v4903_v1, %v4902_v16 }
 0x517   : > { %v6709_v46 = vpop.f32.mrf.mxu0 }
 0x518   : > { %v6710_v35 = vadd.f32 %v6709_v46, %v6708_v58  ;;  %v4904_v42 = vmax.f32 %v4868_v27, 0.0  ;;  %v4899_v33 = vmax.f32 %v4847_v24, 0.0  ;;  %v9645_v7 = vpop.permute.xlu0 %5006  ;;  %v9647_v39 = vpop.permute.xlu1 %5011 }
 0x51a   : > { %v4871_v61 = vadd.f32 %v6710_v35, %v9484_v26  ;;  %v6683_v26 = vadd.f32 %v6682_v2, %v6681_v0  ;;  %v4934_v0 = vpack.c.bf16 %v4899_v33, %v4898_v5  ;;  %v7308_v2 = vld [vmem:[%s9778_s10 + $0x60] ss:$8 sps:$4 sm:$0xff]  }
 0x51c   : > { %v4905_v45 = vmax.f32 %v4871_v61, 0.0  ;;  %v4836_v51 = vadd.f32 %v6683_v26, %v9517_v28  ;;  %v7290_v28 = vld [vmem:[%s9778_s10] ss:$8 sps:$4 sm:$0xff]   ;;  %v9649_v58 = vpop.permute.xlu0 %4996  ;;  %v9651_v30 = vpop.permute.xlu1 %5001 }
 0x51e   : > { %v4937_v48 = vpack.c.bf16 %v4905_v45, %v4904_v42  ;;  %v4896_v17 = vmax.f32 %v4836_v51, 0.0 }
 0x520   : > { %6711 = vmatprep.subr.bf16.mxu1 %v4937_v48  ;;  %v4987_v46 = vpop.permute.xlu0 %4986  ;;  %v4992_v37 = vpop.permute.xlu1 %4991 }
 0x521   : > { %6712 = vmatpush3.bf16.msra.mxu1 %v9558_v19  ;;  %v4897_v19 = vmax.f32 %v4839_v56, 0.0 }
 0x522   : > { %6713 = vmatprep.subr.bf16.mxu1 %v4936_v18 }
 0x523   : > { %v4933_v52 = vpack.c.bf16 %v4897_v19, %v4896_v17 }
 0x524   : > { %v4977_v25 = vpop.permute.xlu0 %4976  ;;  %v4982_v27 = vpop.permute.xlu1 %4981 }
 0x525   : > { %6714 = vmatpush3.bf16.msra.mxu1 %v9554_v62  ;;  %v4894_v62 = vmax.f32 %v4828_v54, 0.0 }
 0x526   : > { %6715 = vmatprep.subr.bf16.mxu1 %v4935_v49 }
 0x527   : > { %v4932_v32 = vpack.c.bf16 %v4895_v43, %v4894_v62 }
 0x528   : > { %v4967_v35 = vpop.permute.xlu0 %4966  ;;  %v4972_v57 = vpop.permute.xlu1 %4971 }
 0x529   : > { %6716 = vmatpush3.bf16.msra.mxu1 %v9550_v41  ;;  %v7302_v41 = vld [vmem:[%s9778_s10 + $0x40] ss:$8 sps:$4 sm:$0xff]  }
 0x52a   : > { %6717 = vmatprep.subr.bf16.mxu1 %v4934_v0 }
 0x52c   : > { %v4957_v15 = vpop.permute.xlu0 %4956  ;;  %v4962_v16 = vpop.permute.xlu1 %4961 }
 0x52d   : > { %6718 = vmatpush3.bf16.msra.mxu1 %v9546_v36  ;;  %v7304_v36 = vld [vmem:[%s9778_s10 + $0x44] ss:$8 sps:$4 sm:$0xff]  }
 0x52e   : > { %6719 = vmatprep.subr.bf16.mxu1 %v4933_v52 }
 0x531   : > { %6720 = vmatpush3.bf16.msra.mxu1 %v9542_v23  ;;  %v7299_v23 = vld [vmem:[%s9778_s10 + $0x30] ss:$8 sps:$4 sm:$0xff]  }
 0x532   : > { %6721 = vmatprep.subr.bf16.mxu1 %v4932_v32 }
 0x535   : > { %6722 = vmatpush3.bf16.msra.mxu1 %v9537_v60  ;;  %v7301_v60 = vld [vmem:[%s9778_s10 + $0x34] ss:$8 sps:$4 sm:$0xff]  }
 0x536   : > { %6723 = vmatprep.subr.bf16.mxu1 %v9566_v63  ;;  %v7310_v63 = vld [vmem:[%s9778_s10 + $0x64] ss:$8 sps:$4 sm:$0xff]  }
 0x539   : > { %6724 = vmatpush3.bf16.msra.mxu1 %v9535_v50  ;;  %v7298_v50 = vld [vmem:[%s9778_s10 + $0x24] ss:$8 sps:$4 sm:$0xff]  }
 0x53a   : > { %6725 = vmatprep.subr.bf16.mxu1 %v9562_v38  ;;  %v7307_v38 = vld [vmem:[%s9778_s10 + $0x54] ss:$8 sps:$4 sm:$0xff]  }
 0x53d   : > { %6726 = vmatpush3.bf16.msra.mxu1 %v9533_v10  ;;  %v7296_v10 = vld [vmem:[%s9778_s10 + $0x20] ss:$8 sps:$4 sm:$0xff]  }
 0x53e   : > { %6864 = vmatprep.subr.bf16.mxu1 %v7345_v4 }
 0x540   : > { %5147 = vmatmul.mubr.bf16.vlgmr.msra.gmra.mxu1 %v7290_v28 }
 0x541   : > { %5154 = vmatprep.mubr.bf16.mxu1 %v7295_v55 }
 0x548   : > { %5155 = vmatmul.mubr.bf16.gmra.mxu1 %v7293_v44 }
 0x549   : > { %5162 = vmatprep.mubr.bf16.mxu1 %v7298_v50 }
 0x550   : > { %5163 = vmatmul.mubr.bf16.gmra.mxu1 %v7296_v10 }
 0x551   : > { %5170 = vmatprep.mubr.bf16.mxu1 %v7301_v60 }
 0x558   : > { %5171 = vmatmul.mubr.bf16.gmra.mxu1 %v7299_v23 }
 0x559   : > { %5178 = vmatprep.mubr.bf16.mxu1 %v7304_v36 }
 0x560   : > { %5179 = vmatmul.mubr.bf16.gmra.mxu1 %v7302_v41 }
 0x561   : > { %5186 = vmatprep.mubr.bf16.mxu1 %v7307_v38 }
 0x568   : > { %5187 = vmatmul.mubr.bf16.gmra.mxu1 %v7305_v14 }
 0x569   : > { %5194 = vmatprep.mubr.bf16.mxu1 %v7310_v63 }
 0x570   : > { %5195 = vmatmul.mubr.bf16.gmra.mxu1 %v7308_v2 }
 0x571   : > { %5202 = vmatprep.mubr.bf16.mxu1 %v7313_v21 }
 0x578   : > { %5203 = vmatmul.mubr.bf16.gmra.mxu1 %v7311_v22 }
 0x579   : > { %6880 = vmatprep.mubr.msk.bf16.mxu1 %vm7346_vm1, %v7345_v4 }
 0x600   : > { %v6727_v20 = vpop.f32.mrf.mxu1 }
 0x602   : > { %v6728_v61 = vpop.f32.mrf.mxu1 }
 0x603   : > { %v6729_v59 = vadd.f32 %v6728_v61, %v6727_v20 }
 0x604   : > { %v6730_v1 = vpop.f32.mrf.mxu1 }
 0x605   : > { %v5149_v42 = vadd.f32 %v6729_v59, %v4957_v15 }
 0x606   : > { %v6731_v45 = vpop.f32.mrf.mxu1 }
 0x607   : > { %v5211_v8 = vmax.f32 %v5149_v42, 0.0  ;;  %v6732_v29 = vadd.f32 %v6731_v45, %v6730_v1 }
 0x608   : > { %v6733_v48 = vpop.f32.mrf.mxu1 }
 0x609   : > { %5228 = vst.msk [vmem:[%s9657_s18] sm:$0xff] %vm5227_vm2, %v5211_v8  ;;  %v5152_v6 = vadd.f32 %v6732_v29, %v4962_v16 }
 0x60a   : > { %v6734_v24 = vpop.f32.mrf.mxu1 }
 0x60b   : > { %v5212_v9 = vmax.f32 %v5152_v6, 0.0  ;;  %v6735_v18 = vadd.f32 %v6734_v24, %v6733_v48 }
 0x60c   : > { %v6736_v26 = vpop.f32.mrf.mxu1 }
 0x60d   : > { %5229 = vst.msk [vmem:[%s9657_s18 + $0x8] sm:$0xff] %vm5227_vm2, %v5212_v9  ;;  %v9663_v47 = vpack.c.bf16 %v5212_v9, %v5211_v8  ;;  %v5157_v34 = vadd.f32 %v6735_v18, %v4967_v35 }
 0x60e   : > { %v6737_v13 = vpop.f32.mrf.mxu1 }
 0x60f   : > { %v5213_v56 = vmax.f32 %v5157_v34, 0.0  ;;  %v6738_v33 = vadd.f32 %v6737_v13, %v6736_v26 }
 0x610   : > { %v6739_v49 = vpop.f32.mrf.mxu1 }
 0x611   : > { %5230 = vst.msk [vmem:[%s9657_s18 + $0x10] sm:$0xff] %vm5227_vm2, %v5213_v56  ;;  %v5160_v53 = vadd.f32 %v6738_v33, %v4972_v57 }
 0x612   : > { %v6740_v51 = vpop.f32.mrf.mxu1 }
 0x613   : > { %v5214_v5 = vmax.f32 %v5160_v53, 0.0  ;;  %v6741_v40 = vadd.f32 %v6740_v51, %v6739_v49 }
 0x614   : > { %v6742_v19 = vpop.f32.mrf.mxu1 }
 0x615   : > { %5231 = vst.msk [vmem:[%s9657_s18 + $0x18] sm:$0xff] %vm5227_vm2, %v5214_v5  ;;  %v9669_v0 = vpack.c.bf16 %v5214_v5, %v5213_v56  ;;  %v9671_v54 = vadd.f32 %v6741_v40, %v4977_v25 }
 0x616   : > { %v6743_v17 = vpop.f32.mrf.mxu1 }
 0x617   : > { %v5215_v43 = vmax.f32 %v9671_v54, 0.0  ;;  %v6744_v52 = vadd.f32 %v6743_v17, %v6742_v19  ;;  %v5297_v54 = vpop.permute.xlu0 %5296 }
 0x618   : > { %v6745_v62 = vpop.f32.mrf.mxu1 }
 0x619   : > { %5232 = vst.msk [vmem:[%s9657_s18 + $0x20] sm:$0xff] %vm5227_vm2, %v5215_v43  ;;  %v9678_v32 = vadd.f32 %v6744_v52, %v4982_v27  ;;  %v5244_v52 = vld [vmem:[%s9780_s12] sm:$0xf] }
 0x61a   : > { %v6746_v28 = vpop.f32.mrf.mxu1 }
 0x61b   : > { %v5216_v55 = vmax.f32 %v9678_v32, 0.0  ;;  %v6747_v44 = vadd.f32 %v6746_v28, %v6745_v62 }
 0x61c   : > { %v6748_v50 = vpop.f32.mrf.mxu1 }
 0x61d   : > { %5233 = vst.msk [vmem:[%s9657_s18 + $0x28] sm:$0xff] %vm5227_vm2, %v5216_v55  ;;  %v9685_v10 = vadd.f32 %v6747_v44, %v4987_v46  ;;  %v5247_v17 = vpack.c.bf16 %v5216_v55, %v5215_v43 }
 0x61e   : > { %v6749_v60 = vpop.f32.mrf.mxu1 }
 0x61f   : > { %v5217_v23 = vmax.f32 %v9685_v10, 0.0  ;;  %v6750_v36 = vadd.f32 %v6749_v60, %v6748_v50 }
 0x620   : > { %v6751_v41 = vpop.f32.mrf.mxu1 }
 0x621   : > { %5234 = vst.msk [vmem:[%s9657_s18 + $0x30] sm:$0xff] %vm5227_vm2, %v5217_v23  ;;  %v9692_v38 = vadd.f32 %v6750_v36, %v4992_v37 }
 0x622   : > { %v6752_v14 = vpop.f32.mrf.mxu1 }
 0x623   : > { %v5218_v63 = vmax.f32 %v9692_v38, 0.0  ;;  %v6753_v2 = vadd.f32 %v6752_v14, %v6751_v41 }
 0x624   : > { %v6754_v21 = vpop.f32.mrf.mxu1 }
 0x625   : > { %5235 = vst.msk [vmem:[%s9657_s18 + $0x38] sm:$0xff] %vm5227_vm2, %v5218_v63  ;;  %v5181_v22 = vadd.f32 %v6753_v2, %v9649_v58 }
 0x626   : > { %v6755_v46 = vpop.f32.mrf.mxu1 }
 0x627   : > { %v5219_v25 = vmax.f32 %v5181_v22, 0.0  ;;  %v6756_v27 = vadd.f32 %v6755_v46, %v6754_v21 }
 0x628   : > { %v6757_v35 = vpop.f32.mrf.mxu1 }
 0x629   : > { %5236 = vst.msk [vmem:[%s9657_s18 + $0x40] sm:$0xff] %vm5227_vm2, %v5219_v25  ;;  %v5184_v37 = vadd.f32 %v6756_v27, %v9651_v30 }
 0x62a   : > { %v6758_v20 = vpop.f32.mrf.mxu1 }
 0x62b   : > { %v5220_v57 = vmax.f32 %v5184_v37, 0.0  ;;  %v6759_v61 = vadd.f32 %v6758_v20, %v6757_v35 }
 0x62c   : > { %v6760_v59 = vpop.f32.mrf.mxu1 }
 0x62d   : > { %5237 = vst.msk [vmem:[%s9657_s18 + $0x48] sm:$0xff] %vm5227_vm2, %v5220_v57  ;;  %v5189_v15 = vadd.f32 %v6759_v61, %v9645_v7 }
 0x62e   : > { %v6761_v1 = vpop.f32.mrf.mxu1 }
 0x62f   : > { %v5221_v58 = vmax.f32 %v5189_v15, 0.0  ;;  %v6762_v42 = vadd.f32 %v6761_v1, %v6760_v59 }
 0x630   : > { %v6763_v45 = vpop.f32.mrf.mxu1 }
 0x631   : > { %5238 = vst.msk [vmem:[%s9657_s18 + $0x50] sm:$0xff] %vm5227_vm2, %v5221_v58  ;;  %v5192_v8 = vadd.f32 %v6762_v42, %v9647_v39 }
 0x632   : > { %v6764_v29 = vpop.f32.mrf.mxu1 }
 0x633   : > { %v5222_v30 = vmax.f32 %v5192_v8, 0.0  ;;  %v6765_v16 = vadd.f32 %v6764_v29, %v6763_v45 }
 0x634   : > { %v6766_v48 = vpop.f32.mrf.mxu1 }
 0x635   : > { %5239 = vst.msk [vmem:[%s9657_s18 + $0x58] sm:$0xff] %vm5227_vm2, %v5222_v30  ;;  %v5197_v6 = vadd.f32 %v6765_v16, %v9640_v3  ;;  %v5250_v19 = vpack.c.bf16 %v5222_v30, %v5221_v58 }
 0x636   : > { %v6767_v7 = vpop.f32.mrf.mxu1 }
 0x637   : > { %v5223_v24 = vmax.f32 %v5197_v6, 0.0  ;;  %v6768_v9 = vadd.f32 %v6767_v7, %v6766_v48 }
 0x638   : > { %v6769_v18 = vpop.f32.mrf.mxu1 }
 0x639   : > { %5240 = vst.msk [vmem:[%s9657_s18 + $0x60] sm:$0xff] %vm5227_vm2, %v5223_v24  ;;  %v5200_v26 = vadd.f32 %v6768_v9, %v9642_v11 }
 0x63a   : > { %v6770_v39 = vpop.f32.mrf.mxu1 }
 0x63b   : > { %v5224_v34 = vmax.f32 %v5200_v26, 0.0  ;;  %v6771_v13 = vadd.f32 %v6770_v39, %v6769_v18 }
 0x63c   : > { %v6772_v56 = vpop.f32.mrf.mxu1 }
 0x63d   : > { %5241 = vst.msk [vmem:[%s9657_s18 + $0x68] sm:$0xff] %vm5227_vm2, %v5224_v34  ;;  %v5205_v33 = vadd.f32 %v6771_v13, %v9636_v12  ;;  %v5251_v11 = vpack.c.bf16 %v5224_v34, %v5223_v24  ;;  %v5249_v12 = vpack.c.bf16 %v5220_v57, %v5219_v25 }
 0x63e   : > { %v6773_v49 = vpop.f32.mrf.mxu1 }
 0x63f   : > { %v5225_v3 = vmax.f32 %v5205_v33, 0.0  ;;  %v6774_v53 = vadd.f32 %v6773_v49, %v6772_v56 }
 0x641   : > { %5242 = vst.msk [vmem:[%s9657_s18 + $0x70] sm:$0xff] %vm5227_vm2, %v5225_v3  ;;  %v5208_v51 = vadd.f32 %v6774_v53, %v9638_v31  ;;  %v5248_v31 = vpack.c.bf16 %v5218_v63, %v5217_v23 }
 0x643   : > { %v5226_v5 = vmax.f32 %v5208_v51, 0.0 }
 0x645   : > { %5243 = vst.msk [vmem:[%s9657_s18 + $0x78] sm:$0xff] %vm5227_vm2, %v5226_v5  ;;  %v5252_v40 = vpack.c.bf16 %v5226_v5, %v5225_v3  ;;  %s693_s18 = scalar_lea.vmem %s9785_s17, %s9740_s20 }
 0x647   : > { %6865 = vmatpush3.bf16.msra.mxu1 %v5252_v40 }
 0x648   : > { %6866 = vmatprep.subr.bf16.mxu1 %v7345_v4 }
 0x64b   : > { %6867 = vmatpush3.bf16.msra.mxu1 %v5251_v11 }
 0x64c   : > { %6868 = vmatprep.subr.bf16.mxu1 %v7345_v4 }
 0x64f   : > { %6869 = vmatpush3.bf16.msra.mxu1 %v5250_v19 }
 0x650   : > { %6870 = vmatprep.subr.bf16.mxu1 %v7345_v4 }
 0x653   : > { %6871 = vmatpush3.bf16.msra.mxu1 %v5249_v12 }
 0x654   : > { %6872 = vmatprep.subr.bf16.mxu1 %v7345_v4 }
 0x657   : > { %6873 = vmatpush3.bf16.msra.mxu1 %v5248_v31 }
 0x658   : > { %6874 = vmatprep.subr.bf16.mxu1 %v7345_v4 }
 0x65b   : > { %6875 = vmatpush3.bf16.msra.mxu1 %v5247_v17 }
 0x65c   : > { %6876 = vmatprep.subr.bf16.mxu1 %v7345_v4 }
 0x65f   : > { %6877 = vmatpush3.bf16.msra.mxu1 %v9669_v0 }
 0x660   : > { %6878 = vmatprep.subr.bf16.mxu1 %v7345_v4 }
 0x663   : > { %6879 = vmatpush3.bf16.msra.mxu1 %v9663_v47 }
 0x666   : > { %6881 = vmatmul.mubr.bf16.vlgmr.msra.gmra.mxu1 %v5244_v52 }
 0x726   : > { %v5287_v43 = vpop.f32.mrf.mxu1 }
 0x727   : > { %v5299_v0 = vadd.f32 %v5297_v54, %v5287_v43 }
 0x728   : > { %v6882_v62 = vpop.f32.mrf.mxu1 }
 0x729   : > { %5301 = vst.msk [vmem:[%s679_s21] sm:$0x3f] %vm5300_vm3, %v5299_v0  ;;  %v5302_v4 = vsel %vm5300_vm3, %v5299_v0, -inf }
 0x72a   : > { %v5303_v47 = vrot.slane %v5302_v4, 4  ;;  %v5290_v32 = vpop.f32.mrf.mxu1 }
 0x72c   : > { %v5304_v28 = vmax.f32 %v5302_v4, %v5303_v47  ;;  %v6883_v55 = vpop.f32.mrf.mxu1 }
 0x72e   : > { %v5305_v44 = vrot.slane %v5304_v28, 2 }
 0x730   : > { %v5306_v50 = vmax.f32 %v5304_v28, %v5305_v44 }
 0x732   : > { %v5307_v10 = vrot.slane %v5306_v50, 1 }
 0x734   : > { %v5308_v60 = vmax.f32 %v5306_v50, %v5307_v10 }
 0x736   : > { %v5309_v23 = vsub.f32 %v5299_v0, %v5308_v60 }
 0x738   : > { %v5310_v36 = vmul.f32 1.442695, %v5309_v23 }
 0x73a   : > { %7314 = vpow2.f32 %v5310_v36 }
 0x747   : > { %v7315_v41 = vpop.eup %7314 }
 0x748   : > { %v5312_v38 = vsel %vm5300_vm3, %v7315_v41, 0.0 }
 0x749   : > { %v5313_v14 = vrot.slane %v5312_v38, 4 }
 0x74b   : > { %v5314_v63 = vadd.f32 %v5313_v14, %v5312_v38 }
 0x74d   : > { %v5315_v2 = vrot.slane %v5314_v63, 2 }
 0x74f   : > { %v5316_v21 = vadd.f32 %v5315_v2, %v5314_v63 }
 0x751   : > { %v5317_v22 = vrot.slane %v5316_v21, 1 }
 0x753   : > { %v5318_v46 = vadd.f32 %v5317_v22, %v5316_v21 }
 0x755   : > { %7316 = vrcp.f32 %v5318_v46 }
 0x756   : > { %7318 = vlog2.f32 %v5318_v46 }
 0x762   : > { %v7317_v25 = vpop.eup %7316 }
 0x763   : > { %v7319_v27 = vpop.eup %7318  ;;  %v5320_v35 = vmul.f32 %v7317_v25, %v7315_v41 }
 0x764   : > { %v5323_v37 = vmul.f32 0.6931472, %v7319_v27 }
 0x765   : > { %5321 = vst.msk [vmem:[%s686_s28] sm:$0x3f] %vm5300_vm3, %v5320_v35 }
 0x766   : > { %v5324_v20 = vsub.f32 %v5309_v23, %v5323_v37 }
 0x768   : > { %5325 = vst.msk [vmem:[%s693_s18] sm:$0x3f] %vm5300_vm3, %v5324_v20 }
 0x769 PF: > { %s28_s26 = sadd.s32 1, %s7342_s26   ;;  %s9874_s24 = smov %s7338_s25 }
 0x76a   : > { %p25_p5 = scmp.ge.s32.totalorder %s28_s26, 4   ;;  %s9875_s25 = smov %s9877_s27 }
 0x76c   :  { %27 = sbr.rel (!%p25_p5) target bundleno = 3 (0x3), region = 148 }

</bundles_post_ra>
